<compile_context>
chip_gen: v5e
topology: v5e:2x2
jax: 0.10.0
libtpu: 0.0.40
codegen_flags: <defaults>
</compile_context>

<pallas_src>
import functools
import math

import jax
import jax.numpy as jnp
from jax import lax
from jax.experimental import pallas as pl
from jax.experimental.pallas import tpu as pltpu
from jax.scipy.special import erf as _erf_exact

BN_EPS = 1e-5                      # nn.BatchNorm2d default eps
_SQRT1_2 = 0.7071067811865476


# ---------------------------------------------------------------------------
# In-kernel helpers
# ---------------------------------------------------------------------------
def _erf_approx(x):
    # Abramowitz & Stegun 7.1.26, max abs error ~1.5e-7 (effectively f32-exact
    # here). Uses only exp/mul/add/div/select so it always lowers in Mosaic.
    p = 0.3275911
    a1, a2, a3, a4, a5 = (0.254829592, -0.284496736, 1.421413741,
                          -1.453152027, 1.061405429)
    sgn = jnp.where(x >= 0.0, 1.0, -1.0)
    ax = jnp.abs(x)
    t = 1.0 / (1.0 + p * ax)
    poly = t * (a1 + t * (a2 + t * (a3 + t * (a4 + t * a5))))
    return sgn * (1.0 - poly * jnp.exp(-(ax * ax)))


def _gelu(x):
    # Exact (erf-based) GELU, matching nn.GELU() (approximate='none').
    return 0.5 * x * (1.0 + _erf_approx(x * _SQRT1_2))


# ---------------------------------------------------------------------------
# Pallas kernel: fused conv1(3x3,s1)+BN1+GELU -> conv2(3x3,s2)+BN2 for one
# batch element, on a (channels, flat padded spatial) lane-dense layout.
# ---------------------------------------------------------------------------
def _stem_kernel(x_ref, w1_ref, b1_ref, w2_ref, b2_ref, mask_ref, out_ref,
                 *, starts, span, margin):
    x = x_ref[0]                                            # (Cin, Np) f32

    # conv1 as a single im2col matmul: patches1 = (9*Cin, span), K = 9*Cin.
    p1 = jnp.concatenate([x[:, s:s + span] for s in starts], axis=0)
    h = jnp.dot(w1_ref[...], p1, preferred_element_type=jnp.float32)
    h = _gelu(h + b1_ref[...])                              # BN1 folded into w1/b1
    h = h * mask_ref[...]                                   # zero the pad ring

    # Re-embed into the padded grid so conv2's taps are again static slices;
    # the zeroed ring doubles as conv2's padding=1.
    zpad = jnp.zeros((h.shape[0], margin), h.dtype)
    hf = jnp.concatenate([zpad, h, zpad], axis=1)           # (C1, Np)

    # conv2 (BN2 folded in) as a single im2col matmul (K = 9*C1), computed on
    # the full conv1 grid; the wrapper keeps only the stride-2 positions.
    p2 = jnp.concatenate([hf[:, s:s + span] for s in starts], axis=0)
    y = jnp.dot(w2_ref[...], p2, preferred_element_type=jnp.float32)
    out_ref[0] = (y + b2_ref[...]).astype(out_ref.dtype)


# ---------------------------------------------------------------------------
# Wrapper
# ---------------------------------------------------------------------------
def stem_forward(x_nchw, params):
    """StemLayer forward. x_nchw: (B, Cin, H, W) f32 -> (B, Hout, Wout, C2)
    channels_last, matching the PyTorch module with inference-mode BatchNorm."""
    w1, b1, bn1, w2, b2, bn2 = params
    B, Cin, H, W = x_nchw.shape
    C1, C2 = w1.shape[0], w2.shape[0]
    Hp, Wp = H + 2, W + 2
    Np = Hp * Wp
    M = Wp + 1                          # largest |tap offset| on the flat grid
    Ni = Np - 2 * M                     # span of positions actually computed
    Hout = (H - 1) // 2 + 1
    Wout = (W - 1) // 2 + 1

    # --- fold inference-mode BatchNorm into the convs (exact) ---------------
    def fold(w, b, bn):
        gamma, beta, rm, rv = bn
        s = gamma / jnp.sqrt(rv + BN_EPS)
        return w * s[:, None, None, None], (b - rm) * s + beta

    w1f, b1f = fold(w1, b1, bn1)
    w2f, b2f = fold(w2, b2, bn2)

    # (Cout, 9*Cin) matmul slabs, tap-major then input-channel — matches the
    # in-kernel patch construction order.
    w1r = jnp.transpose(w1f, (0, 2, 3, 1)).reshape(C1, 9 * Cin)
    w2r = jnp.transpose(w2f, (0, 2, 3, 1)).reshape(C2, 9 * C1)
    b1c, b2c = b1f[:, None], b2f[:, None]                   # (Cout, 1)

    # Spatially padded input, flattened so the lane axis is dense spatial.
    x_flat = jnp.pad(x_nchw, ((0, 0), (0, 0), (1, 1), (1, 1))).reshape(
        B, Cin, Np).astype(jnp.float32)

    # Mask of "real image" positions inside the computed span.
    q = jnp.arange(M, M + Ni)
    yy, xx = q // Wp, q % Wp
    mask = (((yy >= 1) & (yy <= H) & (xx >= 1) & (xx <= W))
            .astype(jnp.float32))[None, :]                  # (1, Ni)

    starts = tuple(M + (dy - 1) * Wp + (dx - 1)
                   for dy in range(3) for dx in range(3))
    kernel = functools.partial(_stem_kernel, starts=starts, span=Ni, margin=M)

    # Scoped-VMEM limit sized from the actual footprint (double-buffered I/O
    # blocks + weight slabs + in-kernel values), with margin, capped for v7x.
    est = 4 * (2 * (Cin * Np + C2 * Ni)
               + 9 * Cin * C1 + 9 * C1 * C2
               + Ni * (9 * Cin + 9 * C1 + 2 * C1 + 2 * C2 + 1)
               + Cin * Np + C1 * Np)
    vmem_limit = int(min(max(2 * est, 32 * 1024 * 1024), 64 * 1024 * 1024))

    out_flat = pl.pallas_call(
        kernel,
        out_shape=jax.ShapeDtypeStruct((B, C2, Ni), jnp.float32),
        grid=(B,),
        in_specs=[
            pl.BlockSpec((1, Cin, Np), lambda b: (b, 0, 0)),
            pl.BlockSpec((C1, 9 * Cin), lambda b: (0, 0)),
            pl.BlockSpec((C1, 1), lambda b: (0, 0)),
            pl.BlockSpec((C2, 9 * C1), lambda b: (0, 0)),
            pl.BlockSpec((C2, 1), lambda b: (0, 0)),
            pl.BlockSpec((1, Ni), lambda b: (0, 0)),
        ],
        out_specs=pl.BlockSpec((1, C2, Ni), lambda b: (b, 0, 0)),
        compiler_params=pltpu.CompilerParams(
            dimension_semantics=("parallel",),
            vmem_limit_bytes=vmem_limit),
    )(x_flat, w1r, b1c, w2r, b2c, mask)

    # Keep only the stride-2 output positions, then go channels_last
    # (norm2 ends with to_channels_last in the PyTorch module).
    out_full = jnp.pad(out_flat, ((0, 0), (0, 0), (M, M))).reshape(B, C2, Hp, Wp)
    out = out_full[:, :, 1:2 * Hout:2, 1:2 * Wout:2]        # (B, C2, Hout, Wout)
    return jnp.transpose(out, (0, 2, 3, 1))                 # NHWC


# ---------------------------------------------------------------------------
# Pure-JAX/XLA reference (for the correctness check only)
# ---------------------------------------------------------------------------
def ref_stem(x, params):
    w1, b1, bn1, w2, b2, bn2 = params

    def bn_eval(z, bn):
        gamma, beta, rm, rv = bn
        s = gamma / jnp.sqrt(rv + BN_EPS)
        return z * s[None, :, None, None] + (beta - rm * s)[None, :, None, None]

    def conv(z, w, b, stride):
        y = lax.conv_general_dilated(
            z, w, (stride, stride), ((1, 1), (1, 1)),
            dimension_numbers=("NCHW", "OIHW", "NCHW"))
        return y + b[None, :, None, None]

    y = bn_eval(conv(x, w1, b1, 1), bn1)
    y = 0.5 * y * (1.0 + _erf_exact(y * _SQRT1_2))          # exact GELU
    y = bn_eval(conv(y, w2, b2, 2), bn2)
    return jnp.transpose(y, (0, 2, 3, 1))                   # channels_last


if __name__ == "__main__":
    key = jax.random.PRNGKey(0)
    B, Cin, H, W = 2, 3, 16, 16          # small demo shapes
    out_chans = 96                       # StemLayer default (3 -> 48 -> 96)
    C1, C2 = out_chans // 2, out_chans

    ks = jax.random.split(key, 14)
    x = jax.random.normal(ks[0], (B, Cin, H, W), jnp.float32)

    def conv_init(kw, kb, cout, cin):
        bound = 1.0 / math.sqrt(cin * 9)
        w = jax.random.uniform(kw, (cout, cin, 3, 3), jnp.float32, -bound, bound)
        b = jax.random.uniform(kb, (cout,), jnp.float32, -bound, bound)
        return w, b

    def bn_init(kg, kb, km, kv, c):
        gamma = jax.random.uniform(kg, (c,), jnp.float32, 0.5, 1.5)
        beta = 0.1 * jax.random.normal(kb, (c,), jnp.float32)
        rmean = 0.1 * jax.random.normal(km, (c,), jnp.float32)
        rvar = jax.random.uniform(kv, (c,), jnp.float32, 0.5, 1.5)
        return gamma, beta, rmean, rvar

    w1, b1 = conv_init(ks[1], ks[2], C1, Cin)
    w2, b2 = conv_init(ks[3], ks[4], C2, C1)
    bn1 = bn_init(ks[5], ks[6], ks[7], ks[8], C1)
    bn2 = bn_init(ks[9], ks[10], ks[11], ks[12], C2)
    params = (w1, b1, bn1, w2, b2, bn2)

    out = stem_forward(x, params)
    jax.block_until_ready(out)

    ref = ref_stem(x, params)
    err = float(jnp.max(jnp.abs(out - ref)))
    assert out.shape == ref.shape, (out.shape, ref.shape)
    assert jnp.allclose(out, ref, atol=5e-4, rtol=5e-4), f"max err {err}"

    print("KERNEL_OK")
</pallas_src>

<mosaic_0001>
module attributes {stable_mosaic.version = 11 : i64} {
  func.func @_stem_kernel(%arg0: i32, %arg1: memref<1x3x324xf32, #tpu.memory_space<vmem>>, %arg2: memref<48x27xf32, #tpu.memory_space<vmem>>, %arg3: memref<48x1xf32, #tpu.memory_space<vmem>>, %arg4: memref<96x432xf32, #tpu.memory_space<vmem>>, %arg5: memref<96x1xf32, #tpu.memory_space<vmem>>, %arg6: memref<1x286xf32, #tpu.memory_space<vmem>>, %arg7: memref<1x96x286xf32, #tpu.memory_space<vmem>>) attributes {dimension_semantics = [#tpu.dimension_semantics<parallel>], iteration_bounds = array<i64: 2>, scalar_prefetch = 0 : i64, scratch_operands = 0 : i64, tpu.core_type = #tpu.core_type<tc>, window_params = [{transform_indices = @transform_0, window_bounds = array<i64: 1, 3, 324>}, {pipeline_mode = #tpu.pipeline_mode<synchronous>, transform_indices = @transform_1, window_bounds = array<i64: 48, 27>}, {pipeline_mode = #tpu.pipeline_mode<synchronous>, transform_indices = @transform_2, window_bounds = array<i64: 48, 1>}, {pipeline_mode = #tpu.pipeline_mode<synchronous>, transform_indices = @transform_3, window_bounds = array<i64: 96, 432>}, {pipeline_mode = #tpu.pipeline_mode<synchronous>, transform_indices = @transform_4, window_bounds = array<i64: 96, 1>}, {pipeline_mode = #tpu.pipeline_mode<synchronous>, transform_indices = @transform_5, window_bounds = array<i64: 1, 286>}, {transform_indices = @transform_6, window_bounds = array<i64: 1, 96, 286>}]} {
    %c0 = arith.constant 0 : index
    %c0_0 = arith.constant 0 : index
    %c0_1 = arith.constant 0 : index
    %0 = vector.load %arg1[%c0, %c0_0, %c0_1] : memref<1x3x324xf32, #tpu.memory_space<vmem>>, vector<1x3x324xf32>
    %1 = vector.shape_cast %0 : vector<1x3x324xf32> to vector<3x324xf32>
    %2 = vector.extract_strided_slice %1 {offsets = [0, 0], sizes = [3, 286], strides = [1, 1]} : vector<3x324xf32> to vector<3x286xf32>
    %3 = vector.extract_strided_slice %1 {offsets = [0, 1], sizes = [3, 286], strides = [1, 1]} : vector<3x324xf32> to vector<3x286xf32>
    %4 = vector.extract_strided_slice %1 {offsets = [0, 2], sizes = [3, 286], strides = [1, 1]} : vector<3x324xf32> to vector<3x286xf32>
    %5 = vector.extract_strided_slice %1 {offsets = [0, 18], sizes = [3, 286], strides = [1, 1]} : vector<3x324xf32> to vector<3x286xf32>
    %6 = vector.extract_strided_slice %1 {offsets = [0, 19], sizes = [3, 286], strides = [1, 1]} : vector<3x324xf32> to vector<3x286xf32>
    %7 = vector.extract_strided_slice %1 {offsets = [0, 20], sizes = [3, 286], strides = [1, 1]} : vector<3x324xf32> to vector<3x286xf32>
    %8 = vector.extract_strided_slice %1 {offsets = [0, 36], sizes = [3, 286], strides = [1, 1]} : vector<3x324xf32> to vector<3x286xf32>
    %9 = vector.extract_strided_slice %1 {offsets = [0, 37], sizes = [3, 286], strides = [1, 1]} : vector<3x324xf32> to vector<3x286xf32>
    %10 = vector.extract_strided_slice %1 {offsets = [0, 38], sizes = [3, 286], strides = [1, 1]} : vector<3x324xf32> to vector<3x286xf32>
    %11 = tpu.concatenate %2, %3, %4, %5, %6, %7, %8, %9, %10 in 0 : vector<3x286xf32>, vector<3x286xf32>, vector<3x286xf32>, vector<3x286xf32>, vector<3x286xf32>, vector<3x286xf32>, vector<3x286xf32>, vector<3x286xf32>, vector<3x286xf32> -> vector<27x286xf32>
    %c0_2 = arith.constant 0 : index
    %c0_3 = arith.constant 0 : index
    %12 = vector.load %arg2[%c0_2, %c0_3] : memref<48x27xf32, #tpu.memory_space<vmem>>, vector<48x27xf32>
    %cst = arith.constant dense<0.000000e+00> : vector<48x286xf32>
    %13 = tpu.matmul %12, %11, %cst {dimension_numbers = #tpu.dot_dimension_numbers<[1], [0], [0], [1], [0, 0, 1, 1], [], []>} : vector<48x27xf32>, vector<27x286xf32>, vector<48x286xf32> -> vector<48x286xf32>
    %c0_4 = arith.constant 0 : index
    %c0_5 = arith.constant 0 : index
    %14 = vector.load %arg3[%c0_4, %c0_5] : memref<48x1xf32, #tpu.memory_space<vmem>>, vector<48x1xf32>
    %15 = vector.broadcast %14 : vector<48x1xf32> to vector<48x286xf32>
    %16 = arith.addf %13, %15 : vector<48x286xf32>
    %cst_6 = arith.constant 5.000000e-01 : f32
    %17 = vector.broadcast %cst_6 : f32 to vector<48x286xf32>
    %18 = arith.mulf %17, %16 : vector<48x286xf32>
    %cst_7 = arith.constant 0.707106769 : f32
    %19 = vector.broadcast %cst_7 : f32 to vector<48x286xf32>
    %20 = arith.mulf %16, %19 : vector<48x286xf32>
    %cst_8 = arith.constant 0.000000e+00 : f32
    %21 = vector.broadcast %cst_8 : f32 to vector<48x286xf32>
    %22 = arith.cmpf oge, %20, %21 : vector<48x286xf32>
    %cst_9 = arith.constant 1.000000e+00 : f32
    %cst_10 = arith.constant -1.000000e+00 : f32
    %23 = vector.broadcast %cst_9 : f32 to vector<48x286xf32>
    %24 = vector.broadcast %cst_10 : f32 to vector<48x286xf32>
    %25 = arith.select %22, %23, %24 : vector<48x286xi1>, vector<48x286xf32>
    %26 = math.absf %20 : vector<48x286xf32>
    %cst_11 = arith.constant 0.327591091 : f32
    %27 = vector.broadcast %cst_11 : f32 to vector<48x286xf32>
    %28 = arith.mulf %27, %26 : vector<48x286xf32>
    %cst_12 = arith.constant 1.000000e+00 : f32
    %29 = vector.broadcast %cst_12 : f32 to vector<48x286xf32>
    %30 = arith.addf %29, %28 : vector<48x286xf32>
    %cst_13 = arith.constant 1.000000e+00 : f32
    %31 = vector.broadcast %cst_13 : f32 to vector<48x286xf32>
    %32 = arith.divf %31, %30 : vector<48x286xf32>
    %cst_14 = arith.constant 1.06140542 : f32
    %33 = vector.broadcast %cst_14 : f32 to vector<48x286xf32>
    %34 = arith.mulf %32, %33 : vector<48x286xf32>
    %cst_15 = arith.constant -1.45315206 : f32
    %35 = vector.broadcast %cst_15 : f32 to vector<48x286xf32>
    %36 = arith.addf %35, %34 : vector<48x286xf32>
    %37 = arith.mulf %32, %36 : vector<48x286xf32>
    %cst_16 = arith.constant 1.42141378 : f32
    %38 = vector.broadcast %cst_16 : f32 to vector<48x286xf32>
    %39 = arith.addf %38, %37 : vector<48x286xf32>
    %40 = arith.mulf %32, %39 : vector<48x286xf32>
    %cst_17 = arith.constant -0.284496725 : f32
    %41 = vector.broadcast %cst_17 : f32 to vector<48x286xf32>
    %42 = arith.addf %41, %40 : vector<48x286xf32>
    %43 = arith.mulf %32, %42 : vector<48x286xf32>
    %cst_18 = arith.constant 0.254829586 : f32
    %44 = vector.broadcast %cst_18 : f32 to vector<48x286xf32>
    %45 = arith.addf %44, %43 : vector<48x286xf32>
    %46 = arith.mulf %32, %45 : vector<48x286xf32>
    %47 = arith.mulf %26, %26 : vector<48x286xf32>
    %cst_19 = arith.constant 0.000000e+00 : f32
    %48 = vector.broadcast %cst_19 : f32 to vector<48x286xf32>
    %49 = arith.subf %48, %47 : vector<48x286xf32>
    %50 = math.exp %49 : vector<48x286xf32>
    %51 = arith.mulf %46, %50 : vector<48x286xf32>
    %cst_20 = arith.constant 1.000000e+00 : f32
    %52 = vector.broadcast %cst_20 : f32 to vector<48x286xf32>
    %53 = arith.subf %52, %51 : vector<48x286xf32>
    %54 = arith.mulf %25, %53 : vector<48x286xf32>
    %cst_21 = arith.constant 1.000000e+00 : f32
    %55 = vector.broadcast %cst_21 : f32 to vector<48x286xf32>
    %56 = arith.addf %55, %54 : vector<48x286xf32>
    %57 = arith.mulf %18, %56 : vector<48x286xf32>
    %c0_22 = arith.constant 0 : index
    %c0_23 = arith.constant 0 : index
    %58 = vector.load %arg6[%c0_22, %c0_23] : memref<1x286xf32, #tpu.memory_space<vmem>>, vector<1x286xf32>
    %59 = vector.broadcast %58 : vector<1x286xf32> to vector<48x286xf32>
    %60 = arith.mulf %57, %59 : vector<48x286xf32>
    %cst_24 = arith.constant 0.000000e+00 : f32
    %61 = vector.broadcast %cst_24 : f32 to vector<48x19xf32>
    %62 = tpu.concatenate %61, %60, %61 in 1 : vector<48x19xf32>, vector<48x286xf32>, vector<48x19xf32> -> vector<48x324xf32>
    %63 = vector.extract_strided_slice %62 {offsets = [0, 0], sizes = [48, 286], strides = [1, 1]} : vector<48x324xf32> to vector<48x286xf32>
    %64 = vector.extract_strided_slice %62 {offsets = [0, 1], sizes = [48, 286], strides = [1, 1]} : vector<48x324xf32> to vector<48x286xf32>
    %65 = vector.extract_strided_slice %62 {offsets = [0, 2], sizes = [48, 286], strides = [1, 1]} : vector<48x324xf32> to vector<48x286xf32>
    %66 = vector.extract_strided_slice %62 {offsets = [0, 18], sizes = [48, 286], strides = [1, 1]} : vector<48x324xf32> to vector<48x286xf32>
    %67 = vector.extract_strided_slice %62 {offsets = [0, 19], sizes = [48, 286], strides = [1, 1]} : vector<48x324xf32> to vector<48x286xf32>
    %68 = vector.extract_strided_slice %62 {offsets = [0, 20], sizes = [48, 286], strides = [1, 1]} : vector<48x324xf32> to vector<48x286xf32>
    %69 = vector.extract_strided_slice %62 {offsets = [0, 36], sizes = [48, 286], strides = [1, 1]} : vector<48x324xf32> to vector<48x286xf32>
    %70 = vector.extract_strided_slice %62 {offsets = [0, 37], sizes = [48, 286], strides = [1, 1]} : vector<48x324xf32> to vector<48x286xf32>
    %71 = vector.extract_strided_slice %62 {offsets = [0, 38], sizes = [48, 286], strides = [1, 1]} : vector<48x324xf32> to vector<48x286xf32>
    %72 = tpu.concatenate %63, %64, %65, %66, %67, %68, %69, %70, %71 in 0 : vector<48x286xf32>, vector<48x286xf32>, vector<48x286xf32>, vector<48x286xf32>, vector<48x286xf32>, vector<48x286xf32>, vector<48x286xf32>, vector<48x286xf32>, vector<48x286xf32> -> vector<432x286xf32>
    %c0_25 = arith.constant 0 : index
    %c0_26 = arith.constant 0 : index
    %73 = vector.load %arg4[%c0_25, %c0_26] : memref<96x432xf32, #tpu.memory_space<vmem>>, vector<96x432xf32>
    %cst_27 = arith.constant dense<0.000000e+00> : vector<96x286xf32>
    %74 = tpu.matmul %73, %72, %cst_27 {dimension_numbers = #tpu.dot_dimension_numbers<[1], [0], [0], [1], [0, 0, 1, 1], [], []>} : vector<96x432xf32>, vector<432x286xf32>, vector<96x286xf32> -> vector<96x286xf32>
    %c0_28 = arith.constant 0 : index
    %c0_29 = arith.constant 0 : index
    %75 = vector.load %arg5[%c0_28, %c0_29] : memref<96x1xf32, #tpu.memory_space<vmem>>, vector<96x1xf32>
    %76 = vector.broadcast %75 : vector<96x1xf32> to vector<96x286xf32>
    %77 = arith.addf %74, %76 : vector<96x286xf32>
    %c0_30 = arith.constant 0 : index
    %c0_31 = arith.constant 0 : index
    %c0_32 = arith.constant 0 : index
    %78 = vector.load %arg7[%c0_30, %c0_31, %c0_32] : memref<1x96x286xf32, #tpu.memory_space<vmem>>, vector<1x96x286xf32>
    %79 = vector.shape_cast %78 : vector<1x96x286xf32> to vector<96x286xf32>
    %80 = vector.shape_cast %77 : vector<96x286xf32> to vector<1x96x286xf32>
    tpu.vector_store %arg7[%c0_30, %c0_31, %c0_32], %80 {strides = array<i32>} : memref<1x96x286xf32, #tpu.memory_space<vmem>>, vector<1x96x286xf32>,
    return
  }
  func.func @transform_0(%arg0: i32) -> (i32, i32, i32) {
    %c0_i32 = arith.constant 0 : i32
    %c0_i32_0 = arith.constant 0 : i32
    %c0_i32_1 = arith.constant 0 : i32
    return %arg0, %c0_i32, %c0_i32_0 : i32, i32, i32
  }
  func.func @transform_1(%arg0: i32) -> (i32, i32) {
    %c0_i32 = arith.constant 0 : i32
    %c0_i32_0 = arith.constant 0 : i32
    %c0_i32_1 = arith.constant 0 : i32
    return %c0_i32, %c0_i32_0 : i32, i32
  }
  func.func @transform_2(%arg0: i32) -> (i32, i32) {
    %c0_i32 = arith.constant 0 : i32
    %c0_i32_0 = arith.constant 0 : i32
    %c0_i32_1 = arith.constant 0 : i32
    return %c0_i32, %c0_i32_0 : i32, i32
  }
  func.func @transform_3(%arg0: i32) -> (i32, i32) {
    %c0_i32 = arith.constant 0 : i32
    %c0_i32_0 = arith.constant 0 : i32
    %c0_i32_1 = arith.constant 0 : i32
    return %c0_i32, %c0_i32_0 : i32, i32
  }
  func.func @transform_4(%arg0: i32) -> (i32, i32) {
    %c0_i32 = arith.constant 0 : i32
    %c0_i32_0 = arith.constant 0 : i32
    %c0_i32_1 = arith.constant 0 : i32
    return %c0_i32, %c0_i32_0 : i32, i32
  }
  func.func @transform_5(%arg0: i32) -> (i32, i32) {
    %c0_i32 = arith.constant 0 : i32
    %c0_i32_0 = arith.constant 0 : i32
    %c0_i32_1 = arith.constant 0 : i32
    return %c0_i32, %c0_i32_0 : i32, i32
  }
  func.func @transform_6(%arg0: i32) -> (i32, i32, i32) {
    %c0_i32 = arith.constant 0 : i32
    %c0_i32_0 = arith.constant 0 : i32
    %c0_i32_1 = arith.constant 0 : i32
    return %arg0, %c0_i32, %c0_i32_0 : i32, i32, i32
  }
}

</mosaic_0001>

<bundles_post_ra>
// kernel: tpu_custom_call.1
= control target key start
LH: loop header
LB: loop body
LE: loop exit
PB: predicated region body
PF: predicated region fallthrough
CT: control target
= control target key end

     0   :  { %11 = vsyncpa [#allocation3], 0  ;;  %s3629_s21 = smov 0   ;;  %s6144_s0 = inlined_call_operand.vmem [shape: f32[2,3,324], index: 0, kind: input, shape index: {}]   ;;  %s6145_s1 = inlined_call_operand.vmem [shape: f32[48,27], index: 1, kind: input, shape index: {}]   ;;  %s6146_s2 = inlined_call_operand.vmem [shape: f32[48,1], index: 2, kind: input, shape index: {}]   ;;  %s6147_s3 = inlined_call_operand.hbm [shape: f32[96,432], index: 3, kind: input, shape index: {}]   ;;  %s6148_s4 = inlined_call_operand.vmem [shape: f32[96,1], index: 4, kind: input, shape index: {}]   ;;  %s6149_s5 = inlined_call_operand.vmem [shape: f32[1,286], index: 5, kind: input, shape index: {}]   ;;  %s6150_s6 = inlined_call_operand.vmem [shape: f32[2,96,286], index: 6, kind: output, shape index: {}]  }
   0x1 LB: > { %s196_s24 = sshll.u32 %s6147_s3, 4  ;;  %s2923_s25 = sadd.s32 4294967295, %s3578_s21   ;;  %s3578_s21 = sphi %s3629_s21, %s17_s21   ;;  %s197_s24 = int_to_ptr.hbm [resolvable:$true] %s196_s24 }
   0x2   : > { %p2925_p0 = scmp.ge.s32.totalorder %s3578_s21, 1  ;;  %p179_p1 = scmp.lt.s32.totalorder %s3578_s21, 3 }
   0x3   : > { %p3045_p2 = scmp.eq.s32.totalorder %s2923_s25, 0  ;;  %s3580_s26 = smov [#allocation2]  }
   0x4   : > { %p180_p3 = pnand %p2925_p0, %p179_p1  ;;  %s198_s27 = sshll.u32 %s3580_s26, 4  ;;  %s199_s27 = int_to_ptr.vmem [resolvable:$true] %s198_s27 }
   0x5   : > { %s3581_s28 = smov 512   ;;  %s3582_s29 = smov 32  }
   0x6   : > { %p3041_p4 = pneg %p180_p3  ;;  %228 = sbr.rel (%p180_p3) target bundleno = 1295 (0x50f), region = 44 }
   0x8   : > { %p3042_p5 = pnand %p3045_p2, %p3041_p4 }
   0xa   : > { %3044 = dma.hbm_to_vmem [thread:$0]  (!%p3042_p5), %s197_s24, 6144, %s199_s27, [#allocation3], %s3581_s28, %s3581_s28, %s3582_s29  }
   0xb   : > { %3573 = dma.done.wait (%p3045_p2), [#allocation3], 6144  }
   0xc   : > { %3575 = vsyncadd (%p3045_p2), [#allocation3], 4294961152  ;;  %p259_p6 = scmp.lt.s32.totalorder %s2923_s25, 1  ;;  %s3583_s10 = smov 127   ;;  %vm318_vm0 = vcmask 1031168   ;;  %vm6164_vm1 = vcmask 900096  }
   0xd   : > { %s3584_s11 = smov 126   ;;  %s3585_s12 = smov 109   ;;  %vm6163_vm2 = vcmask 736256   ;;  %vm400_vm3 = vcmask 752640   ;;  %vm379_vm4 = vcmask 883712   ;;  %vm450_vm5 = vcmask 1040384  }
   0xe   : > { %s6490_s25 = smov (!%p259_p6, %s2923_s25), 1  ;;  %s3586_s13 = smov 110   ;;  %vm442_vm6 = vcmask 1042432   ;;  %vm462_vm7 = vcmask 1041408   ;;  %vm421_vm8 = vcmask 744448   ;;  %vm466_vm9 = vcmask 1044480  }
   0xf   : > { %s3035_s30 = smul.u32 12, %s6490_s25  ;;  %s3587_s14 = smov 108   ;;  %vm358_vm10 = vcmask 891904   ;;  %vm297_vm11 = vcmask 1039360   ;;  %vm454_vm12 = vcmask 1043456   ;;  %vm458_vm13 = vcmask 1046528  }
  0x10   : > { %s3588_s15 = smov 92   ;;  %s3589_s16 = smov 90   ;;  %vm446_vm14 = vcmask 1045504   ;;  %vm512_vm15 = vcmask 220160  }
  0x11   : > { %s263_s9 = scalar_lea.vmem %s6144_s0, %s3035_s30  ;;  %s3590_s17 = smov 91  }
  0x12   : > { %v3646_v0 = vld [vmem:[%s263_s9] sm:$0x77]  ;;  %v3648_v1 = vld [vmem:[%s263_s9 + $0x8] sm:$0x7]  ;;  %s3593_s8 = smov 19  }
  0x13   : > { %273 = vst [vmem:[#allocation1] ss:$2 sm:$0xff] %v3646_v0 }
  0x14   : > { %275 = vst [vmem:[#allocation1 + $0x10] ss:$2 sm:$0xff] %v3648_v1 }
  0x1a   : > { %v3652_v2 = vld.sshfl [vmem:[#allocation1] sm:$0xff pattern:$0x75316420]  ;;  %v3654_v3 = vld.sshfl [vmem:[#allocation1 + $0x8] sm:$0xff pattern:$0x75316420] }
  0x1b   : > { %v3656_v4 = vld.sshfl [vmem:[#allocation1 + $0x10] sm:$0xff pattern:$0x75316420]  ;;  %282 = vst [vmem:[#allocation1] ss:$2 sm:$0xff] %v3646_v0 }
  0x1c   : > { %284 = vst [vmem:[#allocation1 + $0x10] ss:$2 sm:$0xff] %v3648_v1 }
  0x22   : > { %v3660_v5 = vld.sshfl [vmem:[#allocation1] sm:$0xff pattern:$0x75316420]  ;;  %v286_v6 = vld.sshfl [vmem:[#allocation1 + $0x8] sm:$0xff pattern:$0x75316420] }
  0x23   : > { %v287_v7 = vld.sshfl [vmem:[#allocation1 + $0x10] sm:$0xff pattern:$0x75316420]  ;;  %303 = vst [vmem:[#allocation1] ss:$2 sm:$0xff] %v3646_v0  ;;  %v289_v8 = vrot.slane %v286_v6, 5 }
  0x24   : > { %305 = vst [vmem:[#allocation1 + $0x10] ss:$2 sm:$0xff] %v3648_v1  ;;  %v290_v9 = vrot.slane %v287_v7, 5  ;;  %v288_v53 = vrot.slane %v3660_v5, 5 }
  0x26   : > { %v3069_v12 = vpack.i.bf16 %v290_v9, %v289_v8 }
  0x28   : > { %3070 = vrot.lane.b32.xlu2 %v3069_v12, %s3583_s10  ;;  %v477_v12 = vld [vmem:[%s6146_s2 + $0x8] sm:$0xff] }
  0x2a   : > { %v3664_v10 = vld.sshfl [vmem:[#allocation1] sm:$0xff pattern:$0x75316420]  ;;  %v307_v11 = vld.sshfl [vmem:[#allocation1 + $0x8] sm:$0xff pattern:$0x75316420] }
  0x2b   : > { %v308_v13 = vld.sshfl [vmem:[#allocation1 + $0x10] sm:$0xff pattern:$0x75316420]  ;;  %324 = vst [vmem:[#allocation1] ss:$2 sm:$0xff] %v3646_v0  ;;  %v310_v14 = vrot.slane %v307_v11, 2 }
  0x2c   : > { %326 = vst [vmem:[#allocation1 + $0x10] ss:$2 sm:$0xff] %v3648_v1  ;;  %v311_v15 = vrot.slane %v308_v13, 2  ;;  %v309_v51 = vrot.slane %v3664_v10, 2 }
  0x2e   : > { %v3074_v18 = vpack.i.bf16 %v311_v15, %v310_v14 }
  0x30   : > { %3075 = vrot.lane.b32.xlu2 %v3074_v18, %s3584_s11 }
  0x32   : > { %v3669_v16 = vld.sshfl [vmem:[#allocation1] sm:$0xff pattern:$0x75316420]  ;;  %v328_v17 = vld.sshfl [vmem:[#allocation1 + $0x8] sm:$0xff pattern:$0x75316420] }
  0x33   : > { %v329_v19 = vld.sshfl [vmem:[#allocation1 + $0x10] sm:$0xff pattern:$0x75316420]  ;;  %346 = vst [vmem:[#allocation1 + $0x1] ss:$2 sm:$0xff] %v3646_v0  ;;  %v331_v24 = vrot.slane %v328_v17, 7 }
  0x34   : > { %348 = vst [vmem:[#allocation1 + $0x11] ss:$2 sm:$0xff] %v3648_v1  ;;  %v332_v25 = vrot.slane %v329_v19, 7  ;;  %v330_v52 = vrot.slane %v3669_v16, 7 }
  0x36   : > { %v3079_v26 = vpack.i.bf16 %v332_v25, %v331_v24 }
  0x38   : > { %3080 = vrot.lane.b32.xlu2 %v3079_v26, %s3586_s13 }
  0x3a   : > { %v349_v20 = vld.sshfl [vmem:[#allocation1] sm:$0xff pattern:$0x75316420]  ;;  %v350_v21 = vld.sshfl [vmem:[#allocation1 + $0x8] sm:$0xff pattern:$0x75316420] }
  0x3b   : > { %v351_v22 = vld.sshfl [vmem:[#allocation1 + $0x10] sm:$0xff pattern:$0x75316420]  ;;  %364 = vst [vmem:[#allocation1] ss:$2 sm:$0xff] %v3646_v0 }
  0x3c   : > { %366 = vst [vmem:[#allocation1 + $0x10] ss:$2 sm:$0xff] %v3648_v1  ;;  %v3084_v23 = vpack.i.bf16 %v351_v22, %v350_v21  ;;  %v3591_v21 = vmov 0  }
  0x3d   : > { %3106 = vset.pattern.permute.xlu1 %v3591_v21  ;;  %3104 = vset.pattern.permute.xlu2 %v3591_v21 }
  0x3e   : > { %3085 = vrot.lane.b32.xlu1 %v3084_v23, %s3585_s12  ;;  %3105 = vset.pattern.permute.xlu0 %v3591_v21 }
  0x42   : > { %v368_v27 = vld.sshfl [vmem:[#allocation1 + $0x8] sm:$0xff pattern:$0x75316420]  ;;  %v367_v28 = vld.sshfl [vmem:[#allocation1] sm:$0xff pattern:$0x75316420] }
  0x43   : > { %v369_v29 = vld.sshfl [vmem:[#allocation1 + $0x10] sm:$0xff pattern:$0x75316420]  ;;  %v371_v30 = vrot.slane %v368_v27, 1  ;;  %385 = vst [vmem:[#allocation1] ss:$2 sm:$0xff] %v3646_v0 }
  0x44   : > { %v372_v31 = vrot.slane %v369_v29, 1  ;;  %387 = vst [vmem:[#allocation1 + $0x10] ss:$2 sm:$0xff] %v3648_v1  ;;  %v370_v33 = vrot.slane %v367_v28, 1  ;;  %v479_v28 = vld [vmem:[%s6146_s2 + $0x18] sm:$0xff] }
  0x46   : > { %v3089_v32 = vpack.i.bf16 %v372_v31, %v371_v30 }
  0x48   : > { %3090 = vrot.lane.b32.xlu0 %v3089_v32, %s3587_s14 }
  0x4a   : > { %v388_v35 = vld.sshfl [vmem:[#allocation1] sm:$0xff pattern:$0x75316420]  ;;  %v389_v36 = vld.sshfl [vmem:[#allocation1 + $0x8] sm:$0xff pattern:$0x75316420] }
  0x4b   : > { %v390_v34 = vld.sshfl [vmem:[#allocation1 + $0x10] sm:$0xff pattern:$0x75316420]  ;;  %v391_v37 = vrot.slane %v388_v35, 6  ;;  %406 = vst [vmem:[#allocation1] ss:$2 sm:$0xff] %v3646_v0 }
  0x4c   : > { %408 = vst [vmem:[#allocation1 + $0x10] ss:$2 sm:$0xff] %v3648_v1  ;;  %v392_v38 = vrot.slane %v389_v36, 6  ;;  %v393_v39 = vrot.slane %v390_v34, 6 }
  0x4d   : > { %394 = vrot.lane.b32.xlu1 %v391_v37, %s3588_s15 }
  0x4e   : > { %v3094_v40 = vpack.i.bf16 %v393_v39, %v392_v38 }
  0x50   : > { %373 = vrot.lane.b32.xlu0 %v370_v33, %s3587_s14 }
  0x52   : > { %v409_v42 = vld.sshfl [vmem:[#allocation1] sm:$0xff pattern:$0x75316420]  ;;  %v410_v43 = vld.sshfl [vmem:[#allocation1 + $0x8] sm:$0xff pattern:$0x75316420] }
  0x53   : > { %v411_v41 = vld.sshfl [vmem:[#allocation1 + $0x10] sm:$0xff pattern:$0x75316420]  ;;  %427 = vst [vmem:[#allocation1] ss:$2 sm:$0xff] %v3646_v0  ;;  %v413_v44 = vrot.slane %v410_v43, 3 }
  0x54   : > { %429 = vst [vmem:[#allocation1 + $0x10] ss:$2 sm:$0xff] %v3648_v1  ;;  %v414_v45 = vrot.slane %v411_v41, 3  ;;  %v412_v49 = vrot.slane %v409_v42, 3  ;;  %v478_v41 = vld [vmem:[%s6146_s2 + $0x10] sm:$0xff] }
  0x56   : > { %v3099_v46 = vpack.i.bf16 %v414_v45, %v413_v44 }
  0x58   : > { %3095 = vrot.lane.b32.xlu0 %v3094_v40, %s3588_s15 }
  0x5a   : > { %v431_v47 = vld.sshfl [vmem:[#allocation1 + $0x8] sm:$0xff pattern:$0x75316420]  ;;  %v430_v48 = vld.sshfl [vmem:[#allocation1] sm:$0xff pattern:$0x75316420] }
  0x5b   : > { %435 = vrot.lane.b32.xlu1 %v431_v47, %s3589_s16  ;;  %433 = vrot.lane.b32.xlu2 %v430_v48, %s3589_s16  ;;  %v432_v50 = vld.sshfl [vmem:[#allocation1 + $0x10] sm:$0xff pattern:$0x75316420] }
  0x60   : > { %3100 = vrot.lane.b32.xlu0 %v3099_v46, %s3590_s17 }
  0x63   : > { %437 = vrot.lane.b32.xlu1 %v432_v50, %s3589_s16  ;;  %415 = vrot.lane.b32.xlu2 %v412_v49, %s3590_s17 }
  0x68   : > { %312 = vrot.lane.b32.xlu0 %v309_v51, %s3584_s11  ;;  %v470_v51 = vld [vmem:[%s6145_s1] sm:$0xff] }
  0x6b   : > { %333 = vrot.lane.b32.xlu1 %v330_v52, %s3586_s13  ;;  %499 = vperm.xlu2 %3104, %v479_v28   ;;  %v476_v52 = vld [vmem:[%s6146_s2] sm:$0xff] }
  0x70   : > { %352 = vrot.lane.b32.xlu0 %v349_v20, %s3585_s12 }
  0x73   : > { %291 = vrot.lane.b32.xlu1 %v288_v53, %s3583_s10  ;;  %484 = vperm.xlu2 %3104, %v476_v52  }
  0x78   : > { %494 = vperm.xlu0 %3105, %v478_v41  }
  0x7b   : > { %489 = vperm.xlu1 %3106, %v477_v12  }
  0x82   : > { %v3700_v54 = vpop.permute.xlu2 %3070 }
  0x83   : > { %v3073_v5 = vunpack.i.h.bf16 %v3700_v54  ;;  %v3072_v6 = vunpack.i.l.bf16 %v3700_v54  ;;  %v472_v54 = vld [vmem:[%s6145_s1 + $0x10] sm:$0xff] }
  0x85   : > { %v299_v36 = vsel %vm297_vm11, %v3072_v6, %v3073_v5  ;;  %v445_v47 = vsel %vm442_vm6, %v3656_v4, %v3073_v5  ;;  %v471_v5 = vld [vmem:[%s6145_s1 + $0x8] sm:$0xff] }
  0x86   : > { %v444_v49 = vsel %vm442_vm6, %v3654_v3, %v299_v36 }
  0x8a   : > { %v3702_v55 = vpop.permute.xlu2 %3075 }
  0x8b   : > { %v3713_v63 = vunpack.i.h.bf16 %v3702_v55  ;;  %v3077_v0 = vunpack.i.l.bf16 %v3702_v55  ;;  %v480_v55 = vld [vmem:[%s6146_s2 + $0x20] sm:$0xff] }
  0x8c   : > { %504 = vperm.xlu2 %3104, %v480_v55  }
  0x8d   : > { %v3723_v7 = vsel %vm318_vm0, %v3077_v0, %v3713_v63  ;;  %v449_v4 = vsel %vm446_vm14, %v445_v47, %v3713_v63 }
  0x8e   : > { %v448_v3 = vsel %vm446_vm14, %v444_v49, %v3723_v7 }
  0x92   : > { %v3708_v58 = vpop.permute.xlu2 %3080 }
  0x93   : > { %v3083_v8 = vunpack.i.h.bf16 %v3708_v58  ;;  %v3082_v9 = vunpack.i.l.bf16 %v3708_v58 }
  0x95   : > { %v341_v22 = vsel %vm6164_vm1, %v3082_v9, %v3083_v8  ;;  %v453_v30 = vsel %vm450_vm5, %v3713_v63, %v3083_v8  ;;  %v474_v8 = vld [vmem:[%s6145_s1 + $0x20] sm:$0xff] }
  0x96   : > { %v452_v33 = vsel %vm450_vm5, %v3723_v7, %v341_v22 }
  0xb0   : > { %v3706_v57 = vpop.permute.xlu1 %3085 }
  0xb1   : > { %v3088_v14 = vunpack.i.h.bf16 %v3706_v57  ;;  %v3087_v18 = vunpack.i.l.bf16 %v3706_v57 }
  0xb3   : > { %v360_v32 = vsel %vm358_vm10, %v3087_v18, %v3088_v14  ;;  %v457_v40 = vsel %vm454_vm12, %v453_v30, %v3088_v14 }
  0xb4   : > { %v456_v45 = vsel %vm454_vm12, %v452_v33, %v360_v32 }
  0xb5   : > { %v434_v61 = vpop.permute.xlu2 %433 }
  0xba   : > { %v3704_v56 = vpop.permute.xlu0 %3090 }
  0xbb   : > { %v3092_v13 = vunpack.i.l.bf16 %v3704_v56  ;;  %v3093_v25 = vunpack.i.h.bf16 %v3704_v56  ;;  %v481_v56 = vld [vmem:[%s6146_s2 + $0x28] sm:$0xff] }
  0xbc   : > { %509 = vperm.xlu1 %3106, %v481_v56  }
  0xbd   : > { %v416_v16 = vpop.permute.xlu2 %415  ;;  %v381_v39 = vsel %vm379_vm4, %v3092_v13, %v3093_v25  ;;  %v461_v48 = vsel %vm458_vm13, %v457_v40, %v3093_v25 }
  0xbe   : > { %v460_v50 = vsel %vm458_vm13, %v456_v45, %v381_v39 }
  0xbf   : > { %v395_v60 = vpop.permute.xlu1 %394 }
  0xc2   : > { %v374_v59 = vpop.permute.xlu0 %373 }
  0xc3   : > { %v3742_v23 = vsel %vm379_vm4, %v374_v59, %v3092_v13 }
  0xca   : > { %v3710_v62 = vpop.permute.xlu0 %3095 }
  0xcb   : > { %v3097_v1 = vunpack.i.l.bf16 %v3710_v62  ;;  %v3098_v19 = vunpack.i.h.bf16 %v3710_v62 }
  0xcd   : > { %v436_v10 = vpop.permute.xlu1 %435  ;;  %v401_v17 = vsel %vm400_vm3, %v395_v60, %v3097_v1  ;;  %v402_v31 = vsel %vm400_vm3, %v3097_v1, %v3098_v19  ;;  %v465_v38 = vsel %vm462_vm7, %v3093_v25, %v3098_v19 }
  0xce   : > { %v440_v11 = vsel %vm6163_vm2, %v434_v61, %v436_v10  ;;  %v463_v27 = vsel %vm462_vm7, %v3742_v23, %v401_v17  ;;  %v464_v43 = vsel %vm462_vm7, %v381_v39, %v402_v31 }
  0xcf   : > { %2932 = vmatpush.msk.msra.mxu0 %vm442_vm6, %v440_v11  ;;  %3009 = vmatpush.msk.msra.mxu3 %vm442_vm6, %v440_v11 }
  0xd2   : > { %v3101_v15 = vpop.permute.xlu0 %3100 }
  0xd3   : > { %v3102_v20 = vunpack.i.l.bf16 %v3101_v15  ;;  %v3103_v24 = vunpack.i.h.bf16 %v3101_v15 }
  0xd5   : > { %v422_v26 = vsel %vm421_vm8, %v416_v16, %v3102_v20  ;;  %v438_v34 = vpop.permute.xlu1 %437  ;;  %v423_v35 = vsel %vm421_vm8, %v3102_v20, %v3103_v24  ;;  %v469_v42 = vsel %vm466_vm9, %v465_v38, %v3103_v24 }
  0xd6   : > { %v467_v29 = vsel %vm466_vm9, %v463_v27, %v422_v26  ;;  %2946 = vmatpush.msk.msra.mxu2 %vm442_vm6, %v438_v34  ;;  %v441_v37 = vsel %vm6163_vm2, %v436_v10, %v438_v34  ;;  %v468_v46 = vsel %vm466_vm9, %v464_v43, %v423_v35  ;;  %v3855_v10 = vpop.permute.xlu2 %499 }
  0xd7   : > { %550 = vmatpush.msra.mxu0 %v467_v29  ;;  %3010 = vmatpush.msra.mxu3 %v467_v29 }
  0xd8   : > { %2939 = vmatpush.msk.msra.mxu1 %vm442_vm6, %v441_v37  ;;  %620 = vmatpush.msra.mxu2 %v469_v42 }
  0xda   : > { %v313_v44 = vpop.permute.xlu0 %312  ;;  %585 = vmatpush.msra.mxu1 %v468_v46  ;;  %621 = vmatpush.msra.mxu2 %v461_v48 }
  0xdb   : > { %v319_v60 = vsel %vm318_vm0, %v313_v44, %v3077_v0 }
  0xdc   : > { %586 = vmatpush.msra.mxu1 %v460_v50  ;;  %622 = vmatpush.msra.mxu2 %v449_v4 }
  0xdd   : > { %2947 = vmatmul.msk.f32.vlgmr.msra.gmra.mxu2 %vm512_vm15, %v470_v51  ;;  %v334_v53 = vpop.permute.xlu1 %333 }
  0xde   : > { %587 = vmatpush.msra.mxu1 %v448_v3  ;;  %v340_v59 = vsel %vm6164_vm1, %v334_v53, %v3082_v9  ;;  %v485_v11 = vpop.permute.xlu2 %484 }
  0xdf   : > { %2940 = vmatmul.msk.f32.vlgmr.msra.gmra.mxu1 %vm512_vm15, %v470_v51  ;;  %v451_v62 = vsel %vm450_vm5, %v319_v60, %v340_v59 }
  0xe2   : > { %v353_v61 = vpop.permute.xlu0 %352 }
  0xe3   : > { %v359_v63 = vsel %vm358_vm10, %v353_v61, %v3087_v18 }
  0xe4   : > { %v455_v1 = vsel %vm454_vm12, %v451_v62, %v359_v63 }
  0xe5   : > { %v459_v58 = vsel %vm458_vm13, %v455_v1, %v3742_v23  ;;  %2948 = vmatmul.msk.f32.gmra.mxu2 %vm512_vm15, %v471_v5  ;;  %v292_v57 = vpop.permute.xlu1 %291 }
  0xe6   : > { %551 = vmatpush.msra.mxu0 %v459_v58  ;;  %3011 = vmatpush.msra.mxu3 %v459_v58  ;;  %v298_v0 = vsel %vm297_vm11, %v292_v57, %v3072_v6  ;;  %v473_v6 = vld [vmem:[%s6145_s1 + $0x18] sm:$0xff]  ;;  %v3902_v61 = vpop.permute.xlu2 %504 }
  0xe7   : > { %2941 = vmatmul.msk.f32.gmra.mxu1 %vm512_vm15, %v471_v5  ;;  %v443_v7 = vsel %vm442_vm6, %v3652_v2, %v298_v0  ;;  %v475_v2 = vld [vmem:[%s6145_s1 + $0x28] sm:$0xff] }
  0xe8   : > { %v447_v9 = vsel %vm446_vm14, %v443_v7, %v319_v60 }
  0xe9   : > { %552 = vmatpush.msra.mxu0 %v447_v9  ;;  %3012 = vmatpush.msra.mxu3 %v447_v9 }
  0xea   : > { %2933 = vmatmul.msk.f32.vlgmr.msra.gmra.mxu0 %vm512_vm15, %v470_v51  ;;  %2937 = vmatmul.msk.f32.vlgmr.msra.gmra.mxu3 %vm512_vm15, %v474_v8 }
  0xed   : > { %2949 = vmatmul.msk.f32.gmra.mxu2 %vm512_vm15, %v472_v54  ;;  %v3875_v26 = vpop.permute.xlu1 %489 }
  0xef   : > { %2942 = vmatmul.msk.f32.gmra.mxu1 %vm512_vm15, %v472_v54 }
  0xf2   : > { %2934 = vmatmul.msk.f32.gmra.mxu0 %vm512_vm15, %v471_v5  ;;  %2938 = vmatmul.msk.f32.gmra.mxu3 %vm512_vm15, %v475_v2 }
  0xf5   : > { %2950 = vmatmul.msk.f32.gmra.mxu2 %vm512_vm15, %v473_v6 }
  0xf7   : > { %2943 = vmatmul.msk.f32.gmra.mxu1 %vm512_vm15, %v473_v6 }
  0xfa   : > { %2935 = vmatmul.msk.f32.gmra.mxu0 %vm512_vm15, %v472_v54 }
  0xfd   : > { %2951 = vmatmul.msk.f32.gmra.mxu2 %vm512_vm15, %v474_v8 }
  0xff   : > { %2944 = vmatmul.msk.f32.gmra.mxu1 %vm512_vm15, %v474_v8 }
 0x102   : > { %2936 = vmatmul.msk.f32.gmra.mxu0 %vm512_vm15, %v473_v6 }
 0x105   : > { %2952 = vmatmul.msk.f32.gmra.mxu2 %vm512_vm15, %v475_v2 }
 0x107   : > { %2945 = vmatmul.msk.f32.gmra.mxu1 %vm512_vm15, %v475_v2 }
 0x15c   : > { %v589_v12 = vpop.f32.mrf.mxu1 }
 0x15d   : > { %v3857_v13 = vadd.f32 %v589_v12, %v485_v11 }
 0x15f   : > { %v3860_v14 = vmul.f32 0.70710677, %v3857_v13 }
 0x160   : > { %v624_v16 = vpop.f32.mrf.mxu2 }
 0x161   : > { %v3863_v15 = vand.u32 2147483647, %v3860_v14  ;;  %v3865_v17 = vadd.f32 %v624_v16, %v485_v11 }
 0x163   : > { %v733_v18 = vmul.f32 0.3275911, %v3863_v15  ;;  %v3869_v19 = vmul.f32 0.70710677, %v3865_v17  ;;  %v1201_v16 = vmul.f32 %v3863_v15, %v3863_v15 }
 0x164   : > { %v592_v46 = vpop.f32.mrf.mxu1 }
 0x165   : > { %v751_v20 = vadd.f32 1.0, %v733_v18  ;;  %v3872_v21 = vand.u32 2147483647, %v3869_v19  ;;  %v3899_v4 = vadd.f32 %v592_v46, %v3875_v26 }
 0x167   : > { %3462 = vrcp.f32 %v751_v20  ;;  %v734_v22 = vmul.f32 0.3275911, %v3872_v21  ;;  %v554_v23 = vpop.f32.mrf.mxu0  ;;  %v794_v36 = vand.u32 2147483648, %v751_v20  ;;  %v792_v38 = vand.u32 2147483647, %v751_v20  ;;  %6258 = vst [vmem:[#allocation5_spill] sm:$0xff] %v3899_v4 }
 0x168   : > { %v627_v25 = vpop.f32.mrf.mxu2  ;;  %v3877_v27 = vadd.f32 %v554_v23, %v485_v11  ;;  %vm788_vm6 = vweird.f32 %v751_v20  ;;  %v3905_v63 = vmul.f32 0.70710677, %v3899_v4  ;;  %v1202_v18 = vmul.f32 %v3872_v21, %v3872_v21 }
 0x169   : > { %v752_v24 = vadd.f32 1.0, %v734_v22  ;;  %v3880_v29 = vadd.f32 %v627_v25, %v3875_v26  ;;  %v795_v45 = vor.u32 1.1754944e-38, %v794_v36  ;;  %vm793_vm9 = vcmp.eq.f32.partialorder %v792_v38, 8.507059e+37 }
 0x16a   : > { %v3883_v32 = vmul.f32 0.70710677, %v3877_v27  ;;  %6259 = vst [vmem:[#allocation6_spill] sm:$0xff] %v3905_v63  ;;  %v718_v0 = vand.u32 2147483647, %v3905_v63  ;;  %v1219_v38 = vsub.f32 0.0, %v1201_v16 }
 0x16b   : > { %3464 = vrcp.f32 %v752_v24  ;;  %v3886_v33 = vmul.f32 0.70710677, %v3880_v29  ;;  %v809_v52 = vand.u32 2147483648, %v752_v24  ;;  %vm803_vm13 = vweird.f32 %v752_v24 }
 0x16c   : > { %v3889_v37 = vand.u32 2147483647, %v3883_v32  ;;  %v807_v3 = vand.u32 2147483647, %v752_v24  ;;  %v736_v22 = vmul.f32 0.3275911, %v718_v0 }
 0x16d   : > { %v3463_v28 = vpop.eup %3462  ;;  %v3893_v43 = vand.u32 2147483647, %v3886_v33  ;;  %v566_v59 = vpop.f32.mrf.mxu3  ;;  %v810_v62 = vor.u32 1.1754944e-38, %v809_v52 }
 0x16e   : > { %v784_v30 = vmul.f32 %v3463_v28, %v751_v20  ;;  %vm789_vm5 = vweird.f32 %v3463_v28  ;;  %v732_v41 = vmul.f32 0.3275911, %v3889_v37  ;;  %vm808_vm15 = vcmp.eq.f32.partialorder %v807_v3, 8.507059e+37  ;;  %v3935_v52 = vpop.permute.xlu0 %494 }
 0x16f   : > { %vm790_vm7 = vmor %vm788_vm6, %vm789_vm5  ;;  %v737_v49 = vmul.f32 0.3275911, %v3893_v43  ;;  %v3908_v58 = vadd.f32 %v566_v59, %v3902_v61  ;;  %v1204_v59 = vmul.f32 %v718_v0, %v718_v0  ;;  %v3950_v0 = vmul.f32 0.5, %v3857_v13 }
 0x170   : > { %v785_v31 = vsub.f32 1.0, %v784_v30  ;;  %v750_v47 = vadd.f32 1.0, %v732_v41 }
 0x171   : > { %v3465_v34 = vpop.eup %3464  ;;  %v755_v53 = vadd.f32 1.0, %v737_v49  ;;  %v3915_v54 = vmul.f32 0.70710677, %v3908_v58 }
 0x172   : > { %v786_v35 = vmul.f32 %v3463_v28, %v785_v31  ;;  %v799_v39 = vmul.f32 %v3465_v34, %v752_v24  ;;  %vm804_vm12 = vweird.f32 %v3465_v34  ;;  %3466 = vrcp.f32 %v750_v47 }
 0x173   : > { %vm805_vm14 = vmor %vm803_vm13, %vm804_vm12  ;;  %3468 = vrcp.f32 %v755_v53  ;;  %v779_v9 = vand.u32 2147483648, %v750_v47  ;;  %v777_v12 = vand.u32 2147483647, %v750_v47  ;;  %vm773_vm6 = vweird.f32 %v750_v47 }
 0x174   : > { %v787_v40 = vadd.f32 %v3463_v28, %v786_v35  ;;  %v800_v42 = vsub.f32 1.0, %v799_v39  ;;  %v854_v24 = vand.u32 2147483648, %v755_v53  ;;  %v3923_v31 = vand.u32 2147483647, %v3915_v54 }
 0x175   : > { %vm848_vm12 = vweird.f32 %v755_v53  ;;  %v852_v21 = vand.u32 2147483647, %v755_v53  ;;  %v3927_v39 = vadd.f32 1.0, %v736_v22 }
 0x176   : > { %v791_v44 = vsel %vm790_vm7, %v3463_v28, %v787_v40  ;;  %v801_v48 = vmul.f32 %v3465_v34, %v800_v42  ;;  %v780_v28 = vor.u32 1.1754944e-38, %v779_v9  ;;  %v855_v41 = vor.u32 1.1754944e-38, %v854_v24  ;;  %v630_v9 = vpop.f32.mrf.mxu2 }
 0x177   : > { %v3896_v50 = vsel %vm793_vm9, %v795_v45, %v791_v44  ;;  %vm778_vm9 = vcmp.eq.f32.partialorder %v777_v12, 8.507059e+37  ;;  %v1220_v44 = vsub.f32 0.0, %v1202_v18  ;;  %v744_v46 = vmul.f32 0.3275911, %v3923_v31 }
 0x178   : > { %v802_v51 = vadd.f32 %v3465_v34, %v801_v48  ;;  %v1039_v56 = vmul.f32 1.0614054, %v3896_v50  ;;  %v3467_v1 = vpop.eup %3466  ;;  %3470 = vrcp.f32 %v3927_v39  ;;  %v839_v16 = vand.u32 2147483648, %v3927_v39 }
 0x179   : > { %v769_v57 = vmul.f32 %v3467_v1, %v750_v47  ;;  %v3469_v2 = vpop.eup %3468  ;;  %vm774_vm5 = vweird.f32 %v3467_v1  ;;  %v3937_v3 = vadd.f32 1.0, %v744_v46  ;;  %v1222_v18 = vsub.f32 0.0, %v1204_v59 }
 0x17a   : > { %v806_v60 = vsel %vm805_vm14, %v3465_v34, %v802_v51  ;;  %v1057_v5 = vadd.f32 -1.4531521, %v1039_v56  ;;  %v844_v20 = vmul.f32 %v3469_v2, %v755_v53  ;;  %vm775_vm7 = vmor %vm773_vm6, %vm774_vm5  ;;  %vm849_vm13 = vweird.f32 %v3469_v2  ;;  %v595_v51 = vpop.f32.mrf.mxu1 }
 0x17b   : > { %v3910_v55 = vsel %vm808_vm15, %v810_v62, %v806_v60  ;;  %v770_v7 = vsub.f32 1.0, %v769_v57  ;;  %vm850_vm14 = vmor %vm848_vm12, %vm849_vm13  ;;  %vm679_vm15 = vcmp.ge.f32.partialorder %v3860_v14, 0.0  ;;  %vm853_vm5 = vcmp.eq.f32.partialorder %v852_v21, 8.507059e+37  ;;  %v557_v62 = vpop.f32.mrf.mxu0 }
 0x17c   : > { %v1040_v8 = vmul.f32 1.0614054, %v3910_v55  ;;  %v1075_v6 = vmul.f32 %v1057_v5, %v3896_v50  ;;  %v845_v30 = vsub.f32 1.0, %v844_v20  ;;  %v1238_v56 = vmul.f32 1.442695, %v1219_v38 }
 0x17d   : > { %v771_v11 = vmul.f32 %v3467_v1, %v770_v7  ;;  %v1240_v5 = vmul.f32 1.442695, %v1220_v44  ;;  %3472 = vrcp.f32 %v3937_v3  ;;  %vm680_vm6 = vcmp.ge.f32.partialorder %v3869_v19, 0.0 }
 0x17e   : > { %v1058_v25 = vadd.f32 -1.4531521, %v1040_v8  ;;  %v1093_v34 = vadd.f32 1.4214138, %v1075_v6  ;;  %v846_v36 = vmul.f32 %v3469_v2, %v845_v30  ;;  %v3947_v8 = vadd.f32 %v595_v51, %v3935_v52  ;;  %v3971_v22 = vpop.eup %3470 }
 0x17f   : > { %v772_v23 = vadd.f32 %v3467_v1, %v771_v11  ;;  %v3958_v12 = vadd.f32 %v557_v62, %v3875_v26  ;;  %3474 = vpow2.f32 %v1238_v56  ;;  %v3961_v19 = vmul.f32 0.5, %v3865_v17 }
 0x180   : > { %v1076_v42 = vmul.f32 %v1058_v25, %v3910_v55  ;;  %v847_v45 = vadd.f32 %v3469_v2, %v846_v36  ;;  %v1111_v47 = vmul.f32 %v1093_v34, %v3896_v50  ;;  %6260 = vst [vmem:[#allocation7_spill] sm:$0xff] %v3947_v8  ;;  %3476 = vpow2.f32 %v1240_v5 }
 0x181   : > { %v776_v35 = vsel %vm775_vm7, %v3467_v1, %v772_v23  ;;  %v3969_v14 = vadd.f32 %v630_v9, %v3935_v52  ;;  %v3975_v23 = vmul.f32 0.5, %v3877_v27  ;;  %v3978_v24 = vmul.f32 0.70710677, %v3947_v8 }
 0x182   : > { %v3925_v15 = vsel %vm778_vm9, %v780_v28, %v776_v35  ;;  %v851_v49 = vsel %vm850_vm14, %v3469_v2, %v847_v45  ;;  %v1094_v1 = vadd.f32 1.4214138, %v1076_v42  ;;  %v1129_v57 = vadd.f32 -0.28449672, %v1111_v47 }
 0x183   : > { %v1038_v40 = vmul.f32 1.0614054, %v3925_v15  ;;  %v3940_v60 = vsel %vm853_vm5, %v855_v41, %v851_v49  ;;  %v6151_v2 = vmov -1.0   ;;  %6261 = vst [vmem:[#allocation8_spill] sm:$0xff] %v3978_v24  ;;  %v3473_v25 = vpop.eup %3472  ;;  %v1200_v28 = vmul.f32 %v3889_v37, %v3889_v37 }
 0x184   : > { %v1043_v53 = vmul.f32 1.0614054, %v3940_v60  ;;  %v3955_v6 = vsel %vm679_vm15, 1.0, %v6151_v2  ;;  %v3965_v13 = vsel %vm680_vm6, 1.0, %v6151_v2  ;;  %v1112_v20 = vmul.f32 %v1094_v1, %v3910_v55 }
 0x185   : > { %v1056_v48 = vadd.f32 -1.4531521, %v1038_v40  ;;  %v1147_v26 = vmul.f32 %v1129_v57, %v3896_v50  ;;  %v3983_v30 = vmul.f32 0.5, %v3880_v29  ;;  %v3987_v35 = vmul.f32 0.70710677, %v3958_v12  ;;  %v3475_v42 = vpop.eup %3474 }
 0x186   : > { %v1061_v11 = vadd.f32 -1.4531521, %v1043_v53  ;;  %v3989_v36 = vor.u32 1.1754944e-38, %v839_v16  ;;  %v1244_v27 = vmul.f32 1.442695, %v1222_v18  ;;  %v1205_v21 = vmul.f32 %v3893_v43, %v3893_v43  ;;  %v4006_v47 = vpop.eup %3476  ;;  %v598_v18 = vpop.f32.mrf.mxu1 }
 0x187   : > { %v1074_v7 = vmul.f32 %v1056_v48, %v3925_v15  ;;  %v949_v38 = vmul.f32 %v3473_v25, %v3937_v3  ;;  %v1130_v40 = vadd.f32 -0.28449672, %v1112_v20  ;;  %v829_v37 = vmul.f32 %v3971_v22, %v3927_v39 }
 0x188   : > { %v1079_v34 = vmul.f32 %v1061_v11, %v3940_v60  ;;  %vm678_vm7 = vcmp.ge.f32.partialorder %v3883_v32, 0.0  ;;  %vm683_vm9 = vcmp.ge.f32.partialorder %v3886_v33, 0.0  ;;  %v3999_v29 = vand.u32 2147483647, %v3987_v35 }
 0x189   : > { %v1092_v17 = vadd.f32 1.4214138, %v1074_v7  ;;  %v4002_v41 = vmul.f32 0.70710677, %v3969_v14  ;;  %v1165_v44 = vadd.f32 0.2548296, %v1147_v26  ;;  %vm954_vm12 = vweird.f32 %v3473_v25 }
 0x18a   : > { %v721_v45 = vand.u32 2147483647, %v3978_v24  ;;  %v950_v46 = vsub.f32 1.0, %v949_v38  ;;  %v1218_v48 = vsub.f32 0.0, %v1200_v28  ;;  %v1097_v49 = vadd.f32 1.4214138, %v1079_v34 }
 0x18b   : > { %v1110_v43 = vmul.f32 %v1092_v17, %v3925_v15  ;;  %v959_v51 = vand.u32 2147483648, %v3937_v3  ;;  %v735_v56 = vmul.f32 0.3275911, %v3999_v29  ;;  %v957_v62 = vand.u32 2147483647, %v3937_v3 }
 0x18c   : > { %v951_v59 = vmul.f32 %v3473_v25, %v950_v46  ;;  %v4012_v1 = vand.u32 2147483647, %v4002_v41  ;;  %v1148_v5 = vmul.f32 %v1130_v40, %v3910_v55  ;;  %v830_v53 = vsub.f32 1.0, %v829_v37 }
 0x18d   : > { %v1223_v57 = vsub.f32 0.0, %v1205_v21  ;;  %v4015_v7 = vadd.f32 1.0, %v735_v56  ;;  %v1128_v9 = vadd.f32 -0.28449672, %v1110_v43  ;;  %vm953_vm13 = vweird.f32 %v3937_v3 }
 0x18e   : > { %v952_v11 = vadd.f32 %v3473_v25, %v951_v59  ;;  %v740_v16 = vmul.f32 0.3275911, %v4012_v1  ;;  %v1115_v20 = vmul.f32 %v1097_v49, %v3940_v60  ;;  %v739_v26 = vmul.f32 0.3275911, %v721_v45  ;;  %vm955_vm14 = vmor %vm953_vm13, %vm954_vm12 }
 0x18f   : > { %v960_v17 = vor.u32 1.1754944e-38, %v959_v51  ;;  %3478 = vrcp.f32 %v4015_v7  ;;  %v1183_v28 = vmul.f32 %v1165_v44, %v3896_v50  ;;  %v1236_v34 = vmul.f32 1.442695, %v1218_v48 }
 0x190   : > { %v956_v21 = vsel %vm955_vm14, %v3473_v25, %v952_v11  ;;  %vm958_vm15 = vcmp.eq.f32.partialorder %v957_v62, 8.507059e+37  ;;  %v1166_v38 = vadd.f32 0.2548296, %v1148_v5  ;;  %v4024_v37 = vadd.f32 1.0, %v740_v16 }
 0x191   : > { %v4022_v40 = vsel %vm958_vm15, %v960_v17, %v956_v21  ;;  %v4027_v3 = vadd.f32 %v598_v18, %v3855_v10  ;;  %3480 = vpow2.f32 %v1244_v27  ;;  %v1146_v43 = vmul.f32 %v1128_v9, %v3925_v15 }
 0x192   : > { %v1246_v46 = vmul.f32 1.442695, %v1223_v57  ;;  %v4030_v49 = vmul.f32 %v721_v45, %v721_v45  ;;  %v1133_v51 = vadd.f32 -0.28449672, %v1115_v20  ;;  %v4032_v56 = vadd.f32 1.0, %v739_v26  ;;  %v569_v57 = vpop.f32.mrf.mxu3  ;;  %v4068_v20 = vpop.permute.xlu1 %509 }
 0x193   : > { %6262 = vst [vmem:[#allocation9_spill] sm:$0xff] %v4027_v3  ;;  %v1050_v50 = vmul.f32 1.0614054, %v4022_v40  ;;  %3482 = vrcp.f32 %v4024_v37  ;;  %v4037_v25 = vmul.f32 %v3971_v22, %v830_v53  ;;  %v4042_v44 = vsel %vm678_vm7, 1.0, %v6151_v2 }
 0x194   : > { %3484 = vpow2.f32 %v1236_v34  ;;  %v4047_v27 = vsel %vm683_vm9, 1.0, %v6151_v2  ;;  %v1273_v48 = vmul.f32 %v3475_v42, %v1183_v28  ;;  %v1184_v59 = vmul.f32 %v1166_v38, %v3910_v55 }
 0x195   : > { %v3479_v45 = vpop.eup %3478  ;;  %v4052_v62 = vmul.f32 %v3923_v31, %v3923_v31  ;;  %v4055_v5 = vmul.f32 0.70710677, %v4027_v3  ;;  %v1164_v32 = vadd.f32 0.2548296, %v1146_v43  ;;  %3486 = vpow2.f32 %v1246_v46 }
 0x196   : > { %v4058_v53 = vmul.f32 0.5, %v3908_v58  ;;  %v814_v33 = vmul.f32 %v3479_v45, %v4015_v7  ;;  %v1151_v9 = vmul.f32 %v1133_v51, %v3940_v60  ;;  %3488 = vrcp.f32 %v4032_v56  ;;  %v560_v51 = vpop.f32.mrf.mxu0 }
 0x197   : > { %6263 = vst [vmem:[#allocation10_spill] sm:$0xff] %v4055_v5  ;;  %v1225_v55 = vsub.f32 0.0, %v4030_v49  ;;  %v1068_v42 = vadd.f32 -1.4531521, %v1050_v50  ;;  %v4064_v31 = vpop.eup %3480  ;;  %v822_v16 = vand.u32 2147483647, %v4015_v7  ;;  %v1274_v28 = vmul.f32 %v4006_v47, %v1184_v59 }
 0x198   : > { %6264 = vst [vmem:[#allocation11_spill] sm:$0xff] %v4064_v31  ;;  %v815_v11 = vsub.f32 1.0, %v814_v33  ;;  %v824_v18 = vand.u32 2147483648, %v4015_v7  ;;  %v4071_v58 = vand.u32 2147483647, %v4055_v5  ;;  %v1291_v17 = vsub.f32 1.0, %v1273_v48 }
 0x199   : > { %v4073_v26 = vpop.eup %3482  ;;  %v1230_v34 = vsub.f32 0.0, %v4052_v62  ;;  %v4078_v21 = vadd.f32 %v569_v57, %v4068_v20  ;;  %v1182_v43 = vmul.f32 %v1164_v32, %v3925_v15  ;;  %vm819_vm5 = vweird.f32 %v3479_v45 }
 0x19a   : > { %v3485_v38 = vpop.eup %3484  ;;  %v816_v46 = vmul.f32 %v3479_v45, %v815_v11  ;;  %v889_v49 = vmul.f32 %v4073_v26, %v4024_v37  ;;  %v1169_v50 = vadd.f32 0.2548296, %v1151_v9  ;;  %v1086_v33 = vmul.f32 %v1068_v42, %v4022_v40 }
 0x19b   : > { %vm818_vm6 = vweird.f32 %v4015_v7  ;;  %v742_v47 = vmul.f32 0.3275911, %v4071_v58  ;;  %v3487_v48 = vpop.eup %3486  ;;  %vm690_vm7 = vcmp.ge.f32.partialorder %v3915_v54, 0.0  ;;  %vm823_vm9 = vcmp.eq.f32.partialorder %v822_v16, 8.507059e+37 }
 0x19c   : > { %v817_v59 = vadd.f32 %v3479_v45, %v816_v46  ;;  %v825_v62 = vor.u32 1.1754944e-38, %v824_v18  ;;  %v890_v15 = vsub.f32 1.0, %v889_v49  ;;  %v4087_v32 = vpop.eup %3488  ;;  %vm820_vm12 = vmor %vm818_vm6, %vm819_vm5  ;;  %vm893_vm13 = vweird.f32 %v4024_v37 }
 0x19d   : > { %vm894_vm14 = vweird.f32 %v4073_v26  ;;  %v4092_v57 = vmul.f32 0.70710677, %v4078_v21  ;;  %v4095_v7 = vadd.f32 %v560_v51, %v3935_v52  ;;  %v897_v11 = vand.u32 2147483647, %v4024_v37 }
 0x19e   : > { %v821_v9 = vsel %vm820_vm12, %v3479_v45, %v817_v59  ;;  %v891_v42 = vmul.f32 %v4073_v26, %v890_v15  ;;  %v899_v16 = vand.u32 2147483648, %v4024_v37  ;;  %v1309_v18 = vmul.f32 %v1291_v17, %v3955_v6  ;;  %vm4113_vm15 = vmor %vm893_vm13, %vm894_vm14 }
 0x19f   : > { %v1104_v46 = vadd.f32 1.4214138, %v1086_v33  ;;  %v4101_v49 = vsel %vm823_vm9, %v825_v62, %v821_v9  ;;  %v4103_v2 = vadd.f32 1.0, %v742_v47  ;;  %v1272_v3 = vmul.f32 %v3485_v38, %v1182_v43 }
 0x1a0   : > { %v874_v8 = vmul.f32 %v4087_v32, %v4032_v56  ;;  %v1041_v52 = vmul.f32 1.0614054, %v4101_v49  ;;  %v892_v45 = vadd.f32 %v4073_v26, %v891_v42  ;;  %v1292_v6 = vsub.f32 1.0, %v1274_v28 }
 0x1a1   : > { %v1203_v17 = vmul.f32 %v3999_v29, %v3999_v29  ;;  %v4120_v38 = vand.u32 2147483647, %v4092_v57  ;;  %v4123_v43 = vmul.f32 0.70710677, %v4095_v7  ;;  %v1187_v33 = vmul.f32 %v1169_v50, %v3940_v60 }
 0x1a2   : > { %v1059_v47 = vadd.f32 -1.4531521, %v1041_v52  ;;  %vm4126_vm5 = vcmp.eq.f32.partialorder %v897_v11, 8.507059e+37  ;;  %v900_v37 = vor.u32 1.1754944e-38, %v899_v16  ;;  %v1122_v62 = vmul.f32 %v1104_v46, %v4022_v40 }
 0x1a3   : > { %v896_v29 = vsel %vm4113_vm15, %v4073_v26, %v892_v45  ;;  %3490 = vrcp.f32 %v4103_v2  ;;  %v747_v28 = vmul.f32 0.3275911, %v4120_v38  ;;  %v1327_v15 = vadd.f32 1.0, %v1309_v18 }
 0x1a4   : > { %v1290_v9 = vsub.f32 1.0, %v1272_v3  ;;  %v884_v60 = vand.u32 2147483648, %v4032_v56  ;;  %v1250_v50 = vmul.f32 1.442695, %v1225_v55  ;;  %v875_v42 = vsub.f32 1.0, %v874_v8 }
 0x1a5   : > { %v1077_v11 = vmul.f32 %v1059_v47, %v4101_v49  ;;  %v4138_v52 = vadd.f32 1.0, %v747_v28  ;;  %v4141_v16 = vand.u32 2147483647, %v4123_v43  ;;  %v1310_v46 = vmul.f32 %v1292_v6, %v3965_v13 }
 0x1a6   : > { %v1277_v26 = vmul.f32 %v3487_v48, %v1187_v33  ;;  %v1260_v45 = vmul.f32 1.442695, %v1230_v34  ;;  %v4146_v51 = vsel %vm4126_vm5, %v900_v37, %v896_v29  ;;  %v6269_v3 = vmov -1.0  }
 0x1a7   : > { %v4151_v55 = vsel %vm690_vm7, 1.0, %v6269_v3  ;;  %v1140_v8 = vadd.f32 -0.28449672, %v1122_v62  ;;  %v1221_v18 = vsub.f32 0.0, %v1203_v17  ;;  %3492 = vrcp.f32 %v4138_v52 }
 0x1a8   : > { %v4155_v47 = vmul.f32 %v1327_v15, %v3950_v0  ;;  %v1308_v13 = vmul.f32 %v1290_v9, %v4042_v44  ;;  %v4158_v48 = vor.u32 1.1754944e-38, %v884_v60  ;;  %3494 = vpow2.f32 %v1250_v50 }
 0x1a9   : > { %v4160_v34 = vpop.eup %3490  ;;  %v4163_v6 = vmul.f32 %v4087_v32, %v875_v42  ;;  %v1095_v54 = vadd.f32 1.4214138, %v1077_v11  ;;  %v1046_v33 = vmul.f32 1.0614054, %v4146_v51  ;;  %v738_v17 = vmul.f32 0.3275911, %v4141_v16 }
 0x1aa   : > { %v1328_v59 = vadd.f32 1.0, %v1310_v46  ;;  %v1295_v37 = vsub.f32 1.0, %v1277_v26  ;;  %3496 = vpow2.f32 %v1260_v45  ;;  %v1208_v0 = vmul.f32 %v4012_v1, %v4012_v1  ;;  %v633_v45 = vpop.f32.mrf.mxu2 }
 0x1ab   : > { %v1158_v44 = vmul.f32 %v1140_v8, %v4022_v40  ;;  %v4171_v62 = vmul.f32 0.5, %v3958_v12  ;;  %v1242_v29 = vmul.f32 1.442695, %v1221_v18  ;;  %v4173_v28 = vadd.f32 1.0, %v738_v17 }
 0x1ac   : > { %v1326_v15 = vadd.f32 1.0, %v1308_v13  ;;  %vm681_vm6 = vcmp.ge.f32.partialorder %v3987_v35, 0.0  ;;  %vm686_vm7 = vcmp.ge.f32.partialorder %v4002_v41, 0.0  ;;  %v919_v9 = vmul.f32 %v4160_v34, %v4103_v2 }
 0x1ad   : > { %v3493_v60 = vpop.eup %3492  ;;  %v1113_v50 = vmul.f32 %v1095_v54, %v4101_v49  ;;  %v4181_v1 = vmul.f32 0.5, %v3969_v14  ;;  %v1064_v42 = vadd.f32 -1.4531521, %v1046_v33  ;;  %3498 = vrcp.f32 %v4173_v28 }
 0x1ae   : > { %v4184_v12 = vpop.eup %3494  ;;  %v4187_v11 = vmul.f32 %v1328_v59, %v3961_v19  ;;  %v1313_v35 = vmul.f32 %v1295_v37, %v4047_v27  ;;  %v1226_v46 = vsub.f32 0.0, %v1208_v0  ;;  %v994_v26 = vmul.f32 %v3493_v60, %v4138_v52 }
 0x1af   : > { %6270 = vst [vmem:[#allocation12_spill] sm:$0xff] %v4184_v12  ;;  %v1176_v8 = vadd.f32 0.2548296, %v1158_v44  ;;  %v4192_v18 = vsel %vm681_vm6, 1.0, %v6269_v3  ;;  %3500 = vpow2.f32 %v1242_v29  ;;  %v4197_v14 = vsel %vm686_vm7, 1.0, %v6269_v3 }
 0x1b0   : > { %v3497_v13 = vpop.eup %3496  ;;  %v4200_v19 = vmul.f32 %v1326_v15, %v3975_v23  ;;  %v920_v54 = vsub.f32 1.0, %v919_v9  ;;  %v995_v27 = vsub.f32 1.0, %v994_v26  ;;  %v1002_v33 = vand.u32 2147483647, %v4138_v52 }
 0x1b1   : > { %v1131_v17 = vadd.f32 -0.28449672, %v1113_v50  ;;  %v1082_v59 = vmul.f32 %v1064_v42, %v4146_v51  ;;  %v1004_v37 = vand.u32 2147483648, %v4138_v52  ;;  %v4206_v0 = vadd.f32 %v633_v45, %v3855_v10 }
 0x1b2   : > { %v1331_v44 = vadd.f32 1.0, %v1313_v35  ;;  %v1252_v41 = vmul.f32 1.442695, %v1226_v46  ;;  %v996_v29 = vmul.f32 %v3493_v60, %v995_v27  ;;  %vm999_vm9 = vweird.f32 %v3493_v60  ;;  %v601_v27 = vpop.f32.mrf.mxu1 }
 0x1b3   : > { %6271 = vst [vmem:[#allocation13_spill] sm:$0xff] %v4206_v0  ;;  %v3499_v5 = vpop.eup %3498  ;;  %v1194_v23 = vmul.f32 %v1176_v8, %v4022_v40  ;;  %v929_v15 = vand.u32 2147483648, %v4103_v2  ;;  %v4212_v9 = vmul.f32 %v4071_v58, %v4071_v58  ;;  %v4215_v50 = vmul.f32 0.70710677, %v4206_v0 }
 0x1b4   : > { %v921_v42 = vmul.f32 %v4160_v34, %v920_v54  ;;  %v997_v26 = vadd.f32 %v3493_v60, %v996_v29  ;;  %vm998_vm12 = vweird.f32 %v4138_v52  ;;  %vm1003_vm13 = vcmp.eq.f32.partialorder %v1002_v33, 8.507059e+37 }
 0x1b5   : > { %v3501_v35 = vpop.eup %3500  ;;  %v1149_v46 = vmul.f32 %v1131_v17, %v4101_v49  ;;  %v1100_v45 = vadd.f32 1.4214138, %v1082_v59  ;;  %vm1000_vm14 = vmor %vm998_vm12, %vm999_vm9  ;;  %v1005_v40 = vor.u32 1.1754944e-38, %v1004_v37  ;;  %v859_v8 = vmul.f32 %v3499_v5, %v4173_v28 }
 0x1b6   : > { %v1001_v58 = vsel %vm1000_vm14, %v3493_v60, %v997_v26  ;;  %vm863_vm15 = vweird.f32 %v4173_v28  ;;  %v867_v12 = vand.u32 2147483647, %v4173_v28  ;;  %v869_v54 = vand.u32 2147483648, %v4173_v28 }
 0x1b7   : > { %v4224_v29 = vsel %vm1003_vm13, %v1005_v40, %v1001_v58  ;;  %v860_v52 = vsub.f32 1.0, %v859_v8  ;;  %vm864_vm5 = vweird.f32 %v3499_v5  ;;  %v4227_v33 = vand.u32 2147483647, %v4215_v50 }
 0x1b8   : > { %v922_v17 = vadd.f32 %v4160_v34, %v921_v42  ;;  %vm924_vm6 = vweird.f32 %v4160_v34  ;;  %v1053_v59 = vmul.f32 1.0614054, %v4224_v29  ;;  %v4233_v60 = vadd.f32 %v601_v27, %v3902_v61  ;;  %vm4241_vm9 = vmor %vm863_vm15, %vm864_vm5  ;;  %v563_v27 = vpop.f32.mrf.mxu0 }
 0x1b9   : > { %v1118_v37 = vmul.f32 %v1100_v45, %v4146_v51  ;;  %v927_v26 = vand.u32 2147483647, %v4103_v2  ;;  %v861_v40 = vmul.f32 %v3499_v5, %v860_v52  ;;  %v743_v8 = vmul.f32 0.3275911, %v4227_v33 }
 0x1ba   : > { %v1167_v58 = vadd.f32 0.2548296, %v1149_v46  ;;  %vm923_vm7 = vweird.f32 %v4103_v2  ;;  %v1071_v24 = vadd.f32 -1.4531521, %v1053_v59  ;;  %v870_v4 = vor.u32 1.1754944e-38, %v869_v54 }
 0x1bb   : > { %vm4245_vm12 = vmor %vm923_vm7, %vm924_vm6  ;;  %v930_v45 = vor.u32 1.1754944e-38, %v929_v15  ;;  %v862_v52 = vadd.f32 %v3499_v5, %v861_v40  ;;  %vm868_vm13 = vcmp.eq.f32.partialorder %v867_v12, 8.507059e+37  ;;  %v4249_v0 = vadd.f32 1.0, %v743_v8 }
 0x1bc   : > { %v1284_v46 = vmul.f32 %v3497_v13, %v1194_v23  ;;  %v926_v2 = vsel %vm4245_vm12, %v4160_v34, %v922_v17  ;;  %v1089_v28 = vmul.f32 %v1071_v24, %v4224_v29  ;;  %v4256_v59 = vmul.f32 0.70710677, %v4233_v60 }
 0x1bd   : > { %v1136_v54 = vadd.f32 -0.28449672, %v1118_v37  ;;  %v866_v63 = vsel %vm4241_vm9, %v3499_v5, %v862_v52  ;;  %3502 = vrcp.f32 %v4249_v0  ;;  %v4262_v12 = vadd.f32 %v563_v27, %v3855_v10 }
 0x1be   : > { %v1185_v13 = vmul.f32 %v1167_v58, %v4101_v49  ;;  %3504 = vpow2.f32 %v1252_v41  ;;  %vm928_vm14 = vcmp.eq.f32.partialorder %v927_v26, 8.507059e+37  ;;  %v4265_v31 = vsel %vm868_vm13, %v870_v4, %v866_v63 }
 0x1bf   : > { %v4268_v24 = vmul.f32 %v1331_v44, %v3983_v30  ;;  %v4270_v34 = vsel %vm928_vm14, %v930_v45, %v926_v2  ;;  %v1107_v23 = vadd.f32 1.4214138, %v1089_v28  ;;  %v1044_v15 = vmul.f32 1.0614054, %v4265_v31 }
 0x1c0   : > { %v1302_v5 = vsub.f32 1.0, %v1284_v46  ;;  %v1228_v17 = vsub.f32 0.0, %v4212_v9  ;;  %v1215_v10 = vmul.f32 %v4120_v38, %v4120_v38  ;;  %v4277_v49 = vand.u32 2147483647, %v4256_v59 }
 0x1c1   : > { %v1154_v4 = vmul.f32 %v1136_v54, %v4146_v51  ;;  %v1062_v63 = vadd.f32 -1.4531521, %v1044_v15  ;;  %v1206_v30 = vmul.f32 %v4141_v16, %v4141_v16  ;;  %v4283_v44 = vmul.f32 0.70710677, %v4262_v12 }
 0x1c2   : > { %v1275_v41 = vmul.f32 %v3501_v35, %v1185_v13  ;;  %v1048_v37 = vmul.f32 1.0614054, %v4270_v34  ;;  %v4287_v9 = vmul.f32 0.5, %v4078_v21  ;;  %v745_v38 = vmul.f32 0.3275911, %v4277_v49 }
 0x1c3   : > { %v3503_v26 = vpop.eup %3502  ;;  %v1125_v40 = vmul.f32 %v1107_v23, %v4224_v29  ;;  %v4292_v8 = vmul.f32 0.5, %v4095_v7  ;;  %v1080_v58 = vmul.f32 %v1062_v63, %v4265_v31  ;;  %v4296_v16 = vand.u32 2147483647, %v4283_v44 }
 0x1c4   : > { %v3505_v42 = vpop.eup %3504  ;;  %v4298_v35 = vmul.f32 1.442695, %v1228_v17  ;;  %vm693_vm15 = vcmp.ge.f32.partialorder %v4092_v57, 0.0  ;;  %v1233_v21 = vsub.f32 0.0, %v1215_v10  ;;  %v934_v27 = vmul.f32 %v3503_v26, %v4249_v0 }
 0x1c5   : > { %v1320_v45 = vmul.f32 %v1302_v5, %v4151_v55  ;;  %v1172_v52 = vadd.f32 0.2548296, %v1154_v4  ;;  %v1224_v46 = vsub.f32 0.0, %v1206_v30  ;;  %v4303_v2 = vadd.f32 1.0, %v745_v38 }
 0x1c6   : > { %6276 = vst [vmem:[#allocation14_spill] sm:$0xff] %v4298_v35  ;;  %v1293_v7 = vsub.f32 1.0, %v1275_v41  ;;  %v1066_v28 = vadd.f32 -1.4531521, %v1048_v37  ;;  %v935_v54 = vsub.f32 1.0, %v934_v27  ;;  %v944_v17 = vand.u32 2147483648, %v4249_v0  ;;  %v636_v41 = vpop.f32.mrf.mxu2 }
 0x1c7   : > { %v741_v13 = vmul.f32 0.3275911, %v4296_v16  ;;  %v1143_v23 = vadd.f32 -0.28449672, %v1125_v40  ;;  %v1098_v15 = vadd.f32 1.4214138, %v1080_v58  ;;  %3506 = vrcp.f32 %v4303_v2 }
 0x1c8   : > { %vm684_vm5 = vcmp.ge.f32.partialorder %v4123_v43, 0.0  ;;  %v936_v10 = vmul.f32 %v3503_v26, %v935_v54  ;;  %vm939_vm6 = vweird.f32 %v3503_v26  ;;  %v942_v55 = vand.u32 2147483647, %v4249_v0 }
 0x1c9   : > { %v1338_v5 = vadd.f32 1.0, %v1320_v45  ;;  %v1190_v4 = vmul.f32 %v1172_v52, %v4146_v51  ;;  %v1266_v63 = vmul.f32 1.442695, %v1233_v21  ;;  %v4311_v30 = vadd.f32 1.0, %v741_v13 }
 0x1ca   : > { %v1084_v37 = vmul.f32 %v1066_v28, %v4270_v34  ;;  %v1248_v38 = vmul.f32 1.442695, %v1224_v46  ;;  %v937_v40 = vadd.f32 %v3503_v26, %v936_v10  ;;  %vm938_vm7 = vweird.f32 %v4249_v0 }
 0x1cb   : > { %v1311_v58 = vmul.f32 %v1293_v7, %v4192_v18  ;;  %v1161_v27 = vmul.f32 %v1143_v23, %v4224_v29  ;;  %v1116_v54 = vmul.f32 %v1098_v15, %v4265_v31  ;;  %vm940_vm9 = vmor %vm938_vm7, %vm939_vm6  ;;  %v945_v45 = vor.u32 1.1754944e-38, %v944_v17 }
 0x1cc   : > { %v941_v35 = vsel %vm940_vm9, %v3503_v26, %v937_v40  ;;  %vm943_vm12 = vcmp.eq.f32.partialorder %v942_v55, 8.507059e+37  ;;  %3508 = vrcp.f32 %v4311_v30  ;;  %v4320_v51 = vadd.f32 %v636_v41, %v3902_v61 }
 0x1cd   : > { %v3507_v21 = vpop.eup %3506  ;;  %v4322_v52 = vmul.f32 %v3505_v42, %v1190_v4  ;;  %v4327_v18 = vsel %vm693_vm15, 1.0, %v6269_v3  ;;  %v4332_v0 = vsel %vm684_vm5, 1.0, %v6269_v3  ;;  %v4334_v26 = vsel %vm943_vm12, %v945_v45, %v941_v35  ;;  %v604_v42 = vpop.f32.mrf.mxu1 }
 0x1ce   : > { %6277 = vst [vmem:[#allocation15_spill] sm:$0xff] %v4320_v51  ;;  %v1102_v46 = vadd.f32 1.4214138, %v1084_v37  ;;  %3510 = vpow2.f32 %v1266_v63  ;;  %v1049_v61 = vmul.f32 1.0614054, %v4334_v26  ;;  %v964_v7 = vmul.f32 %v3507_v21, %v4303_v2 }
 0x1cf   : > { %v4339_v28 = vmul.f32 %v1338_v5, %v4058_v53  ;;  %v1179_v57 = vadd.f32 0.2548296, %v1161_v27  ;;  %v1134_v13 = vadd.f32 -0.28449672, %v1116_v54  ;;  %3512 = vpow2.f32 %v1248_v38 }
 0x1d0   : > { %v4341_v23 = vadd.f32 1.0, %v1311_v58  ;;  %v1067_v43 = vadd.f32 -1.4531521, %v1049_v61  ;;  %v965_v15 = vsub.f32 1.0, %v964_v7  ;;  %v4344_v35 = vmul.f32 0.70710677, %v4320_v51 }
 0x1d1   : > { %v1298_v17 = vsub.f32 1.0, %v4322_v52  ;;  %v972_v10 = vand.u32 2147483647, %v4303_v2  ;;  %v974_v55 = vand.u32 2147483648, %v4303_v2  ;;  %v4350_v4 = vadd.f32 %v604_v42, %v4068_v20 }
 0x1d2   : > { %6278 = vst [vmem:[#allocation16_spill] sm:$0xff] %v4344_v35  ;;  %v3509_v53 = vpop.eup %3508  ;;  %v4353_v5 = vmul.f32 %v1102_v46, %v4270_v34  ;;  %v1211_v63 = vmul.f32 %v4227_v33, %v4227_v33  ;;  %v966_v41 = vmul.f32 %v3507_v21, %v965_v15  ;;  %vm969_vm13 = vweird.f32 %v3507_v21 }
 0x1d3   : > { %v1152_v37 = vmul.f32 %v1134_v13, %v4265_v31  ;;  %vm968_vm14 = vweird.f32 %v4303_v2  ;;  %v1213_v38 = vmul.f32 %v4277_v49, %v4277_v49  ;;  %v904_v40 = vmul.f32 %v3509_v53, %v4311_v30 }
 0x1d4   : > { %v3511_v58 = vpop.eup %3510  ;;  %v1197_v27 = vmul.f32 %v1179_v57, %v4224_v29  ;;  %v1085_v54 = vmul.f32 %v1067_v43, %v4334_v26  ;;  %v967_v45 = vadd.f32 %v3507_v21, %v966_v41  ;;  %v4365_v52 = vand.u32 2147483647, %v4344_v35  ;;  %vm970_vm15 = vmor %vm968_vm14, %vm969_vm13 }
 0x1d5   : > { %v3513_v33 = vpop.eup %3512  ;;  %vm973_vm5 = vcmp.eq.f32.partialorder %v972_v10, 8.507059e+37  ;;  %v975_v46 = vor.u32 1.1754944e-38, %v974_v55  ;;  %v905_v61 = vsub.f32 1.0, %v904_v40  ;;  %v4368_v2 = vmul.f32 0.70710677, %v4350_v4 }
 0x1d6   : > { %v971_v49 = vsel %vm970_vm15, %v3507_v21, %v967_v45  ;;  %v912_v7 = vand.u32 2147483647, %v4311_v30  ;;  %v914_v42 = vand.u32 2147483648, %v4311_v30  ;;  %v746_v29 = vmul.f32 0.3275911, %v4365_v52 }
 0x1d7   : > { %v1170_v57 = vadd.f32 0.2548296, %v1152_v37  ;;  %v4373_v13 = vsel %vm973_vm5, %v975_v46, %v971_v49  ;;  %v906_v43 = vmul.f32 %v3509_v53, %v905_v61  ;;  %vm909_vm6 = vweird.f32 %v3509_v53 }
 0x1d8   : > { %v1103_v15 = vadd.f32 1.4214138, %v1085_v54  ;;  %v1229_v41 = vsub.f32 0.0, %v1211_v63  ;;  %v1051_v10 = vmul.f32 1.0614054, %v4373_v13  ;;  %v4376_v55 = vadd.f32 1.0, %v746_v29  ;;  %v639_v63 = vpop.f32.mrf.mxu2 }
 0x1d9   : > { %v1287_v40 = vmul.f32 %v3511_v58, %v1197_v27  ;;  %v907_v51 = vadd.f32 %v3509_v53, %v906_v43  ;;  %vm908_vm7 = vweird.f32 %v4311_v30  ;;  %v4380_v21 = vand.u32 2147483647, %v4368_v2 }
 0x1da   : > { %v1069_v45 = vadd.f32 -1.4531521, %v1051_v10  ;;  %vm910_vm9 = vmor %vm908_vm7, %vm909_vm6  ;;  %v915_v37 = vor.u32 1.1754944e-38, %v914_v42  ;;  %v1209_v46 = vmul.f32 %v4296_v16, %v4296_v16  ;;  %3514 = vrcp.f32 %v4376_v55 }
 0x1db   : > { %v1188_v54 = vmul.f32 %v1170_v57, %v4265_v31  ;;  %v1231_v61 = vsub.f32 0.0, %v1213_v38  ;;  %v911_v49 = vsel %vm910_vm9, %v3509_v53, %v907_v51  ;;  %vm913_vm12 = vcmp.eq.f32.partialorder %v912_v7, 8.507059e+37 }
 0x1dc   : > { %v1121_v58 = vmul.f32 %v1103_v15, %v4334_v26  ;;  %v1087_v30 = vmul.f32 %v1069_v45, %v4373_v13  ;;  %v4388_v27 = vsel %vm913_vm12, %v915_v37, %v911_v49  ;;  %v748_v29 = vmul.f32 0.3275911, %v4380_v21 }
 0x1dd   : > { %v1316_v42 = vmul.f32 %v1298_v17, %v4197_v14  ;;  %v1305_v43 = vsub.f32 1.0, %v1287_v40  ;;  %v1047_v16 = vmul.f32 1.0614054, %v4388_v27  ;;  %v4394_v10 = vadd.f32 %v639_v63, %v4068_v20  ;;  %v4403_v14 = vld [vmem:[%s6149_s5] sm:$0x7] }
 0x1de   : > { %v1258_v31 = vmul.f32 1.442695, %v1229_v41  ;;  %v1105_v38 = vadd.f32 1.4214138, %v1087_v30  ;;  %v1227_v51 = vsub.f32 0.0, %v1209_v46  ;;  %v4396_v53 = vadd.f32 1.0, %v748_v29 }
 0x1df   : > { %v1278_v7 = vmul.f32 %v3513_v33, %v1188_v54  ;;  %vm691_vm13 = vcmp.ge.f32.partialorder %v4256_v59, 0.0  ;;  %vm687_vm14 = vcmp.ge.f32.partialorder %v4283_v44, 0.0  ;;  %v1065_v57 = vadd.f32 -1.4531521, %v1047_v16 }
 0x1e0   : > { %v4405_v17 = vpop.eup %3514  ;;  %v1139_v20 = vadd.f32 -0.28449672, %v1121_v58  ;;  %v1123_v15 = vmul.f32 %v1105_v38, %v4373_v13  ;;  %v1262_v41 = vmul.f32 1.442695, %v1231_v61  ;;  %3516 = vrcp.f32 %v4396_v53 }
 0x1e1   : > { %v1323_v33 = vmul.f32 %v1305_v43, %v4327_v18  ;;  %v1083_v40 = vmul.f32 %v1065_v57, %v4388_v27  ;;  %v979_v45 = vmul.f32 %v4405_v17, %v4376_v55  ;;  %v4414_v37 = vmul.f32 0.70710677, %v4394_v10 }
 0x1e2   : > { %v4418_v46 = vmul.f32 %v4341_v23, %v4171_v62  ;;  %v1141_v63 = vadd.f32 -0.28449672, %v1123_v15  ;;  %v1254_v54 = vmul.f32 1.442695, %v1227_v51  ;;  %v4421_v61 = vperm.slane %v4403_v14, 1 }
 0x1e3   : > { %v4423_v49 = vadd.f32 1.0, %v1316_v42  ;;  %v1296_v18 = vsub.f32 1.0, %v1278_v7  ;;  %v1101_v58 = vadd.f32 1.4214138, %v1083_v40  ;;  %v980_v30 = vsub.f32 1.0, %v979_v45 }
 0x1e4   : > { %v1157_v29 = vmul.f32 %v1139_v20, %v4334_v26  ;;  %3518 = vpow2.f32 %v1258_v31  ;;  %v4429_v43 = vsel %vm691_vm13, 1.0, %v6269_v3  ;;  %v4434_v62 = vsel %vm687_vm14, 1.0, %v6269_v3 }
 0x1e5   : > { %v1341_v23 = vadd.f32 1.0, %v1323_v33  ;;  %3520 = vpow2.f32 %v1262_v41  ;;  %v1119_v42 = vmul.f32 %v1101_v58, %v4388_v27  ;;  %v4438_v16 = vand.u32 2147483647, %v4414_v37 }
 0x1e6   : > { %v3517_v38 = vpop.eup %3516  ;;  %v1159_v31 = vmul.f32 %v1141_v63, %v4373_v13  ;;  %3522 = vpow2.f32 %v1254_v54  ;;  %v981_v59 = vmul.f32 %v4405_v17, %v980_v30  ;;  %v1371_v51 = vmul.f32 %v4421_v61, %v4155_v47 }
 0x1e7   : > { %vm833_vm15 = vweird.f32 %v3927_v39  ;;  %vm834_vm5 = vweird.f32 %v3971_v22  ;;  %v1314_v44 = vmul.f32 %v1296_v18, %v4332_v0  ;;  %v1137_v7 = vadd.f32 -0.28449672, %v1119_v42 }
 0x1e8   : > { %v989_v57 = vand.u32 2147483648, %v4376_v55  ;;  %v1009_v20 = vmul.f32 %v3517_v38, %v4396_v53  ;;  %v1175_v15 = vadd.f32 0.2548296, %v1157_v29  ;;  %vm984_vm6 = vweird.f32 %v4405_v17  ;;  %1408 = vrot.lane.b32.xlu1 %v1371_v51, %s3593_s8 }
 0x1e9   : > { %v1216_v41 = vmul.f32 %v4380_v21, %v4380_v21  ;;  %v749_v33 = vmul.f32 0.3275911, %v4438_v16  ;;  %vm878_vm7 = vweird.f32 %v4032_v56  ;;  %vm879_vm9 = vweird.f32 %v4087_v32 }
 0x1ea   : > { %v1155_v47 = vmul.f32 %v1137_v7, %v4388_v27  ;;  %v1010_v0 = vsub.f32 1.0, %v1009_v20  ;;  %v1017_v40 = vand.u32 2147483647, %v4396_v53  ;;  %v4459_v45 = vperm.slane %v4403_v14, 2  ;;  %v3519_v63 = vpop.eup %3518 }
 0x1eb   : > { %v1177_v54 = vadd.f32 0.2548296, %v1159_v31  ;;  %v982_v21 = vadd.f32 %v4405_v17, %v981_v59  ;;  %v1019_v18 = vand.u32 2147483648, %v4396_v53  ;;  %v4463_v58 = vadd.f32 1.0, %v749_v33  ;;  %v3521_v30 = vpop.eup %3520 }
 0x1ec   : > { %v1173_v29 = vadd.f32 0.2548296, %v1155_v47  ;;  %v1011_v42 = vmul.f32 %v3517_v38, %v1010_v0  ;;  %vm1014_vm12 = vweird.f32 %v3517_v38  ;;  %v1372_v51 = vmul.f32 %v4459_v45, %v4187_v11  ;;  %v3523_v7 = vpop.eup %3522 }
 0x1ed   : > { %v1332_v20 = vadd.f32 1.0, %v1314_v44  ;;  %vm983_vm13 = vweird.f32 %v4376_v55  ;;  %v987_v35 = vand.u32 2147483647, %v4376_v55  ;;  %3524 = vrcp.f32 %v4463_v58 }
 0x1ee   : > { %v1193_v31 = vmul.f32 %v1175_v15, %v4334_v26  ;;  %vm4473_vm14 = vmor %vm983_vm13, %vm984_vm6  ;;  %v990_v33 = vor.u32 1.1754944e-38, %v989_v57  ;;  %v1012_v47 = vadd.f32 %v3517_v38, %v1011_v42  ;;  %vm1013_vm2 = vweird.f32 %v4396_v53  ;;  %1410 = vrot.lane.b32.xlu2 %v1372_v51, %s3593_s8 }
 0x1ef   : > { %v1191_v11 = vmul.f32 %v1173_v29, %v4388_v27  ;;  %v986_v55 = vsel %vm4473_vm14, %v4405_v17, %v982_v21  ;;  %vm1015_vm1 = vmor %vm1013_vm2, %vm1014_vm12  ;;  %v1020_v26 = vor.u32 1.1754944e-38, %v1019_v18  ;;  %v4485_v44 = vperm.slane %v4403_v14, 0 }
 0x1f0   : > { %v1195_v15 = vmul.f32 %v1177_v54, %v4373_v13  ;;  %v1016_v57 = vsel %vm1015_vm1, %v3517_v38, %v1012_v47  ;;  %vm1018_vm6 = vcmp.eq.f32.partialorder %v1017_v40, 8.507059e+37  ;;  %v1234_v0 = vsub.f32 0.0, %v1216_v41  ;;  %vm4505_vm1 = vmor %vm833_vm15, %vm834_vm5 }
 0x1f1   : > { %v1359_v53 = vmul.f32 %v1341_v23, %v4287_v9  ;;  %vm988_vm13 = vcmp.eq.f32.partialorder %v987_v35, 8.507059e+37  ;;  %v4489_v42 = vsel %vm1018_vm6, %v1020_v26, %v1016_v57  ;;  %v1370_v27 = vmul.f32 %v4485_v44, %v4200_v19  ;;  %vm4521_vm2 = vmor %vm878_vm7, %vm879_vm9 }
 0x1f2   : > { %v4494_v17 = vmul.f32 %v1332_v20, %v4292_v8  ;;  %v4496_v21 = vsel %vm988_vm13, %v990_v33, %v986_v55  ;;  %v1054_v14 = vmul.f32 1.0614054, %v4489_v42  ;;  %v1375_v13 = vmul.f32 %v4459_v45, %v4268_v24 }
 0x1f3   : > { %v3525_v38 = vpop.eup %3524  ;;  %v4509_v19 = vmul.f32 %v3519_v63, %v1193_v31  ;;  %v1281_v8 = vmul.f32 %v3523_v7, %v1191_v11  ;;  %1406 = vrot.lane.b32.xlu0 %v1370_v27, %s3593_s8  ;;  %v1382_v35 = vmul.f32 %v4485_v44, %v4339_v28  ;;  %v832_v24 = vadd.f32 %v3971_v22, %v4037_v25 }
 0x1f4   : > { %v1285_v23 = vmul.f32 %v3521_v30, %v1195_v15  ;;  %v1072_v41 = vadd.f32 -1.4531521, %v1054_v14  ;;  %v1268_v40 = vmul.f32 1.442695, %v1234_v0  ;;  %v1024_v54 = vmul.f32 %v3525_v38, %v4463_v58 }
 0x1f5   : > { %v1052_v18 = vmul.f32 1.0614054, %v4496_v21  ;;  %v1032_v28 = vand.u32 2147483647, %v4463_v58  ;;  %1430 = vrot.lane.b32.xlu1 %v1382_v35, %s3593_s8  ;;  %v837_v25 = vand.u32 2147483647, %v3927_v39  ;;  %v877_v30 = vadd.f32 %v4087_v32, %v4163_v6 }
 0x1f6   : > { %v1090_v29 = vmul.f32 %v1072_v41, %v4489_v42  ;;  %v1025_v51 = vsub.f32 1.0, %v1024_v54  ;;  %v1034_v7 = vand.u32 2147483648, %v4463_v58  ;;  %1416 = vrot.lane.b32.xlu2 %v1375_v13, %s3593_s8  ;;  %v836_v20 = vsel %vm4505_vm1, %v3971_v22, %v832_v24 }
 0x1f7   : > { %vm689_vm15 = vcmp.ge.f32.partialorder %v4215_v50, 0.0  ;;  %v1299_v31 = vsub.f32 1.0, %v1281_v8  ;;  %v1373_v39 = vmul.f32 %v4485_v44, %v4418_v46  ;;  %vm838_vm5 = vcmp.eq.f32.partialorder %v837_v25, 8.507059e+37 }
 0x1f8   : > { %v882_v6 = vand.u32 2147483647, %v4032_v56  ;;  %v1108_v59 = vadd.f32 1.4214138, %v1090_v29  ;;  %v1026_v33 = vmul.f32 %v3525_v38, %v1025_v51  ;;  %vm1029_vm7 = vweird.f32 %v3525_v38 }
 0x1f9   : > { %v881_v47 = vsel %vm4521_vm2, %v4087_v32, %v877_v30  ;;  %v1303_v11 = vsub.f32 1.0, %v1285_v23  ;;  %vm1028_vm9 = vweird.f32 %v4463_v58  ;;  %v4546_v22 = vsel %vm838_vm5, %v3989_v36, %v836_v20 }
 0x1fa   : > { %vm883_vm12 = vcmp.eq.f32.partialorder %v882_v6, 8.507059e+37  ;;  %v1126_v55 = vmul.f32 %v1108_v59, %v4489_v42  ;;  %v1027_v46 = vadd.f32 %v3525_v38, %v1026_v33  ;;  %v1042_v26 = vmul.f32 1.0614054, %v4546_v22  ;;  %vm1030_vm14 = vmor %vm1028_vm9, %vm1029_vm7 }
 0x1fb   : > { %v1385_v56 = vmul.f32 %v4485_v44, %v1359_v53  ;;  %v1317_v15 = vmul.f32 %v1299_v31, %v4434_v62  ;;  %v1070_v57 = vadd.f32 -1.4531521, %v1052_v18  ;;  %v1035_v0 = vor.u32 1.1754944e-38, %v1034_v7  ;;  %1412 = vrot.lane.b32.xlu0 %v1373_v39, %s3593_s8 }
 0x1fc   : > { %v4554_v32 = vsel %vm883_vm12, %v4158_v48, %v881_v47  ;;  %v1144_v36 = vadd.f32 -0.28449672, %v1126_v55  ;;  %v1031_v58 = vsel %vm1030_vm14, %v3525_v38, %v1027_v46  ;;  %vm1033_vm6 = vcmp.eq.f32.partialorder %v1032_v28, 8.507059e+37 }
 0x1fd   : > { %v1060_v27 = vadd.f32 -1.4531521, %v1042_v26  ;;  %v1352_v14 = vmul.f32 %v4423_v49, %v4181_v1  ;;  %v4558_v13 = vsel %vm1033_vm6, %v1035_v0, %v1031_v58  ;;  %v1217_v62 = vmul.f32 %v4438_v16, %v4438_v16  ;;  %v6285_v58 = vld [vmem:[#allocation6_spill] sm:$0xff] }
 0x1fe   : > { %v1045_v53 = vmul.f32 1.0614054, %v4554_v32  ;;  %v1162_v9 = vmul.f32 %v1144_v36, %v4489_v42  ;;  %3526 = vpow2.f32 %v1268_v40  ;;  %v1055_v48 = vmul.f32 1.0614054, %v4558_v13  ;;  %1436 = vrot.lane.b32.xlu2 %v1385_v56, %s3593_s8 }
 0x1ff   : > { %v1078_v8 = vmul.f32 %v1060_v27, %v4546_v22  ;;  %v1335_v38 = vadd.f32 1.0, %v1317_v15  ;;  %v1088_v35 = vmul.f32 %v1070_v57, %v4496_v21  ;;  %v1376_v1 = vmul.f32 %v4485_v44, %v4494_v17 }
 0x200   : > { %v1063_v49 = vadd.f32 -1.4531521, %v1045_v53  ;;  %v1301_v16 = vsub.f32 1.0, %v4509_v19  ;;  %v1321_v24 = vmul.f32 %v1303_v11, %v4429_v43  ;;  %v1180_v23 = vadd.f32 0.2548296, %v1162_v9  ;;  %v6287_v53 = vld [vmem:[#allocation13_spill] sm:$0xff] }
 0x201   : > { %v1073_v41 = vadd.f32 -1.4531521, %v1055_v48  ;;  %v651_v40 = vmul.f32 0.5, %v4262_v12  ;;  %v1235_v54 = vsub.f32 0.0, %v1217_v62  ;;  %v1096_v63 = vadd.f32 1.4214138, %v1078_v8 }
 0x202   : > { %v1081_v18 = vmul.f32 %v1063_v49, %v4554_v32  ;;  %v1138_v28 = vadd.f32 -0.28449672, %v4353_v5  ;;  %v707_v25 = vsel %vm689_vm15, 1.0, %v6269_v3  ;;  %v1198_v17 = vmul.f32 %v1180_v23, %v4489_v42  ;;  %v6288_v23 = vld [vmem:[#allocation11_spill] sm:$0xff] }
 0x203   : > { %v1091_v19 = vmul.f32 %v1073_v41, %v4558_v13  ;;  %v1353_v30 = vmul.f32 %v1335_v38, %v651_v40  ;;  %v1106_v43 = vadd.f32 1.4214138, %v1088_v35  ;;  %v1114_v29 = vmul.f32 %v1096_v63, %v4546_v22  ;;  %1418 = vrot.lane.b32.xlu0 %v1376_v1, %s3593_s8 }
 0x204   : > { %v1099_v12 = vadd.f32 1.4214138, %v1081_v18  ;;  %v3527_v51 = vpop.eup %3526  ;;  %v1319_v7 = vmul.f32 %v1301_v16, %v707_v25  ;;  %v1339_v20 = vadd.f32 1.0, %v1321_v24  ;;  %v1378_v5 = vmul.f32 %v4459_v45, %v1352_v14  ;;  %v6286_v14 = vld [vmem:[#allocation14_spill] sm:$0xff] }
 0x205   : > { %v1109_v31 = vadd.f32 1.4214138, %v1091_v19  ;;  %v1288_v39 = vmul.f32 %v3527_v51, %v1198_v17  ;;  %v1270_v50 = vmul.f32 1.442695, %v1235_v54  ;;  %v1132_v6 = vadd.f32 -0.28449672, %v1114_v29 }
 0x206   : > { %v1117_v42 = vmul.f32 %v1099_v12, %v4554_v32  ;;  %v1156_v59 = vmul.f32 %v1138_v28, %v4270_v34  ;;  %v655_v33 = vmul.f32 0.5, %v4233_v60  ;;  %v1214_v47 = vmul.f32 %v4365_v52, %v4365_v52  ;;  %1422 = vrot.lane.b32.xlu2 %v1378_v5, %s3593_s8  ;;  %v6289_v54 = vld [vmem:[#allocation5_spill] sm:$0xff]  ;;  %v6291_v19 = vld [vmem:[#allocation12_spill] sm:$0xff] }
 0x207   : > { %v1127_v11 = vmul.f32 %v1109_v31, %v4558_v13  ;;  %v1124_v55 = vmul.f32 %v1106_v43, %v4496_v21  ;;  %v1150_v46 = vmul.f32 %v1132_v6, %v4546_v22  ;;  %v1379_v56 = vmul.f32 %v4485_v44, %v1353_v30 }
 0x208   : > { %v1135_v26 = vadd.f32 -0.28449672, %v1117_v42  ;;  %v1337_v15 = vadd.f32 1.0, %v1319_v7  ;;  %v1357_v57 = vmul.f32 %v1339_v20, %v655_v33  ;;  %vm694_vm13 = vcmp.ge.f32.partialorder %v4368_v2, 0.0  ;;  %v6290_v2 = vld [vmem:[#allocation8_spill] sm:$0xff] }
 0x209   : > { %v1145_v0 = vadd.f32 -0.28449672, %v1127_v11  ;;  %v1306_v60 = vsub.f32 1.0, %v1288_v39  ;;  %3528 = vpow2.f32 %v1270_v50  ;;  %v1168_v36 = vadd.f32 0.2548296, %v1150_v46  ;;  %v6292_v11 = vld [vmem:[#allocation10_spill] sm:$0xff] }
 0x20a   : > { %v1153_v52 = vmul.f32 %v1135_v26, %v4554_v32  ;;  %vm682_vm1 = vcmp.ge.f32.partialorder %v6285_v58, 0.0  ;;  %v1174_v27 = vadd.f32 0.2548296, %v1156_v59  ;;  %3530 = vpow2.f32 %v6286_v14 }
 0x20b   : > { %v1163_v62 = vmul.f32 %v1145_v0, %v4558_v13  ;;  %v653_v9 = vmul.f32 0.5, %v6287_v53  ;;  %v1142_v44 = vadd.f32 -0.28449672, %v1124_v55  ;;  %v1186_v48 = vmul.f32 %v1168_v36, %v4546_v22  ;;  %1424 = vrot.lane.b32.xlu0 %v1379_v56, %s3593_s8  ;;  %v6293_v0 = vld [vmem:[#allocation7_spill] sm:$0xff]  ;;  %v6294_v53 = vld [vmem:[#allocation16_spill] sm:$0xff] }
 0x20c   : > { %v1171_v8 = vadd.f32 0.2548296, %v1153_v52  ;;  %v1232_v38 = vsub.f32 0.0, %v1214_v47  ;;  %v712_v35 = vsel %vm694_vm13, 1.0, %v6269_v3  ;;  %v1383_v49 = vmul.f32 %v4421_v61, %v1357_v57 }
 0x20d   : > { %v1181_v1 = vadd.f32 0.2548296, %v1163_v62  ;;  %v1355_v16 = vmul.f32 %v1337_v15, %v653_v9  ;;  %v1324_v24 = vmul.f32 %v1306_v60, %v712_v35  ;;  %v1276_v41 = vmul.f32 %v6288_v23, %v1186_v48  ;;  %v6295_v48 = vld [vmem:[#allocation9_spill] sm:$0xff] }
 0x20e   : > { %v1189_v40 = vmul.f32 %v1171_v8, %v4554_v32  ;;  %v646_v63 = vmul.f32 0.5, %v6289_v54  ;;  %v1192_v22 = vmul.f32 %v1174_v27, %v4270_v34  ;;  %1432 = vrot.lane.b32.xlu2 %v1383_v49, %s3593_s8  ;;  %vm685_vm2 = vcmp.ge.f32.partialorder %v6290_v2, 0.0 }
 0x20f   : > { %v1199_v18 = vmul.f32 %v1181_v1, %v4558_v13  ;;  %v3529_v28 = vpop.eup %3528  ;;  %v1160_v25 = vmul.f32 %v1142_v44, %v4496_v21  ;;  %v1294_v17 = vsub.f32 1.0, %v1276_v41  ;;  %v700_v32 = vsel %vm682_vm1, 1.0, %v6269_v3 }
 0x210   : > { %v1279_v30 = vmul.f32 %v6291_v19, %v1189_v40  ;;  %v3531_v43 = vpop.eup %3530  ;;  %v1264_v29 = vmul.f32 1.442695, %v1232_v38  ;;  %vm695_vm15 = vcmp.ge.f32.partialorder %v4414_v37, 0.0  ;;  %v1342_v13 = vadd.f32 1.0, %v1324_v24  ;;  %v6296_v24 = vld [vmem:[#allocation15_spill] sm:$0xff] }
 0x211   : > { %v1289_v34 = vmul.f32 %v3529_v28, %v1199_v18  ;;  %v1312_v12 = vmul.f32 %v1294_v17, %v700_v32  ;;  %v1381_v7 = vmul.f32 %v4459_v45, %v1355_v16  ;;  %v703_v20 = vsel %vm685_vm2, 1.0, %v6269_v3 }
 0x212   : > { %v1297_v51 = vsub.f32 1.0, %v1279_v30  ;;  %v1282_v31 = vmul.f32 %v3531_v43, %v1192_v22  ;;  %v658_v5 = vmul.f32 0.5, %v4350_v4  ;;  %v1178_v50 = vadd.f32 0.2548296, %v1160_v25 }
 0x213   : > { %v1307_v39 = vsub.f32 1.0, %v1289_v34  ;;  %v713_v6 = vsel %vm695_vm15, 1.0, %v6269_v3  ;;  %v1330_v42 = vadd.f32 1.0, %v1312_v12  ;;  %1428 = vrot.lane.b32.xlu0 %v1381_v7, %s3593_s8  ;;  %3532 = vpow2.f32 %v1264_v29 }
 0x214   : > { %v1315_v59 = vmul.f32 %v1297_v51, %v703_v20  ;;  %v1360_v33 = vmul.f32 %v1342_v13, %v658_v5  ;;  %vm688_vm5 = vcmp.ge.f32.partialorder %v6292_v11, 0.0  ;;  %v659_v55 = vmul.f32 0.5, %v4394_v10 }
 0x215   : > { %v1325_v37 = vmul.f32 %v1307_v39, %v713_v6  ;;  %v1348_v47 = vmul.f32 %v1330_v42, %v646_v63  ;;  %v1300_v26 = vsub.f32 1.0, %v1282_v31  ;;  %v1196_v4 = vmul.f32 %v1178_v50, %v4496_v21 }
 0x216   : > { %v1333_v15 = vadd.f32 1.0, %v1315_v59  ;;  %v649_v60 = vmul.f32 0.5, %v6293_v0  ;;  %v1386_v36 = vmul.f32 %v4421_v61, %v1360_v33  ;;  %v706_v58 = vsel %vm688_vm5, 1.0, %v6269_v3 }
 0x217   : > { %v1343_v46 = vadd.f32 1.0, %v1325_v37  ;;  %v1374_v56 = vmul.f32 %v4421_v61, %v1348_v47  ;;  %v1318_v10 = vmul.f32 %v1300_v26, %v706_v58  ;;  %vm692_vm7 = vcmp.ge.f32.partialorder %v6294_v53, 0.0 }
 0x218   : > { %v1351_v62 = vmul.f32 %v1333_v15, %v649_v60  ;;  %v652_v8 = vmul.f32 0.5, %v6295_v48  ;;  %v710_v38 = vsel %vm692_vm7, 1.0, %v6269_v3  ;;  %v656_v23 = vmul.f32 0.5, %v6296_v24 }
 0x219   : > { %v1361_v57 = vmul.f32 %v1343_v46, %v659_v55  ;;  %1414 = vrot.lane.b32.xlu1 %v1374_v56, %s3593_s8  ;;  %v3533_v52 = vpop.eup %3532  ;;  %v1336_v21 = vadd.f32 1.0, %v1318_v10  ;;  %vm1442_vm9 = vcmask 154624   ;;  %vm1479_vm12 = vcmask 400384  }
 0x21a   : > { %v1286_v14 = vmul.f32 %v3533_v52, %v1196_v4  ;;  %v1377_v44 = vmul.f32 %v4421_v61, %v1351_v62  ;;  %vm5011_vm14 = vmneg %vm1442_vm9  ;;  %vm6314_vm6 = vcmask 900096   ;;  %vm6330_vm5 = vcmask 736256  }
 0x21b   : > { %v1387_v27 = vmul.f32 %v4459_v45, %v1361_v57  ;;  %1438 = vrot.lane.b32.xlu0 %v1386_v36, %s3593_s8  ;;  %v1354_v35 = vmul.f32 %v1336_v21, %v652_v8  ;;  %vm6317_vm13 = vmmov %vm6314_vm6 }
 0x21c   : > { %v1304_v9 = vsub.f32 1.0, %v1286_v14  ;;  %vm6323_vm1 = vmmov %vm6314_vm6 }
 0x21d   : > { %1440 = vrot.lane.b32.xlu2 %v1387_v27, %s3593_s8  ;;  %v1380_v16 = vmul.f32 %v4421_v61, %v1354_v35  ;;  %vm6327_vm2 = vmmov %vm6323_vm1 }
 0x21e   : > { %v1322_v1 = vmul.f32 %v1304_v9, %v710_v38  ;;  %vm6329_vm15 = vmmov %vm6323_vm1 }
 0x21f   : > { %vm6333_vm7 = vmmov %vm6323_vm1 }
 0x220   : > { %v1340_v49 = vadd.f32 1.0, %v1322_v1 }
 0x221   : > { %1420 = vrot.lane.b32.xlu1 %v1377_v44, %s3593_s8 }
 0x222   : > { %v1358_v41 = vmul.f32 %v1340_v49, %v656_v23 }
 0x224   : > { %v1384_v40 = vmul.f32 %v4459_v45, %v1358_v41 }
 0x229   : > { %1426 = vrot.lane.b32.xlu1 %v1380_v16, %s3593_s8 }
 0x231   : > { %1434 = vrot.lane.b32.xlu1 %v1384_v40, %s3593_s8 }
 0x248   : > { %v1411_v45 = vpop.permute.xlu2 %1410 }
 0x250   : > { %v1417_v19 = vpop.permute.xlu2 %1416 }
 0x258   : > { %v4684_v32 = vpop.permute.xlu2 %1436 }
 0x259   : > { %v1478_v15 = vsel %vm1442_vm9, 0.0, %v4684_v32 }
 0x25a   : > { %v1409_v54 = vpop.permute.xlu1 %1408 }
 0x25b   : > { %v4662_v18 = vsel %vm1442_vm9, %v1409_v54, %v1411_v45 }
 0x25c   : > { %6297 = vst [vmem:[#allocation6_spill] sm:$0xff] %v4662_v18  ;;  %v4668_v2 = vsel %vm1479_vm12, %v4662_v18, 0.0 }
 0x260   : > { %v1423_v7 = vpop.permute.xlu2 %1422 }
 0x265   : > { %v4644_v63 = vpop.permute.xlu0 %1406 }
 0x266   : > { %v4648_v3 = vsel %vm1442_vm9, %v4644_v63, %v1409_v54  ;;  %v1473_v61 = vsel %vm1442_vm9, 0.0, %v4644_v63 }
 0x267   : > { %v4653_v22 = vpack.i.bf16 %v4648_v3, %v1473_v61  ;;  %v4678_v30 = vpop.permute.xlu1 %1430 }
 0x268   : > { %v4746_v11 = vpop.permute.xlu2 %1432  ;;  %v1477_v46 = vsel %vm1442_vm9, 0.0, %v4678_v30 }
 0x269   : > { %3128 = vrot.lane.b32.xlu2 %v4653_v22, %s3586_s13  ;;  %3118 = vrot.lane.b32.xlu1 %v4653_v22, %s3587_s14  ;;  %v4757_v55 = vsel %vm1442_vm9, %v4678_v30, %v4746_v11 }
 0x26a   : > { %3108 = vrot.lane.b32.xlu0 %v4653_v22, %s3583_s10  ;;  %v3217_v26 = vpack.i.bf16 %v4757_v55, %v1477_v46 }
 0x26d   : > { %v4664_v28 = vpop.permute.xlu0 %1412 }
 0x26e   : > { %v1474_v25 = vsel %vm1442_vm9, 0.0, %v4664_v28 }
 0x26f   : > { %v3137_v17 = vpack.i.bf16 %v1474_v25, %v4668_v2 }
 0x271   : > { %3138 = vrot.lane.b32.xlu1 %v3137_v17, %s3583_s10 }
 0x272   : > { %3113 = vrot.lane.b32.xlu0 %v4653_v22, %s3584_s11 }
 0x275   : > { %v4682_v43 = vpop.permute.xlu0 %1418 }
 0x276   : > { %v1475_v39 = vsel %vm1442_vm9, 0.0, %v4682_v43 }
 0x277   : > { %v1441_v60 = vpop.permute.xlu2 %1440 }
 0x27a   : > { %3123 = vrot.lane.b32.xlu0 %v4653_v22, %s3585_s12 }
 0x27d   : > { %v4700_v51 = vpop.permute.xlu0 %1424 }
 0x27e   : > { %v1476_v33 = vsel %vm1442_vm9, 0.0, %v4700_v51 }
 0x282   : > { %3133 = vrot.lane.b32.xlu0 %v4653_v22, %s3590_s17 }
 0x285   : > { %v1429_v6 = vpop.permute.xlu0 %1428 }
 0x28b   : > { %v1415_v29 = vpop.permute.xlu1 %1414 }
 0x28c   : > { %v4688_v34 = vsel %vm1442_vm9, %v4664_v28, %v1415_v29  ;;  %v4691_v13 = vsel %vm1442_vm9, %v1415_v29, %v1417_v19 }
 0x28d   : > { %6298 = vst [vmem:[#allocation14_spill] sm:$0xff] %v4691_v13  ;;  %v4694_v12 = vpack.i.bf16 %v4688_v34, %v1474_v25  ;;  %v4765_v4 = vpop.permute.xlu0 %1438  ;;  %v1481_v16 = vsel %vm1479_vm12, %v4691_v13, 0.0 }
 0x28e   : > { %v4771_v56 = vsel %vm1442_vm9, %v4684_v32, %v4765_v4  ;;  %v4842_v24 = vpack.i.bf16 %v4668_v2, %v1481_v16  ;;  %v4874_v25 = vsel %vm1442_vm9, %v4765_v4, %v1441_v60 }
 0x28f   : > { %3148 = vrot.lane.b32.xlu2 %v4694_v12, %s3587_s14  ;;  %3143 = vrot.lane.b32.xlu1 %v4694_v12, %s3584_s11  ;;  %v3242_v57 = vpack.i.bf16 %v4771_v56, %v1478_v15  ;;  %6302 = vst [vmem:[#allocation8_spill] sm:$0xff] %v4874_v25 }
 0x290   : > { %3158 = vrot.lane.b32.xlu0 %v4694_v12, %s3586_s13 }
 0x293   : > { %v1421_v20 = vpop.permute.xlu1 %1420 }
 0x294   : > { %v4706_v31 = vsel %vm1442_vm9, %v4682_v43, %v1421_v20  ;;  %v4709_v5 = vsel %vm1442_vm9, %v1421_v20, %v1423_v7 }
 0x295   : > { %6299 = vst [vmem:[#allocation13_spill] sm:$0xff] %v4709_v5  ;;  %v4714_v50 = vpack.i.bf16 %v4706_v31, %v1475_v39  ;;  %v1482_v54 = vsel %vm1479_vm12, %v4709_v5, 0.0 }
 0x297   : > { %3153 = vrot.lane.b32.xlu2 %v4694_v12, %s3585_s12  ;;  %1506 = vrot.lane.b32.xlu1 %v4688_v34, %s3583_s10 }
 0x298   : > { %3168 = vrot.lane.b32.xlu0 %v4714_v50, %s3584_s11 }
 0x29b   : > { %v1427_v42 = vpop.permute.xlu1 %1426 }
 0x29c   : > { %v4723_v59 = vsel %vm1442_vm9, %v1427_v42, %v1429_v6  ;;  %v4733_v37 = vsel %vm1442_vm9, %v4700_v51, %v1427_v42 }
 0x29d   : > { %6300 = vst [vmem:[#allocation11_spill] sm:$0xff] %v4723_v59  ;;  %v4738_v47 = vpack.i.bf16 %v4733_v37, %v1476_v33  ;;  %v1483_v40 = vsel %vm1479_vm12, %v4723_v59, 0.0 }
 0x29e   : > { %v4858_v61 = vpack.i.bf16 %v1482_v54, %v1483_v40 }
 0x29f   : > { %3173 = vrot.lane.b32.xlu2 %v4714_v50, %s3583_s10  ;;  %3163 = vrot.lane.b32.xlu1 %v4694_v12, %s3590_s17 }
 0x2a0   : > { %3178 = vrot.lane.b32.xlu0 %v4714_v50, %s3585_s12 }
 0x2a3   : > { %v1435_v0 = vpop.permute.xlu1 %1434 }
 0x2a4   : > { %v4884_v17 = vsel %vm1442_vm9, %v4746_v11, %v1435_v0  ;;  %vm6336_vm9 = vmmov %vm6330_vm5 }
 0x2a5   : > { %6303 = vst [vmem:[#allocation12_spill] sm:$0xff] %v4884_v17  ;;  %v1484_v42 = vsel %vm1479_vm12, %v4884_v17, 0.0 }
 0x2a7   : > { %3188 = vrot.lane.b32.xlu2 %v4714_v50, %s3590_s17  ;;  %3183 = vrot.lane.b32.xlu1 %v4714_v50, %s3586_s13 }
 0x2a8   : > { %3198 = vrot.lane.b32.xlu0 %v4738_v47, %s3583_s10 }
 0x2af   : > { %3193 = vrot.lane.b32.xlu2 %v4738_v47, %s3584_s11  ;;  %3203 = vrot.lane.b32.xlu1 %v4738_v47, %s3585_s12 }
 0x2b0   : > { %3213 = vrot.lane.b32.xlu0 %v4738_v47, %s3590_s17 }
 0x2b7   : > { %3208 = vrot.lane.b32.xlu2 %v4738_v47, %s3586_s13  ;;  %3218 = vrot.lane.b32.xlu1 %v3217_v26, %s3583_s10 }
 0x2b8   : > { %3228 = vrot.lane.b32.xlu0 %v3217_v26, %s3586_s13 }
 0x2bf   : > { %3223 = vrot.lane.b32.xlu2 %v3217_v26, %s3585_s12  ;;  %3233 = vrot.lane.b32.xlu1 %v3217_v26, %s3590_s17 }
 0x2c0   : > { %3243 = vrot.lane.b32.xlu0 %v3242_v57, %s3585_s12 }
 0x2c3   : > { %v4800_v58 = vpop.permute.xlu2 %3128 }
 0x2c7   : > { %3238 = vrot.lane.b32.xlu2 %v3242_v57, %s3583_s10  ;;  %3253 = vrot.lane.b32.xlu1 %v3217_v26, %s3588_s15 }
 0x2c8   : > { %3248 = vrot.lane.b32.xlu0 %v3217_v26, %s3584_s11 }
 0x2cf   : > { %3258 = vrot.lane.b32.xlu2 %v4738_v47, %s3588_s15  ;;  %3263 = vrot.lane.b32.xlu1 %v4714_v50, %s3588_s15 }
 0x2d0   : > { %3273 = vrot.lane.b32.xlu0 %v4694_v12, %s3588_s15 }
 0x2d7   : > { %3268 = vrot.lane.b32.xlu2 %v3217_v26, %s3589_s16  ;;  %3278 = vrot.lane.b32.xlu1 %v3242_v57, %s3586_s13 }
 0x2d8   : > { %3298 = vrot.lane.b32.xlu0 %v4714_v50, %s3589_s16 }
 0x2db   : > { %v4797_v52 = vpop.permute.xlu1 %3118 }
 0x2dc   : > { %v4792_v36 = vpop.permute.xlu0 %3108  ;;  %v6173_v14 = vunpack.i.h.bf16 %v4797_v52  ;;  %v3120_v62 = vunpack.i.l.bf16 %v4797_v52 }
 0x2dd   : > { %v6175_v38 = vunpack.i.h.bf16 %v4792_v36 }
 0x2de   : > { %v1798_v8 = vsel %vm379_vm4, %v3120_v62, %v6173_v14 }
 0x2df   : > { %3288 = vrot.lane.b32.xlu2 %v3242_v57, %s3590_s17  ;;  %3283 = vrot.lane.b32.xlu1 %v4738_v47, %s3589_s16 }
 0x2e0   : > { %3318 = vrot.lane.b32.xlu0 %v3242_v57, %s3589_s16 }
 0x2e3   : > { %v4812_v21 = vpop.permute.xlu1 %3138 }
 0x2e4   : > { %v4802_v27 = vpop.permute.xlu0 %3113  ;;  %6301 = vst [vmem:[#allocation5_spill] sm:$0xff] %v4812_v21  ;;  %v6165_v48 = vunpack.i.l.bf16 %v4812_v21 }
 0x2e5   : > { %v6167_v4 = vunpack.i.h.bf16 %v4802_v27  ;;  %v3115_v15 = vunpack.i.l.bf16 %v4802_v27 }
 0x2e6   : > { %v4835_v1 = vsel %vm297_vm11, %v6175_v38, %v6165_v48 }
 0x2e7   : > { %3293 = vrot.lane.b32.xlu2 %v4653_v22, %s3588_s15  ;;  %3303 = vrot.lane.b32.xlu1 %v3242_v57, %s3584_s11 }
 0x2e8   : > { %3323 = vrot.lane.b32.xlu0 %v3217_v26, %s3587_s14 }
 0x2e9   : > { %v4808_v10 = vpop.permute.xlu2 %3148 }
 0x2ea   : > { %v6174_v53 = vunpack.i.h.bf16 %v4808_v10  ;;  %v3150_v9 = vunpack.i.l.bf16 %v4808_v10 }
 0x2ec   : > { %v1800_v44 = vsel %vm379_vm4, %v3150_v9, %v6174_v53  ;;  %v4824_v35 = vpop.permute.xlu0 %3123  ;;  %v1600_v9 = vsel %vm318_vm0, %v3115_v15, %v6167_v4 }
 0x2ed   : > { %2236 = vmatpush.msrb.mxu0 %v1800_v44 }
 0x2ef   : > { %3308 = vrot.lane.b32.xlu2 %v3242_v57, %s3588_s15  ;;  %3328 = vrot.lane.b32.xlu1 %v3242_v57, %s3587_s14 }
 0x2f0   : > { %2237 = vmatpush.msrb.mxu0 %v1798_v8  ;;  %3343 = vrot.lane.b32.xlu0 %v4714_v50, %s3587_s14 }
 0x2f1   : > { %v4837_v49 = vpop.permute.xlu2 %3153 }
 0x2f4   : > { %v4850_v23 = vpop.permute.xlu0 %3133 }
 0x2f7   : > { %3313 = vrot.lane.b32.xlu2 %v4694_v12, %s3589_s16  ;;  %3333 = vrot.lane.b32.xlu1 %v4653_v22, %s3589_s16  ;;  %v1485_v12 = vsel %vm1479_vm12, %v4874_v25, 0.0  ;;  %v5177_v25 = vld [vmem:[#allocation2 + $0x40] sm:$0xff] }
 0x2f8   : > { %3358 = vrot.lane.b32.xlu0 %v4842_v24, %s3587_s14  ;;  %v4905_v46 = vpack.i.bf16 %v1484_v42, %v1485_v12  ;;  %6319 = vst [vmem:[#allocation16_spill] sm:$0xff] %v5177_v25 }
 0x2f9   : > { %v4852_v41 = vpop.permute.xlu2 %3173 }
 0x2fa   : > { %v6176_v48 = vunpack.i.h.bf16 %v4852_v41 }
 0x2ff   : > { %3338 = vrot.lane.b32.xlu2 %v4738_v47, %s3587_s14  ;;  %3348 = vrot.lane.b32.xlu1 %v4858_v61, %s3584_s11 }
 0x300   : > { %3363 = vrot.lane.b32.xlu0 %v4858_v61, %s3583_s10 }
 0x301   : > { %v4866_v22 = vpop.permute.xlu2 %3188  ;;  %v4868_v45 = vpop.permute.xlu1 %3143 }
 0x302   : > { %v4870_v2 = vpop.permute.xlu0 %3158  ;;  %v6169_v47 = vunpack.i.h.bf16 %v4868_v45  ;;  %v3145_v11 = vunpack.i.l.bf16 %v4868_v45 }
 0x304   : > { %v1602_v60 = vsel %vm318_vm0, %v3145_v11, %v6169_v47 }
 0x307   : > { %3353 = vrot.lane.b32.xlu2 %v4842_v24, %s3584_s11  ;;  %3368 = vrot.lane.b32.xlu1 %v4858_v61, %s3585_s12 }
 0x308   : > { %3373 = vrot.lane.b32.xlu0 %v4842_v24, %s3585_s12 }
 0x309   : > { %v4886_v19 = vpop.permute.xlu2 %3193  ;;  %v4888_v29 = vpop.permute.xlu1 %1506 }
 0x30a   : > { %v6171_v7 = vunpack.i.h.bf16 %v4886_v19  ;;  %v3195_v20 = vunpack.i.l.bf16 %v4886_v19  ;;  %v4894_v39 = vpop.permute.xlu0 %3168 }
 0x30b   : > { %v6170_v50 = vunpack.i.h.bf16 %v4894_v39  ;;  %v3170_v6 = vunpack.i.l.bf16 %v4894_v39 }
 0x30c   : > { %v1606_v33 = vsel %vm318_vm0, %v3195_v20, %v6171_v7 }
 0x30d   : > { %2183 = vmatpush.msrb.mxu3 %v1606_v33  ;;  %v1604_v26 = vsel %vm318_vm0, %v3170_v6, %v6170_v50 }
 0x30f   : > { %1508 = vrot.lane.b32.xlu2 %v1481_v16, %s3583_s10  ;;  %3383 = vrot.lane.b32.xlu1 %v4905_v46, %s3583_s10 }
 0x310   : > { %2184 = vmatpush.msrb.mxu3 %v1604_v26  ;;  %3378 = vrot.lane.b32.xlu0 %v4858_v61, %s3586_s13 }
 0x311   : > { %v4917_v57 = vpop.permute.xlu2 %3208  ;;  %v4919_v0 = vpop.permute.xlu1 %3163 }
 0x312   : > { %2185 = vmatpush.msrb.mxu3 %v1602_v60  ;;  %v4924_v62 = vpop.permute.xlu0 %3178  ;;  %v3210_v5 = vunpack.i.l.bf16 %v4917_v57 }
 0x314   : > { %2186 = vmatpush.msrb.mxu3 %v1600_v9 }
 0x317   : > { %3393 = vrot.lane.b32.xlu2 %v4905_v46, %s3585_s12  ;;  %3388 = vrot.lane.b32.xlu1 %v4858_v61, %s3590_s17  ;;  %s3036_s12 = smul.u32 288, %s6490_s25 }
 0x318   : > { %3403 = vrot.lane.b32.xlu0 %v4842_v24, %s3590_s17 }
 0x319   : > { %v4935_v44 = vpop.permute.xlu2 %3223  ;;  %v4937_v8 = vpop.permute.xlu1 %3183 }
 0x31a   : > { %v4939_v16 = vpop.permute.xlu0 %3198  ;;  %v3225_v14 = vunpack.i.l.bf16 %v4935_v44 }
 0x31b   : > { %v6172_v9 = vunpack.i.h.bf16 %v4939_v16 }
 0x31f   : > { %3398 = vrot.lane.b32.xlu2 %v4842_v24, %s3586_s13  ;;  %3413 = vrot.lane.b32.xlu1 %v4905_v46, %s3586_s13 }
 0x320   : > { %3408 = vrot.lane.b32.xlu0 %v4858_v61, %s3588_s15 }
 0x321   : > { %v4947_v40 = vpop.permute.xlu2 %3238  ;;  %v4949_v54 = vpop.permute.xlu1 %3203 }
 0x322   : > { %v6166_v12 = vunpack.i.h.bf16 %v4947_v40  ;;  %v3240_v20 = vunpack.i.l.bf16 %v4947_v40  ;;  %v4953_v6 = vpop.permute.xlu0 %3213  ;;  %v6179_v53 = vunpack.i.h.bf16 %v4949_v54  ;;  %v3205_v38 = vunpack.i.l.bf16 %v4949_v54 }
 0x324   : > { %v1544_v42 = vsel %vm297_vm11, %v3240_v20, %v6166_v12  ;;  %v3200_v20 = vunpack.i.l.bf16 %v4939_v16  ;;  %v3175_v12 = vunpack.i.l.bf16 %v4852_v41 }
 0x325   : > { %2187 = vmatpush.msrb.mxu3 %v1544_v42 }
 0x326   : > { %v1540_v4 = vsel %vm297_vm11, %v3200_v20, %v6172_v9  ;;  %v1538_v50 = vsel %vm297_vm11, %v3175_v12, %v6176_v48  ;;  %v6178_v9 = vunpack.i.h.bf16 %v4935_v44 }
 0x327   : > { %3418 = vrot.lane.b32.xlu2 %v4905_v46, %s3590_s17  ;;  %3423 = vrot.lane.b32.xlu1 %v4905_v46, %s3584_s11 }
 0x328   : > { %3438 = vrot.lane.b32.xlu0 %v4858_v61, %s3589_s16 }
 0x329   : > { %v4964_v33 = vpop.permute.xlu2 %3258  ;;  %v4966_v11 = vpop.permute.xlu1 %3218 }
 0x32a   : > { %v6168_v26 = vunpack.i.h.bf16 %v4966_v11  ;;  %v3220_v15 = vunpack.i.l.bf16 %v4966_v11  ;;  %v4970_v60 = vpop.permute.xlu0 %3228 }
 0x32c   : > { %v1542_v42 = vsel %vm297_vm11, %v3220_v15, %v6168_v26  ;;  %v3110_v15 = vunpack.i.l.bf16 %v4792_v36  ;;  %v3141_v26 = vunpack.i.h.bf16 %v4812_v21 }
 0x32d   : > { %2188 = vmatpush.msrb.mxu3 %v1542_v42 }
 0x32f   : > { %3428 = vrot.lane.b32.xlu2 %v4905_v46, %s3588_s15  ;;  %3443 = vrot.lane.b32.xlu1 %v4905_v46, %s3589_s16 }
 0x330   : > { %2189 = vmatpush.msrb.mxu3 %v1540_v4  ;;  %3458 = vrot.lane.b32.xlu0 %v4858_v61, %s3587_s14  ;;  %v1536_v4 = vsel %vm297_vm11, %v3141_v26, %v4888_v29  ;;  %v2077_v26 = vld [vmem:[%s6148_s4 + $0x18] sm:$0xff] }
 0x331   : > { %v4990_v47 = vpop.permute.xlu2 %3268  ;;  %v4992_v42 = vpop.permute.xlu1 %3233 }
 0x332   : > { %2190 = vmatpush.msrb.mxu3 %v1538_v50  ;;  %v4997_v7 = vpop.permute.xlu0 %3243  ;;  %v6304_v50 = vunpack.i.h.bf16 %v4792_v36  ;;  %v6181_v36 = vunpack.i.h.bf16 %v4924_v62 }
 0x333   : > { %v6177_v61 = vunpack.i.h.bf16 %v4997_v7  ;;  %v3245_v20 = vunpack.i.l.bf16 %v4997_v7 }
 0x334   : > { %2191 = vmatpush.msrb.mxu3 %v1536_v4  ;;  %v1534_v12 = vsel %vm297_vm11, %v3110_v15, %v6304_v50  ;;  %v2076_v4 = vld [vmem:[%s6148_s4 + $0x10] sm:$0xff]  ;;  %v3180_v15 = vunpack.i.l.bf16 %v4924_v62 }
 0x335   : > { %v1742_v48 = vsel %vm358_vm10, %v3245_v20, %v6177_v61  ;;  %v1740_v20 = vsel %vm358_vm10, %v3225_v14, %v6178_v9  ;;  %v3235_v61 = vunpack.i.l.bf16 %v4992_v42  ;;  %v3155_v9 = vunpack.i.l.bf16 %v4837_v49 }
 0x336   : > { %2192 = vmatpush.msrb.mxu3 %v1534_v12  ;;  %2238 = vmatpush.msrb.mxu0 %v1742_v48 }
 0x337   : > { %3433 = vrot.lane.b32.xlu2 %v4842_v24, %s3588_s15  ;;  %3448 = vrot.lane.b32.xlu1 %v4905_v46, %s3587_s14  ;;  %v1738_v46 = vsel %vm358_vm10, %v3205_v38, %v6179_v53  ;;  %v3215_v53 = vunpack.i.l.bf16 %v4953_v6  ;;  %v3190_v38 = vunpack.i.l.bf16 %v4866_v22  ;;  %s5898_s15 = scalar_lea.vmem %s6150_s6, %s3036_s12 }
 0x338   : > { %2954 = vmatpush.msk.msrb.mxu3 %vm5011_vm14, %v4684_v32  ;;  %2098 = vperm.xlu0 %3105, %v2076_v4  }
 0x339   : > { %v5033_v48 = vpop.permute.xlu2 %3288  ;;  %v5035_v50 = vpop.permute.xlu1 %3253  ;;  %2239 = vmatpush.msrb.mxu0 %v1740_v20  ;;  %v6183_v20 = vunpack.i.h.bf16 %v4866_v22 }
 0x33a   : > { %v6180_v32 = vunpack.i.h.bf16 %v5033_v48  ;;  %v3290_v4 = vunpack.i.l.bf16 %v5033_v48  ;;  %2956 = vmatpush.msk.msrb.mxu3 %vm5011_vm14, %v4678_v30  ;;  %v5047_v14 = vpop.permute.xlu0 %3248  ;;  %v1736_v30 = vsel %vm358_vm10, %v3180_v15, %v6181_v36  ;;  %v5088_v36 = vld [vmem:[#allocation2] sm:$0xff] }
 0x33b   : > { %2240 = vmatpush.msrb.mxu0 %v1738_v46  ;;  %v2074_v46 = vld [vmem:[%s6148_s4] sm:$0xff]  ;;  %6309 = vst [vmem:[#allocation10_spill] sm:$0xff] %v5088_v36 }
 0x33c   : > { %2958 = vmatpush.msk.msrb.mxu3 %vm5011_vm14, %v4700_v51  ;;  %v1940_v12 = vsel %vm421_vm8, %v3290_v4, %v6180_v32  ;;  %v6307_v51 = vunpack.i.h.bf16 %v4992_v42 }
 0x33d   : > { %2289 = vmatpush.msrb.mxu1 %v1940_v12  ;;  %2241 = vmatpush.msrb.mxu0 %v1736_v30  ;;  %v3125_v12 = vunpack.i.l.bf16 %v4824_v35  ;;  %v2079_v30 = vld [vmem:[%s6148_s4 + $0x28] sm:$0xff] }
 0x33e   : > { %2960 = vmatpush.msk.msrb.mxu3 %vm5011_vm14, %v4682_v43  ;;  %v1938_v4 = vsel %vm421_vm8, %v3235_v61, %v6307_v51  ;;  %v3165_v43 = vunpack.i.l.bf16 %v4919_v0  ;;  %v6308_v61 = vunpack.i.h.bf16 %v4953_v6 }
 0x33f   : > { %3453 = vrot.lane.b32.xlu2 %v4842_v24, %s3589_s16  ;;  %2290 = vmatpush.msrb.mxu1 %v1938_v4  ;;  %v6310_v24 = vunpack.i.h.bf16 %v4837_v49 }
 0x340   : > { %2088 = vperm.xlu1 %3106, %v2074_v46   ;;  %2962 = vmatpush.msk.msrb.mxu3 %vm5011_vm14, %v4664_v28  ;;  %v1936_v51 = vsel %vm421_vm8, %v3215_v53, %v6308_v61  ;;  %v6182_v46 = vunpack.i.h.bf16 %v4850_v23  ;;  %v3135_v28 = vunpack.i.l.bf16 %v4850_v23  ;;  %v1934_v53 = vsel %vm421_vm8, %v3190_v38, %v6183_v20 }
 0x341   : > { %v1734_v4 = vsel %vm358_vm10, %v3155_v9, %v6310_v24  ;;  %v5093_v15 = vpop.permute.xlu2 %3293  ;;  %2291 = vmatpush.msrb.mxu1 %v1936_v51  ;;  %v5095_v32 = vpop.permute.xlu1 %3263  ;;  %2113 = vperm.xlu0 %3105, %v2079_v30   ;;  %v6311_v61 = vunpack.i.h.bf16 %v4824_v35  ;;  %v6312_v24 = vunpack.i.h.bf16 %v4919_v0  ;;  %v5126_v30 = vld [vmem:[#allocation2 + $0x20] sm:$0xff]  ;;  %v6315_v20 = vunpack.i.h.bf16 %v5035_v50 }
 0x342   : > { %2242 = vmatpush.msrb.mxu0 %v1734_v4  ;;  %2964 = vmatpush.msk.msrb.mxu3 %vm5011_vm14, %v4644_v63  ;;  %v5105_v9 = vpop.permute.xlu0 %3273  ;;  %v2075_v63 = vld [vmem:[%s6148_s4 + $0x8] sm:$0xff]  ;;  %v1930_v38 = vsel %vm421_vm8, %v3135_v28, %v6182_v46  ;;  %6313 = vst [vmem:[#allocation7_spill] sm:$0xff] %v5126_v30  ;;  %v3230_v46 = vunpack.i.l.bf16 %v4970_v60  ;;  %v3265_v17 = vunpack.i.l.bf16 %v5095_v32  ;;  %vm6340_vm14 = vmmov %vm6330_vm5 }
 0x343   : > { %2292 = vmatpush.msrb.mxu1 %v1934_v53  ;;  %2199 = vmatmul.f32.vlgmr.msrb.gmra.mxu3 %v5088_v36  ;;  %v1732_v51 = vsel %vm358_vm10, %v3125_v12, %v6311_v61  ;;  %v1932_v4 = vsel %vm421_vm8, %v3165_v43, %v6312_v24  ;;  %v2082_v12 = vld [vmem:[%s6148_s4 + $0x40] sm:$0xff]  ;;  %v3255_v53 = vunpack.i.l.bf16 %v5035_v50  ;;  %v3260_v43 = vunpack.i.l.bf16 %v4964_v33 }
 0x344   : > { %2243 = vmatpush.msrb.mxu0 %v1732_v51  ;;  %v3130_v36 = vunpack.i.l.bf16 %v4800_v58 }
 0x345   : > { %2293 = vmatpush.msrb.mxu1 %v1932_v4  ;;  %v1872_v59 = vsel %vm400_vm3, %v3255_v53, %v6315_v20  ;;  %v6316_v20 = vunpack.i.h.bf16 %v4970_v60 }
 0x347   : > { %2093 = vperm.xlu2 %3104, %v2075_v63   ;;  %2294 = vmatpush.msrb.mxu1 %v1930_v38  ;;  %v1674_v53 = vsel %vm6317_vm13, %v3230_v46, %v6316_v20  ;;  %vm6344_vm13 = vmmov %vm6330_vm5 }
 0x348   : > { %2103 = vperm.xlu1 %3106, %v2077_v26  }
 0x349   : > { %v5130_v61 = vpop.permute.xlu2 %3308  ;;  %v5132_v51 = vpop.permute.xlu1 %3278  ;;  %2128 = vperm.xlu0 %3105, %v2082_v12   ;;  %v2078_v12 = vld [vmem:[%s6148_s4 + $0x20] sm:$0xff] }
 0x34a   : > { %v6188_v24 = vunpack.i.h.bf16 %v5130_v61  ;;  %v3310_v28 = vunpack.i.l.bf16 %v5130_v61  ;;  %v6190_v4 = vunpack.i.h.bf16 %v5132_v51  ;;  %v3280_v63 = vunpack.i.l.bf16 %v5132_v51  ;;  %v5138_v26 = vpop.permute.xlu0 %3298 }
 0x34b   : > { %2202 = vmatmul.f32.gmra.mxu3 %v5126_v30 }
 0x34c   : > { %v1874_v18 = vsel %vm400_vm3, %v3310_v28, %v6188_v24  ;;  %v1676_v38 = vsel %vm6314_vm6, %v3280_v63, %v6190_v4  ;;  %v2080_v28 = vld [vmem:[%s6148_s4 + $0x30] sm:$0xff]  ;;  %v3275_v4 = vunpack.i.l.bf16 %v5105_v9  ;;  %v6318_v24 = vunpack.i.h.bf16 %v4964_v33  ;;  %vm6341_vm6 = vmmov %vm6330_vm5 }
 0x34d   : > { %2295 = vmatpush.msrb.mxu1 %v1874_v18  ;;  %2244 = vmatpush.msrb.mxu0 %v1676_v38  ;;  %v3185_v18 = vunpack.i.l.bf16 %v4937_v8  ;;  %v2085_v38 = vld [vmem:[%s6148_s4 + $0x58] sm:$0xff] }
 0x34e   : > { %v1870_v63 = vsel %vm400_vm3, %v3260_v43, %v6318_v24  ;;  %v3295_v24 = vunpack.i.l.bf16 %v5093_v15 }
 0x34f   : > { %2108 = vperm.xlu2 %3104, %v2078_v12   ;;  %2296 = vmatpush.msrb.mxu1 %v1872_v59  ;;  %v3160_v12 = vunpack.i.l.bf16 %v4870_v2  ;;  %v6325_v59 = vunpack.i.h.bf16 %v5105_v9 }
 0x350   : > { %2118 = vperm.xlu1 %3106, %v2080_v28   ;;  %2245 = vmatpush.msrb.mxu0 %v1674_v53  ;;  %v6322_v28 = vunpack.i.h.bf16 %v4917_v57  ;;  %v6324_v53 = vunpack.i.h.bf16 %v5095_v32 }
 0x351   : > { %v5182_v21 = vpop.permute.xlu2 %3313  ;;  %2297 = vmatpush.msrb.mxu1 %v1870_v63  ;;  %v5184_v46 = vpop.permute.xlu1 %3283  ;;  %v1866_v30 = vsel %vm400_vm3, %v3275_v4, %v6325_v59  ;;  %2143 = vperm.xlu0 %3105, %v2085_v38   ;;  %v3270_v4 = vunpack.i.l.bf16 %v4990_v47  ;;  %v2081_v38 = vld [vmem:[%s6148_s4 + $0x38] sm:$0xff] }
 0x352   : > { %6320 = vst [vmem:[#allocation9_spill] sm:$0xff] %v5182_v21  ;;  %v1672_v20 = vsel %vm6323_vm1, %v3210_v5, %v6322_v28  ;;  %v1868_v13 = vsel %vm400_vm3, %v3265_v17, %v6324_v53  ;;  %v5197_v63 = vpop.permute.xlu0 %3318  ;;  %v6326_v5 = vunpack.i.h.bf16 %v4937_v8  ;;  %vm2146_vm1 = vcmask 392192  }
 0x353   : > { %6321 = vst [vmem:[#allocation15_spill] sm:$0xff] %v5184_v46  ;;  %2246 = vmatpush.msrb.mxu0 %v1672_v20  ;;  %2298 = vmatpush.msrb.mxu1 %v1868_v13  ;;  %v6196_v43 = vunpack.i.h.bf16 %v5197_v63  ;;  %v3320_v17 = vunpack.i.l.bf16 %v5197_v63  ;;  %v2083_v13 = vld [vmem:[%s6148_s4 + $0x48] sm:$0xff]  ;;  %v3285_v20 = vunpack.i.l.bf16 %v5184_v46 }
 0x354   : > { %2205 = vmatmul.f32.gmra.mxu3 %v5177_v25  ;;  %v1670_v28 = vsel %vm6327_vm2, %v3185_v18, %v6326_v5  ;;  %v6328_v18 = vunpack.i.h.bf16 %v4870_v2  ;;  %v6331_v25 = vunpack.i.h.bf16 %v5093_v15  ;;  %v6335_v5 = vunpack.i.h.bf16 %v4990_v47  ;;  %vm6352_vm2 = vmmov %vm6330_vm5 }
 0x355   : > { %2247 = vmatpush.msrb.mxu0 %v1670_v28  ;;  %2299 = vmatpush.msrb.mxu1 %v1866_v30  ;;  %v2006_v53 = vsel %vm6330_vm5, %v3320_v17, %v6196_v43  ;;  %v6332_v28 = vunpack.i.h.bf16 %v4800_v58  ;;  %v3300_v17 = vunpack.i.l.bf16 %v5138_v26  ;;  %v5230_v43 = vld [vmem:[#allocation2 + $0x60] sm:$0xff]  ;;  %vm6406_vm5 = vmmov %vm6333_vm7 }
 0x356   : > { %v1668_v59 = vsel %vm6329_vm15, %v3160_v12, %v6328_v18  ;;  %v1864_v30 = vsel %vm400_vm3, %v3295_v24, %v6331_v25  ;;  %2352 = vmatpush.msrb.mxu2 %v2006_v53  ;;  %v6200_v18 = vunpack.i.h.bf16 %v5138_v26  ;;  %6334 = vst [vmem:[#allocation17_spill] sm:$0xff] %v5230_v43  ;;  %v2004_v25 = vsel %vm6336_vm9, %v3270_v4, %v6335_v5  ;;  %vm6404_vm15 = vmmov %vm6333_vm7 }
 0x357   : > { %2248 = vmatpush.msrb.mxu0 %v1668_v59  ;;  %2123 = vperm.xlu2 %3104, %v2081_v38   ;;  %v1666_v12 = vsel %vm6333_vm7, %v3130_v36, %v6332_v28  ;;  %v3250_v36 = vunpack.i.l.bf16 %v5047_v14  ;;  %v6339_v28 = vunpack.i.h.bf16 %v5184_v46  ;;  %v6201_v4 = vunpack.i.h.bf16 %v5182_v21 }
 0x358   : > { %2300 = vmatpush.msrb.mxu1 %v1864_v30  ;;  %2133 = vperm.xlu1 %3106, %v2083_v13   ;;  %v3315_v5 = vunpack.i.l.bf16 %v5182_v21  ;;  %v2000_v46 = vsel %vm6341_vm6, %v3300_v17, %v6200_v18  ;;  %v5292_v21 = vld [vmem:[#allocation2 + $0x28] sm:$0xff] }
 0x359   : > { %2249 = vmatpush.msrb.mxu0 %v1666_v12  ;;  %v5236_v38 = vpop.permute.xlu2 %3338  ;;  %v5238_v59 = vpop.permute.xlu1 %3303  ;;  %2353 = vmatpush.msrb.mxu2 %v2004_v25  ;;  %v2002_v12 = vsel %vm6340_vm14, %v3285_v20, %v6339_v28  ;;  %v2084_v25 = vld [vmem:[%s6148_s4 + $0x50] sm:$0xff]  ;;  %v6343_v28 = vunpack.i.h.bf16 %v5047_v14  ;;  %6347 = vst [vmem:[#allocation23_spill] sm:$0xff] %v5292_v21 }
 0x35a   : > { %6337 = vst [vmem:[#allocation18_spill] sm:$0xff] %v5236_v38  ;;  %v6202_v13 = vunpack.i.h.bf16 %v5238_v59  ;;  %v3305_v53 = vunpack.i.l.bf16 %v5238_v59  ;;  %v5243_v30 = vpop.permute.xlu0 %3323  ;;  %v5260_v20 = vld [vmem:[#allocation2 + $0x8] sm:$0xff] }
 0x35b   : > { %6338 = vst [vmem:[#allocation19_spill] sm:$0xff] %v5243_v30  ;;  %2354 = vmatpush.msrb.mxu2 %v2002_v12  ;;  %v1608_v12 = vsel %vm318_vm0, %v3250_v36, %v6343_v28  ;;  %v6208_v17 = vunpack.i.h.bf16 %v5243_v30 }
 0x35c   : > { %2208 = vmatmul.f32.gmra.mxu3 %v5230_v43  ;;  %v1610_v24 = vsel %vm318_vm0, %v3305_v53, %v6202_v13  ;;  %6342 = vst [vmem:[#allocation20_spill] sm:$0xff] %v5260_v20  ;;  %v1998_v43 = vsel %vm6344_vm13, %v3315_v5, %v6201_v4  ;;  %v5269_v53 = vld [vmem:[#allocation2 + $0x80] sm:$0xff] }
 0x35d   : > { %2250 = vmatpush.msrb.mxu0 %v1610_v24  ;;  %2355 = vmatpush.msrb.mxu2 %v2000_v46  ;;  %6345 = vst [vmem:[#allocation21_spill] sm:$0xff] %v5269_v53  ;;  %v3325_v24 = vunpack.i.l.bf16 %v5243_v30  ;;  %v5295_v5 = vld [vmem:[#allocation2 + $0xa0] sm:$0xff] }
 0x35e   : > { %6348 = vst [vmem:[#allocation24_spill] sm:$0xff] %v5295_v5 }
 0x35f   : > { %2138 = vperm.xlu2 %3104, %v2084_v25   ;;  %2251 = vmatpush.msrb.mxu0 %v1608_v12  ;;  %v3340_v12 = vunpack.i.l.bf16 %v5236_v38  ;;  %v1806_v4 = vsel %vm379_vm4, %v3325_v24, %v6208_v17 }
 0x360   : > { %2252 = vmatmul.f32.vlgmr.msrb.gmra.mxu0 %v5260_v20  ;;  %2356 = vmatpush.msrb.mxu2 %v1998_v43 }
 0x361   : > { %v5273_v46 = vpop.permute.xlu2 %3353  ;;  %v5275_v18 = vpop.permute.xlu1 %3328 }
 0x362   : > { %v6209_v36 = vunpack.i.h.bf16 %v5275_v18  ;;  %v3330_v25 = vunpack.i.l.bf16 %v5275_v18  ;;  %v5279_v28 = vpop.permute.xlu0 %3343 }
 0x363   : > { %6346 = vst [vmem:[#allocation22_spill] sm:$0xff] %v5279_v28  ;;  %v6213_v13 = vunpack.i.h.bf16 %v5279_v28  ;;  %v3345_v20 = vunpack.i.l.bf16 %v5279_v28 }
 0x364   : > { %2211 = vmatmul.f32.gmra.mxu3 %v5269_v53  ;;  %v1808_v43 = vsel %vm379_vm4, %v3330_v25, %v6209_v36  ;;  %v6349_v53 = vunpack.i.h.bf16 %v5236_v38  ;;  %v6361_v38 = vunpack.i.h.bf16 %v4894_v39  ;;  %v6365_v39 = vunpack.i.h.bf16 %v4868_v45 }
 0x365   : > { %2301 = vmatpush.msrb.mxu1 %v1808_v43  ;;  %v1802_v24 = vsel %vm379_vm4, %v3345_v20, %v6213_v13  ;;  %v5307_v43 = vld [vmem:[#allocation2 + $0x10] sm:$0xff]  ;;  %v5322_v13 = vld [vmem:[#allocation2 + $0x48] sm:$0xff]  ;;  %v6367_v45 = vunpack.i.h.bf16 %v4802_v27 }
 0x366   : > { %v1804_v25 = vsel %vm379_vm4, %v3340_v12, %v6349_v53  ;;  %6350 = vst [vmem:[#allocation25_spill] sm:$0xff] %v5307_v43  ;;  %v5314_v53 = vld [vmem:[#allocation2 + $0x18] sm:$0xff] }
 0x367   : > { %2302 = vmatpush.msrb.mxu1 %v1806_v4  ;;  %6351 = vst [vmem:[#allocation26_spill] sm:$0xff] %v5314_v53 }
 0x368   : > { %2255 = vmatmul.f32.gmra.mxu0 %v5292_v21  ;;  %6353 = vst [vmem:[#allocation27_spill] sm:$0xff] %v5322_v13 }
 0x369   : > { %v5303_v17 = vpop.permute.xlu2 %1508  ;;  %v5305_v36 = vpop.permute.xlu1 %3333  ;;  %2303 = vmatpush.msrb.mxu1 %v1804_v25 }
 0x36a   : > { %v6217_v4 = vunpack.i.h.bf16 %v5305_v36  ;;  %v3335_v21 = vunpack.i.l.bf16 %v5305_v36  ;;  %v5311_v30 = vpop.permute.xlu0 %3358 }
 0x36b   : > { %2304 = vmatpush.msrb.mxu1 %v1802_v24  ;;  %v6219_v20 = vunpack.i.l.bf16 %v5311_v30  ;;  %v6224_v25 = vunpack.i.h.bf16 %v5311_v30  ;;  %v6356_v24 = vunpack.i.h.bf16 %v4797_v52  ;;  %v5352_v52 = vld [vmem:[#allocation2 + $0x38] sm:$0xff] }
 0x36c   : > { %2214 = vmatmul.f32.gmra.mxu3 %v5295_v5  ;;  %v1996_v12 = vsel %vm6352_vm2, %v3335_v21, %v6217_v4  ;;  %2305 = vmatmul.f32.vlgmr.msrb.gmra.mxu1 %v5307_v43  ;;  %v6354_v5 = vunpack.i.h.bf16 %v4808_v10  ;;  %v5332_v21 = vld [vmem:[#allocation2 + $0xc0] sm:$0xff]  ;;  %v5343_v10 = vld [vmem:[#allocation2 + $0x30] sm:$0xff] }
 0x36d   : > { %2357 = vmatpush.msrb.mxu2 %v1996_v12  ;;  %6355 = vst [vmem:[#allocation28_spill] sm:$0xff] %v5332_v21  ;;  %v1799_v12 = vsel %vm379_vm4, %v6356_v24, %v6224_v25 }
 0x36e   : > { %v1801_v28 = vsel %vm379_vm4, %v6354_v5, %v6219_v20  ;;  %2965 = vmatmul.msk.f32.vlgmr.msrb.gmra.mxu2 %vm2146_vm1, %v5314_v53  ;;  %6357 = vst [vmem:[#allocation29_spill] sm:$0xff] %v5343_v10  ;;  %v6359_v5 = vunpack.i.h.bf16 %v4997_v7 }
 0x36f   : > { %2448 = vmatpush.msra.mxu0 %v1801_v28 }
 0x370   : > { %2258 = vmatmul.f32.gmra.mxu0 %v5322_v13 }
 0x371   : > { %v5339_v4 = vpop.permute.xlu2 %3393  ;;  %v5341_v43 = vpop.permute.xlu1 %3348  ;;  %2449 = vmatpush.msra.mxu0 %v1799_v12  ;;  %v6358_v12 = vunpack.i.h.bf16 %v4886_v19 }
 0x372   : > { %v6229_v28 = vunpack.i.l.bf16 %v5339_v4  ;;  %v6228_v13 = vunpack.i.l.bf16 %v5341_v43  ;;  %v5349_v53 = vpop.permute.xlu0 %3363  ;;  %v6360_v24 = vunpack.i.h.bf16 %v5341_v43 }
 0x374   : > { %2217 = vmatmul.f32.gmra.mxu3 %v5332_v21  ;;  %v1607_v25 = vsel %vm318_vm0, %v6358_v12, %v6228_v13  ;;  %2308 = vmatmul.f32.gmra.mxu1 %v5343_v10  ;;  %v1743_v20 = vsel %vm358_vm10, %v6359_v5, %v6229_v28  ;;  %v5366_v21 = vld [vmem:[#allocation2 + $0x68] sm:$0xff]  ;;  %v1605_v19 = vsel %vm318_vm0, %v6361_v38, %v6360_v24  ;;  %v6362_v12 = vunpack.i.h.bf16 %v5339_v4  ;;  %v5387_v5 = vld [vmem:[#allocation2 + $0xe0] sm:$0xff] }
 0x375   : > { %2395 = vmatpush.msra.mxu3 %v1607_v25  ;;  %2450 = vmatpush.msra.mxu0 %v1743_v20  ;;  %v6363_v13 = vunpack.i.h.bf16 %v4935_v44  ;;  %v6232_v25 = vunpack.i.h.bf16 %v5273_v46  ;;  %v6364_v20 = vunpack.i.l.bf16 %v5273_v46  ;;  %v5393_v44 = vld [vmem:[#allocation2 + $0x50] sm:$0xff]  ;;  %v5414_v10 = vld [vmem:[#allocation2 + $0x88] sm:$0xff] }
 0x376   : > { %2966 = vmatmul.msk.f32.gmra.mxu2 %vm2146_vm1, %v5352_v52  ;;  %6366 = vst [vmem:[#allocation30_spill] sm:$0xff] %v5393_v44 }
 0x377   : > { %v1741_v7 = vsel %vm358_vm10, %v6363_v13, %v6362_v12  ;;  %2396 = vmatpush.msra.mxu3 %v1605_v19  ;;  %v1603_v38 = vsel %vm318_vm0, %v6365_v39, %v6364_v20  ;;  %v5405_v20 = vld [vmem:[#allocation2 + $0x58] sm:$0xff]  ;;  %6370 = vst [vmem:[#allocation32_spill] sm:$0xff] %v5414_v10 }
 0x378   : > { %2451 = vmatpush.msra.mxu0 %v1741_v7  ;;  %v1601_v7 = vsel %vm318_vm0, %v6367_v45, %v6232_v25  ;;  %6368 = vst [vmem:[#allocation31_spill] sm:$0xff] %v5405_v20 }
 0x379   : > { %2261 = vmatmul.f32.gmra.mxu0 %v5366_v21  ;;  %v5389_v24 = vpop.permute.xlu2 %3398  ;;  %v5391_v28 = vpop.permute.xlu1 %3368  ;;  %2397 = vmatpush.msra.mxu3 %v1603_v38  ;;  %v6369_v38 = vunpack.i.h.bf16 %v4949_v54  ;;  %v6373_v54 = vunpack.i.h.bf16 %v4837_v49 }
 0x37a   : > { %v6233_v19 = vunpack.i.l.bf16 %v5391_v28  ;;  %v5397_v12 = vpop.permute.xlu0 %3373  ;;  %v6371_v45 = vunpack.i.h.bf16 %v5391_v28 }
 0x37b   : > { %v6236_v39 = vunpack.i.l.bf16 %v5397_v12  ;;  %2398 = vmatpush.msra.mxu3 %v1601_v7  ;;  %v6372_v7 = vunpack.i.h.bf16 %v4924_v62  ;;  %v6376_v62 = vunpack.i.h.bf16 %v5397_v12 }
 0x37c   : > { %2220 = vmatmul.f32.gmra.mxu3 %v5387_v5  ;;  %v1739_v13 = vsel %vm358_vm10, %v6369_v38, %v6233_v19  ;;  %2311 = vmatmul.f32.gmra.mxu1 %v5393_v44  ;;  %v5434_v44 = vld [vmem:[#allocation2 + $0x70] sm:$0xff] }
 0x37d   : > { %2452 = vmatpush.msra.mxu0 %v1739_v13  ;;  %v1737_v25 = vsel %vm358_vm10, %v6372_v7, %v6371_v45  ;;  %v1735_v38 = vsel %vm358_vm10, %v6373_v54, %v6236_v39  ;;  %v5430_v13 = vld [vmem:[#allocation2 + $0x100] sm:$0xff]  ;;  %6375 = vst [vmem:[#allocation34_spill] sm:$0xff] %v5434_v44  ;;  %v6377_v45 = vunpack.i.h.bf16 %v4824_v35  ;;  %v6378_v35 = vunpack.i.h.bf16 %v5033_v48 }
 0x37e   : > { %2967 = vmatmul.msk.f32.gmra.mxu2 %vm2146_vm1, %v5405_v20  ;;  %6374 = vst [vmem:[#allocation33_spill] sm:$0xff] %v5430_v13 }
 0x37f   : > { %2453 = vmatpush.msra.mxu0 %v1737_v25  ;;  %v1733_v7 = vsel %vm358_vm10, %v6377_v45, %v6376_v62  ;;  %v5463_v25 = vld [vmem:[#allocation2 + $0xa8] sm:$0xff]  ;;  %vm6392_vm10 = vmmov %vm6333_vm7 }
 0x381   : > { %2264 = vmatmul.f32.gmra.mxu0 %v5414_v10  ;;  %v3419_v19 = vpop.permute.xlu2 %3418  ;;  %v5432_v27 = vpop.permute.xlu1 %3383 }
 0x382   : > { %2454 = vmatpush.msra.mxu0 %v1735_v38  ;;  %v5441_v49 = vunpack.i.h.bf16 %v3419_v19  ;;  %v5443_v54 = vunpack.i.l.bf16 %v3419_v19  ;;  %v6243_v39 = vunpack.i.l.bf16 %v5432_v27  ;;  %v5447_v10 = vpop.permute.xlu0 %3378  ;;  %v5450_v38 = vld [vmem:[#allocation2 + $0x78] sm:$0xff]  ;;  %v6379_v19 = vunpack.i.h.bf16 %v4947_v40 }
 0x383   : > { %v6381_v48 = vunpack.i.h.bf16 %v5432_v27  ;;  %v6246_v40 = vunpack.i.h.bf16 %v5349_v53 }
 0x384   : > { %2223 = vmatmul.f32.gmra.mxu3 %v5430_v13  ;;  %2455 = vmatpush.msra.mxu0 %v1733_v7  ;;  %v1941_v62 = vsel %vm421_vm8, %v6378_v35, %v5443_v54  ;;  %v1545_v45 = vsel %vm297_vm11, %v6379_v19, %v6243_v39  ;;  %v6380_v7 = vunpack.i.h.bf16 %v4992_v42  ;;  %v6382_v35 = vunpack.i.h.bf16 %v4966_v11 }
 0x385   : > { %2314 = vmatmul.f32.gmra.mxu1 %v5434_v44  ;;  %2399 = vmatpush.msra.mxu3 %v1545_v45  ;;  %v6384_v42 = vunpack.i.h.bf16 %v4939_v16  ;;  %v5483_v45 = vld [vmem:[#allocation2 + $0x120] sm:$0xff]  ;;  %v1537_v44 = vsel %vm297_vm11, %v4888_v29, %v5303_v17 }
 0x386   : > { %2501 = vmatpush.msra.mxu1 %v1941_v62  ;;  %v1939_v20 = vsel %vm421_vm8, %v6380_v7, %v5441_v49  ;;  %v1543_v13 = vsel %vm297_vm11, %v6382_v35, %v6381_v48  ;;  %2968 = vmatmul.msk.f32.gmra.mxu2 %vm2146_vm1, %v5450_v38  ;;  %v6383_v62 = vunpack.i.l.bf16 %v5349_v53  ;;  %v5485_v7 = vld [vmem:[#allocation2 + $0x90] sm:$0xff] }
 0x387   : > { %2400 = vmatpush.msra.mxu3 %v1543_v13  ;;  %6385 = vst [vmem:[#allocation35_spill] sm:$0xff] %v5485_v7  ;;  %v6386_v13 = vunpack.i.h.bf16 %v4852_v41  ;;  %v5509_v41 = vld [vmem:[#allocation2 + $0xc8] sm:$0xff] }
 0x388   : > { %2502 = vmatpush.msra.mxu1 %v1939_v20  ;;  %v1541_v19 = vsel %vm297_vm11, %v6384_v42, %v6383_v62  ;;  %v5497_v62 = vld [vmem:[#allocation2 + $0x98] sm:$0xff] }
 0x389   : > { %2267 = vmatmul.f32.gmra.mxu0 %v5463_v25  ;;  %v3389_v11 = vpop.permute.xlu1 %3388  ;;  %2401 = vmatpush.msra.mxu3 %v1541_v19  ;;  %v1539_v16 = vsel %vm297_vm11, %v6386_v13, %v6246_v40  ;;  %v6387_v19 = vunpack.i.h.bf16 %v4953_v6  ;;  %v3429_v39 = vpop.permute.xlu2 %3428  ;;  %v6388_v13 = vunpack.i.h.bf16 %v4866_v22  ;;  %v5527_v22 = vld [vmem:[#allocation2 + $0x140] sm:$0xff]  ;;  %vm6401_vm11 = vmmov %vm6333_vm7 }
 0x38a   : > { %v5487_v48 = vunpack.i.h.bf16 %v3389_v11  ;;  %v5489_v35 = vunpack.i.l.bf16 %v3389_v11  ;;  %v3404_v20 = vpop.permute.xlu0 %3403  ;;  %v5523_v29 = vunpack.i.l.bf16 %v3429_v39 }
 0x38b   : > { %v5499_v42 = vunpack.i.l.bf16 %v3404_v20  ;;  %2402 = vmatpush.msra.mxu3 %v1539_v16  ;;  %v5517_v6 = vunpack.i.h.bf16 %v3404_v20  ;;  %v5533_v20 = vunpack.i.h.bf16 %v3429_v39  ;;  %v6249_v39 = vunpack.i.h.bf16 %v5447_v10 }
 0x38c   : > { %2226 = vmatmul.f32.gmra.mxu3 %v5483_v45  ;;  %v1937_v11 = vsel %vm421_vm8, %v6387_v19, %v5489_v35  ;;  %v1935_v16 = vsel %vm421_vm8, %v6388_v13, %v5487_v48  ;;  %v6389_v19 = vunpack.i.h.bf16 %v4919_v0 }
 0x38d   : > { %2317 = vmatmul.f32.gmra.mxu1 %v5485_v7  ;;  %2403 = vmatpush.msra.mxu3 %v1537_v44  ;;  %v5543_v7 = vld [vmem:[#allocation2 + $0xb8] sm:$0xff] }
 0x38e   : > { %2503 = vmatpush.msra.mxu1 %v1937_v11  ;;  %2969 = vmatmul.msk.f32.gmra.mxu2 %vm2146_vm1, %v5497_v62  ;;  %v1933_v40 = vsel %vm421_vm8, %v6389_v19, %v5499_v42  ;;  %v5531_v11 = vld [vmem:[#allocation2 + $0xb0] sm:$0xff] }
 0x38f   : > { %2404 = vmatpush.msra.mxu3 %v4835_v1  ;;  %v6390_v1 = vunpack.i.h.bf16 %v4850_v23 }
 0x390   : > { %2504 = vmatpush.msra.mxu1 %v1935_v16 }
 0x391   : > { %2270 = vmatmul.f32.gmra.mxu0 %v5509_v41  ;;  %v5529_v44 = vpop.permute.xlu1 %3413  ;;  %2405 = vmatpush.msra.mxu3 %v4771_v56  ;;  %v1931_v16 = vsel %vm421_vm8, %v6390_v1, %v5517_v6  ;;  %v6391_v56 = vunpack.i.h.bf16 %v5132_v51  ;;  %v6393_v1 = vunpack.i.h.bf16 %v5130_v61  ;;  %v6395_v51 = vunpack.i.h.bf16 %v4970_v60  ;;  %vm6396_vm8 = vmmov %vm6333_vm7  ;;  %v3434_v60 = vpop.permute.xlu2 %3433 }
 0x392   : > { %2505 = vmatpush.msra.mxu1 %v1933_v40  ;;  %v3415_v13 = vunpack.i.l.bf16 %v5529_v44  ;;  %v3409_v19 = vpop.permute.xlu0 %3408  ;;  %v6397_v61 = vunpack.i.h.bf16 %v5035_v50  ;;  %v6400_v50 = vunpack.i.h.bf16 %v4917_v57  ;;  %v6403_v57 = vunpack.i.h.bf16 %v4937_v8  ;;  %vm6410_vm7 = vmmov %vm6406_vm5 }
 0x393   : > { %v5545_v40 = vunpack.i.l.bf16 %v3409_v19  ;;  %2406 = vmatpush.msra.mxu3 %v4757_v55  ;;  %v1875_v0 = vsel %vm400_vm3, %v6393_v1, %v5523_v29  ;;  %v6394_v55 = vunpack.i.h.bf16 %v5529_v44  ;;  %v5614_v8 = vunpack.i.h.bf16 %v3434_v60 }
 0x394   : > { %2229 = vmatmul.f32.gmra.mxu3 %v5527_v22  ;;  %2506 = vmatpush.msra.mxu1 %v1931_v16  ;;  %v1677_v23 = vsel %vm6392_vm10, %v6391_v56, %v3415_v13  ;;  %v5559_v16 = vld [vmem:[#allocation2 + $0xe8] sm:$0xff] }
 0x395   : > { %2320 = vmatmul.f32.gmra.mxu1 %v5531_v11  ;;  %2456 = vmatpush.msra.mxu0 %v1677_v23  ;;  %v1675_v56 = vsel %vm6396_vm8, %v6395_v51, %v6394_v55  ;;  %v1873_v23 = vsel %vm400_vm3, %v6397_v61, %v5533_v20  ;;  %v6399_v55 = vunpack.i.l.bf16 %v5447_v10  ;;  %v5586_v61 = vld [vmem:[#allocation2 + $0x160] sm:$0xff] }
 0x396   : > { %2507 = vmatpush.msra.mxu1 %v1875_v0  ;;  %2407 = vmatpush.msra.mxu3 %v4733_v37  ;;  %v6398_v0 = vunpack.i.h.bf16 %v4964_v33  ;;  %v3400_v37 = vunpack.i.l.bf16 %v5389_v24  ;;  %6402 = vst [vmem:[#allocation36_spill] sm:$0xff] %v5586_v61 }
 0x397   : > { %2970 = vmatmul.msk.f32.gmra.mxu2 %vm2146_vm1, %v5543_v7  ;;  %2457 = vmatpush.msra.mxu0 %v1675_v56  ;;  %v1673_v51 = vsel %vm6401_vm11, %v6400_v50, %v6399_v55  ;;  %v5590_v56 = vunpack.i.h.bf16 %v3409_v19  ;;  %v5601_v55 = vunpack.i.l.bf16 %v3434_v60  ;;  %v5604_v19 = vld [vmem:[#allocation2 + $0xd8] sm:$0xff] }
 0x398   : > { %v1871_v1 = vsel %vm400_vm3, %v6398_v0, %v5545_v40  ;;  %2508 = vmatpush.msra.mxu1 %v1873_v23  ;;  %2408 = vmatpush.msra.mxu3 %v4706_v31  ;;  %v5592_v23 = vld [vmem:[#allocation2 + $0xd0] sm:$0xff]  ;;  %v3401_v31 = vunpack.i.h.bf16 %v5389_v24  ;;  %v1671_v0 = vsel %vm6404_vm15, %v6403_v57, %v6249_v39  ;;  %v5618_v57 = vld [vmem:[#allocation2 + $0x108] sm:$0xff]  ;;  %v6467_v24 = vld [vmem:[#allocation21_spill] sm:$0xff] }
 0x399   : > { %2273 = vmatmul.f32.gmra.mxu0 %v5559_v16  ;;  %v5588_v33 = vpop.permute.xlu1 %3423 }
 0x39a   : > { %2458 = vmatpush.msra.mxu0 %v1673_v51  ;;  %2509 = vmatpush.msra.mxu1 %v1871_v1  ;;  %v3425_v1 = vunpack.i.l.bf16 %v5588_v33  ;;  %v6407_v51 = vunpack.i.l.bf16 %v5341_v43  ;;  %v6250_v39 = vunpack.i.h.bf16 %v5588_v33 }
 0x39b   : > { %2409 = vmatpush.msra.mxu3 %v4688_v34  ;;  %v6405_v34 = vunpack.i.h.bf16 %v4870_v2  ;;  %v6409_v2 = vunpack.i.h.bf16 %v4800_v58  ;;  %v6413_v58 = vunpack.i.h.bf16 %v5238_v59  ;;  %v6416_v59 = vunpack.i.h.bf16 %v5047_v14 }
 0x39c   : > { %2232 = vmatmul.f32.gmra.mxu3 %v5586_v61  ;;  %2459 = vmatpush.msra.mxu0 %v1671_v0  ;;  %v6408_v0 = vunpack.i.h.bf16 %v5095_v32  ;;  %v6412_v32 = vunpack.i.h.bf16 %v5105_v9  ;;  %v6415_v9 = vunpack.i.h.bf16 %v5093_v15  ;;  %v6418_v15 = vunpack.i.h.bf16 %v5273_v46 }
 0x39d   : > { %2410 = vmatpush.msra.mxu3 %v4648_v3  ;;  %v1669_v50 = vsel %vm6406_vm5, %v6405_v34, %v3400_v37  ;;  %2323 = vmatmul.f32.gmra.mxu1 %v5592_v23  ;;  %v1667_v60 = vsel %vm6410_vm7, %v6409_v2, %v3401_v31  ;;  %v6411_v34 = vunpack.i.h.bf16 %v5341_v43 }
 0x39e   : > { %2460 = vmatpush.msra.mxu0 %v1669_v50  ;;  %v1869_v3 = vsel %vm400_vm3, %v6408_v0, %v5590_v56  ;;  %v1867_v50 = vsel %vm400_vm3, %v6412_v32, %v5601_v55  ;;  %v3439_v0 = vpop.permute.xlu0 %3438  ;;  %v1865_v2 = vsel %vm400_vm3, %v6415_v9, %v5614_v8  ;;  %v1609_v32 = vsel %vm318_vm0, %v6416_v59, %v6250_v39  ;;  %vm6421_vm3 = vmmov %vm6352_vm2  ;;  %v5672_v9 = vld [vmem:[#allocation2 + $0x128] sm:$0xff] }
 0x39f   : > { %2607 = vmatpush.msrb.mxu3 %v6407_v51  ;;  %2971 = vmatmul.msk.f32.gmra.mxu2 %vm2146_vm1, %v5604_v19  ;;  %v1611_v51 = vsel %vm318_vm0, %v6413_v58, %v3425_v1  ;;  %v6417_v58 = vld [vmem:[#allocation10_spill] sm:$0xff]  ;;  %v6422_v59 = vunpack.i.l.bf16 %v5432_v27  ;;  %vm6425_vm0 = vmmov %vm6352_vm2  ;;  %v6436_v39 = vunpack.i.h.bf16 %v5349_v53 }
 0x3a0   : > { %2510 = vmatpush.msra.mxu1 %v1869_v3  ;;  %2461 = vmatpush.msra.mxu0 %v1667_v60  ;;  %v6414_v3 = vunpack.i.l.bf16 %v5273_v46  ;;  %v6423_v46 = vunpack.i.h.bf16 %v5311_v30  ;;  %vm6428_vm9 = vmmov %vm6425_vm0 }
 0x3a1   : > { %2608 = vmatpush.msrb.mxu3 %v6411_v34  ;;  %2276 = vmatmul.f32.gmra.mxu0 %v5618_v57  ;;  %v3444_v43 = vpop.permute.xlu1 %3443  ;;  %vm6435_vm14 = vmmov %vm6425_vm0 }
 0x3a2   : > { %2511 = vmatpush.msra.mxu1 %v1867_v50  ;;  %2462 = vmatpush.msra.mxu0 %v1611_v51  ;;  %v5650_v60 = vunpack.i.h.bf16 %v3444_v43  ;;  %v5652_v34 = vunpack.i.l.bf16 %v3444_v43  ;;  %v5659_v50 = vld [vmem:[#allocation2 + $0xf0] sm:$0xff]  ;;  %v5662_v51 = vunpack.i.l.bf16 %v3439_v0  ;;  %v6420_v43 = vunpack.i.h.bf16 %v5197_v63  ;;  %v5683_v63 = vld [vmem:[#allocation2 + $0xf8] sm:$0xff]  ;;  %vm6441_vm6 = vmmov %vm6425_vm0 }
 0x3a3   : > { %2609 = vmatpush.msrb.mxu3 %v6414_v3  ;;  %v6419_v3 = vunpack.i.l.bf16 %v5311_v30  ;;  %vm6449_vm13 = vmmov %vm6425_vm0 }
 0x3a4   : > { %2512 = vmatpush.msra.mxu1 %v1865_v2  ;;  %2411 = vmatmul.f32.vlgmr.msra.gmra.mxu3 %v6417_v58  ;;  %v2007_v14 = vsel %vm6421_vm3, %v6420_v43, %v5652_v34  ;;  %v3454_v2 = vpop.permute.xlu2 %3453 }
 0x3a5   : > { %2463 = vmatpush.msra.mxu0 %v1609_v32  ;;  %2610 = vmatpush.msrb.mxu3 %v6418_v15  ;;  %v6424_v32 = vunpack.i.h.bf16 %v4990_v47  ;;  %v5685_v15 = vunpack.i.h.bf16 %v3439_v0  ;;  %v5694_v30 = vunpack.i.l.bf16 %v3454_v2  ;;  %v6430_v47 = vunpack.i.l.bf16 %v5339_v4 }
 0x3a6   : > { %2564 = vmatpush.msra.mxu2 %v2007_v14  ;;  %2326 = vmatmul.f32.gmra.mxu1 %v5659_v50 }
 0x3a7   : > { %2660 = vmatpush.msrb.mxu0 %v6419_v3  ;;  %2611 = vmatpush.msrb.mxu3 %v6422_v59  ;;  %v2005_v58 = vsel %vm6425_vm0, %v6424_v32, %v5650_v60  ;;  %v6426_v3 = vld [vmem:[#allocation15_spill] sm:$0xff]  ;;  %v6429_v59 = vunpack.i.h.bf16 %v5432_v27 }
 0x3a8   : > { %2565 = vmatpush.msra.mxu2 %v2005_v58  ;;  %v6427_v43 = vunpack.i.h.bf16 %v6426_v3  ;;  %v6432_v27 = vld [vmem:[#allocation7_spill] sm:$0xff]  ;;  %v6433_v3 = vunpack.i.h.bf16 %v5339_v4  ;;  %v6438_v4 = vunpack.i.l.bf16 %v5391_v28 }
 0x3a9   : > { %2661 = vmatpush.msrb.mxu0 %v6423_v46  ;;  %2612 = vmatpush.msrb.mxu3 %v6429_v59  ;;  %v3449_v0 = vpop.permute.xlu1 %3448  ;;  %v6431_v46 = vunpack.i.l.bf16 %v5349_v53 }
 0x3aa   : > { %v2003_v14 = vsel %vm6428_vm9, %v6427_v43, %v5662_v51  ;;  %2279 = vmatmul.f32.gmra.mxu0 %v5672_v9  ;;  %2972 = vmatmul.msk.f32.gmra.mxu2 %vm2146_vm1, %v5683_v63  ;;  %v5702_v32 = vunpack.i.h.bf16 %v3449_v0  ;;  %v5704_v58 = vunpack.i.l.bf16 %v3449_v0  ;;  %v6434_v43 = vunpack.i.h.bf16 %v5138_v26  ;;  %v6439_v26 = vld [vmem:[#allocation9_spill] sm:$0xff] }
 0x3ab   : > { %2662 = vmatpush.msrb.mxu0 %v6430_v47  ;;  %2613 = vmatpush.msrb.mxu3 %v6431_v46  ;;  %v3459_v47 = vpop.permute.xlu0 %3458  ;;  %v6437_v46 = vunpack.i.h.bf16 %v5275_v18  ;;  %v6442_v18 = vld [vmem:[#allocation19_spill] sm:$0xff] }
 0x3ac   : > { %2566 = vmatpush.msra.mxu2 %v2003_v14  ;;  %2414 = vmatmul.f32.gmra.mxu3 %v6432_v27  ;;  %v2001_v59 = vsel %vm6435_vm14, %v6434_v43, %v5685_v15  ;;  %v5719_v14 = vunpack.i.h.bf16 %v3454_v2  ;;  %v5723_v27 = vld [vmem:[#allocation2 + $0x148] sm:$0xff]  ;;  %v5734_v2 = vld [vmem:[#allocation2 + $0x118] sm:$0xff] }
 0x3ad   : > { %2663 = vmatpush.msrb.mxu0 %v6433_v3  ;;  %2614 = vmatpush.msrb.mxu3 %v6436_v39  ;;  %v1809_v0 = vsel %vm379_vm4, %v6437_v46, %v5704_v58  ;;  %v6440_v3 = vunpack.i.h.bf16 %v6439_v26  ;;  %v6443_v39 = vunpack.i.h.bf16 %v6442_v18  ;;  %v6444_v46 = vunpack.i.h.bf16 %v5391_v28  ;;  %v6451_v28 = vld [vmem:[#allocation18_spill] sm:$0xff] }
 0x3ae   : > { %2567 = vmatpush.msra.mxu2 %v2001_v59  ;;  %2513 = vmatpush.msra.mxu1 %v1809_v0  ;;  %v5736_v59 = vunpack.i.l.bf16 %v3459_v47  ;;  %v6445_v0 = vld [vmem:[#allocation5_spill] sm:$0xff]  ;;  %v6448_v26 = vunpack.i.h.bf16 %v5305_v36  ;;  %v6452_v18 = vunpack.i.h.bf16 %v6451_v28  ;;  %v6455_v36 = vld [vmem:[#allocation12_spill] sm:$0xff] }
 0x3af   : > { %2664 = vmatpush.msrb.mxu0 %v6438_v4  ;;  %v1999_v53 = vsel %vm6441_vm6, %v6440_v3, %v5694_v30  ;;  %2615 = vmatpush.msrb.mxu3 %v5303_v17  ;;  %v1807_v43 = vsel %vm379_vm4, %v6443_v39, %v5702_v32  ;;  %v6446_v4 = vunpack.i.l.bf16 %v6445_v0  ;;  %v6447_v17 = vunpack.i.l.bf16 %v5397_v12  ;;  %v6460_v28 = vld [vmem:[#allocation13_spill] sm:$0xff] }
 0x3b0   : > { %2568 = vmatpush.msra.mxu2 %v1999_v53  ;;  %2514 = vmatpush.msra.mxu1 %v1807_v43  ;;  %v1997_v3 = vsel %vm6449_vm13, %v6448_v26, %v5719_v14  ;;  %v6450_v53 = vld [vmem:[#allocation8_spill] sm:$0xff]  ;;  %v1805_v39 = vsel %vm379_vm4, %v6452_v18, %v5736_v59  ;;  %v5757_v43 = vunpack.i.h.bf16 %v3459_v47  ;;  %v6454_v0 = vunpack.i.h.bf16 %v5397_v12  ;;  %v5772_v47 = vld [vmem:[#allocation2 + $0x168] sm:$0xff] }
 0x3b1   : > { %2665 = vmatpush.msrb.mxu0 %v6444_v46  ;;  %2616 = vmatpush.msrb.mxu3 %v6446_v4  ;;  %v6453_v46 = vld [vmem:[#allocation16_spill] sm:$0xff]  ;;  %v5762_v4 = vld [vmem:[#allocation2 + $0x110] sm:$0xff]  ;;  %v6457_v26 = vunpack.i.h.bf16 %v5529_v44  ;;  %v6461_v18 = vld [vmem:[#allocation14_spill] sm:$0xff]  ;;  %v6462_v44 = vunpack.i.l.bf16 %v5447_v10 }
 0x3b2   : > { %2282 = vmatmul.f32.gmra.mxu0 %v5723_v27  ;;  %2973 = vmatmul.msk.f32.gmra.mxu2 %vm2146_vm1, %v5734_v2  ;;  %v5774_v12 = vld [vmem:[#allocation2 + $0x138] sm:$0xff] }
 0x3b3   : > { %2666 = vmatpush.msrb.mxu0 %v6447_v17  ;;  %2989 = vmatpush.msk.msrb.mxu3 %vm1479_vm12, %v6450_v53  ;;  %v6456_v17 = vld [vmem:[#allocation11_spill] sm:$0xff] }
 0x3b4   : > { %2569 = vmatpush.msra.mxu2 %v1997_v3  ;;  %2417 = vmatmul.f32.gmra.mxu3 %v6453_v46  ;;  %v6458_v3 = vld [vmem:[#allocation22_spill] sm:$0xff]  ;;  %v6464_v46 = vunpack.i.h.bf16 %v5447_v10  ;;  %v5809_v10 = vld [vmem:[#allocation2 + $0x158] sm:$0xff] }
 0x3b5   : > { %2667 = vmatpush.msrb.mxu0 %v6454_v0  ;;  %2990 = vmatpush.msk.msrb.mxu3 %vm1479_vm12, %v6455_v36  ;;  %v6459_v53 = vunpack.i.h.bf16 %v6458_v3  ;;  %v6465_v0 = vld [vmem:[#allocation6_spill] sm:$0xff]  ;;  %v5802_v36 = vld [vmem:[#allocation2 + $0x130] sm:$0xff] }
 0x3b6   : > { %2776 = vmatpush.msrb.mxu2 %v5652_v34  ;;  %2515 = vmatpush.msra.mxu1 %v1805_v39  ;;  %v6463_v39 = vld [vmem:[#allocation17_spill] sm:$0xff] }
 0x3b7   : > { %2668 = vmatpush.msrb.mxu0 %v3415_v13  ;;  %2991 = vmatpush.msk.msrb.mxu3 %vm1479_vm12, %v6456_v17  ;;  %v1803_v13 = vsel %vm379_vm4, %v6459_v53, %v5757_v43  ;;  %v5882_v17 = vpop.permute.xlu1 %2088  ;;  %vm2821_vm4 = vcmask 244736  }
 0x3b8   : > { %2329 = vmatmul.f32.gmra.mxu1 %v5762_v4  ;;  %2777 = vmatpush.msrb.mxu2 %v5650_v60 }
 0x3b9   : > { %2669 = vmatpush.msrb.mxu0 %v6457_v26  ;;  %2992 = vmatpush.msk.msrb.mxu3 %vm1479_vm12, %v6460_v28  ;;  %v6479_v26 = vld [vmem:[#allocation30_spill] sm:$0xff] }
 0x3ba   : > { %2516 = vmatpush.msra.mxu1 %v1803_v13  ;;  %2285 = vmatmul.f32.gmra.mxu0 %v5772_v47  ;;  %v5893_v13 = vpop.permute.xlu2 %2093 }
 0x3bb   : > { %2974 = vmatmul.msk.f32.gmra.mxu2 %vm2146_vm1, %v5774_v12  ;;  %2993 = vmatpush.msk.msrb.mxu3 %vm1479_vm12, %v6461_v18 }
 0x3bc   : > { %2670 = vmatpush.msrb.mxu0 %v6462_v44  ;;  %3013 = vmatpush.msrb.mxu1 %v5443_v54 }
 0x3bd   : > { %2778 = vmatpush.msrb.mxu2 %v5662_v51  ;;  %2420 = vmatmul.f32.gmra.mxu3 %v6463_v39 }
 0x3be   : > { %2671 = vmatpush.msrb.mxu0 %v6464_v46  ;;  %2994 = vmatpush.msk.msrb.mxu3 %vm1479_vm12, %v6465_v0  ;;  %v6480_v46 = vld [vmem:[#allocation34_spill] sm:$0xff] }
 0x3bf   : > { %3014 = vmatpush.msrb.mxu1 %v5441_v49  ;;  %2779 = vmatpush.msrb.mxu2 %v5685_v15 }
 0x3c0   : > { %3029 = vmatpush.msra.mxu3 %v5652_v34  ;;  %2672 = vmatpush.msrb.mxu0 %v3400_v37  ;;  %v6466_v37 = vld [vmem:[#allocation20_spill] sm:$0xff]  ;;  %v6468_v34 = vunpack.i.h.bf16 %v5588_v33 }
 0x3c1   : > { %3015 = vmatpush.msrb.mxu1 %v5489_v35  ;;  %2780 = vmatpush.msrb.mxu2 %v5694_v30  ;;  %v6470_v33 = vld [vmem:[#allocation24_spill] sm:$0xff] }
 0x3c2   : > { %3030 = vmatpush.msra.mxu3 %v5650_v60  ;;  %2332 = vmatmul.f32.gmra.mxu1 %v5802_v36  ;;  %v5826_v60 = vld [vmem:[#allocation2 + $0x150] sm:$0xff] }
 0x3c3   : > { %2673 = vmatpush.msrb.mxu0 %v3401_v31  ;;  %3016 = vmatpush.msrb.mxu1 %v5487_v48 }
 0x3c4   : > { %2781 = vmatpush.msrb.mxu2 %v5719_v14  ;;  %3031 = vmatpush.msra.mxu3 %v5662_v51  ;;  %v5833_v51 = vld [vmem:[#allocation2 + $0x178] sm:$0xff] }
 0x3c5   : > { %2975 = vmatmul.msk.f32.gmra.mxu2 %vm2146_vm1, %v5809_v10  ;;  %2464 = vmatmul.f32.vlgmr.msra.gmra.mxu0 %v6466_v37 }
 0x3c6   : > { %3017 = vmatpush.msrb.mxu1 %v5499_v42  ;;  %2674 = vmatpush.msrb.mxu0 %v3425_v1  ;;  %v2200_v31 = vpop.f32.mrf.mxu3 }
 0x3c7   : > { %3032 = vmatpush.msra.mxu3 %v5685_v15  ;;  %v5847_v15 = vld [vmem:[#allocation2 + $0x170] sm:$0xff] }
 0x3c8   : > { %2423 = vmatmul.f32.gmra.mxu3 %v6467_v24  ;;  %3018 = vmatpush.msrb.mxu1 %v5517_v6 }
 0x3c9   : > { %2675 = vmatpush.msrb.mxu0 %v6468_v34  ;;  %3033 = vmatpush.msra.mxu3 %v5694_v30 }
 0x3ca   : > { %3019 = vmatpush.msrb.mxu1 %v5523_v29 }
 0x3cb   : > { %2713 = vmatpush.msra.mxu0 %v5443_v54  ;;  %3034 = vmatpush.msra.mxu3 %v5719_v14  ;;  %v6469_v54 = vld [vmem:[#allocation23_spill] sm:$0xff] }
 0x3cc   : > { %2335 = vmatmul.f32.gmra.mxu1 %v5826_v60 }
 0x3cd   : > { %2714 = vmatpush.msra.mxu0 %v5441_v49  ;;  %3020 = vmatpush.msrb.mxu1 %v5533_v20  ;;  %v6471_v49 = vld [vmem:[#allocation26_spill] sm:$0xff] }
 0x3ce   : > { %2976 = vmatmul.msk.f32.gmra.mxu2 %vm2146_vm1, %v5833_v51  ;;  %2467 = vmatmul.f32.gmra.mxu0 %v6469_v54  ;;  %v2203_v1 = vpop.f32.mrf.mxu3 }
 0x3cf   : > { %2715 = vmatpush.msra.mxu0 %v5489_v35  ;;  %3021 = vmatpush.msrb.mxu1 %v5545_v40  ;;  %v6473_v35 = vld [vmem:[#allocation28_spill] sm:$0xff]  ;;  %v2204_v44 = vadd.f32 %v2203_v1, %v5893_v13 }
 0x3d0   : > { %2426 = vmatmul.f32.gmra.mxu3 %v6470_v33 }
 0x3d1   : > { %2716 = vmatpush.msra.mxu0 %v5487_v48  ;;  %3022 = vmatpush.msrb.mxu1 %v5590_v56  ;;  %v6472_v48 = vld [vmem:[#allocation27_spill] sm:$0xff] }
 0x3d3   : > { %2717 = vmatpush.msra.mxu0 %v5499_v42  ;;  %3023 = vmatpush.msrb.mxu1 %v5601_v55 }
 0x3d4   : > { %2338 = vmatmul.f32.gmra.mxu1 %v5847_v15 }
 0x3d5   : > { %2718 = vmatpush.msra.mxu0 %v5517_v6  ;;  %3024 = vmatpush.msrb.mxu1 %v5614_v8  ;;  %v6474_v6 = vld [vmem:[#allocation25_spill] sm:$0xff] }
 0x3d6   : > { %2977 = vmatmul.msk.f32.vlgmr.msra.gmra.mxu2 %vm2146_vm1, %v6471_v49  ;;  %2470 = vmatmul.f32.gmra.mxu0 %v6472_v48 }
 0x3d7   : > { %2719 = vmatpush.msra.mxu0 %v5523_v29  ;;  %3025 = vmatpush.msrb.mxu1 %v5704_v58  ;;  %v2206_v42 = vpop.f32.mrf.mxu3 }
 0x3d8   : > { %2429 = vmatmul.f32.gmra.mxu3 %v6473_v35 }
 0x3d9   : > { %2720 = vmatpush.msra.mxu0 %v5533_v20  ;;  %3026 = vmatpush.msrb.mxu1 %v5702_v32 }
 0x3db   : > { %2721 = vmatpush.msra.mxu0 %v5545_v40  ;;  %3027 = vmatpush.msrb.mxu1 %v5736_v59  ;;  %v6475_v40 = vld [vmem:[#allocation29_spill] sm:$0xff] }
 0x3dc   : > { %2517 = vmatmul.f32.vlgmr.msra.gmra.mxu1 %v6474_v6 }
 0x3dd   : > { %2722 = vmatpush.msra.mxu0 %v5590_v56  ;;  %3028 = vmatpush.msrb.mxu1 %v5757_v43  ;;  %v2253_v29 = vpop.f32.mrf.mxu0  ;;  %v6476_v56 = vld [vmem:[#allocation31_spill] sm:$0xff] }
 0x3de   : > { %2978 = vmatmul.msk.f32.gmra.mxu2 %vm2146_vm1, %v5352_v52  ;;  %2473 = vmatmul.f32.gmra.mxu0 %v5366_v21 }
 0x3df   : > { %2723 = vmatpush.msra.mxu0 %v5601_v55  ;;  %v2209_v20 = vpop.f32.mrf.mxu3  ;;  %v6477_v55 = vld [vmem:[#allocation32_spill] sm:$0xff] }
 0x3e0   : > { %2432 = vmatmul.f32.gmra.mxu3 %v5387_v5 }
 0x3e1   : > { %2724 = vmatpush.msra.mxu0 %v5614_v8  ;;  %v6478_v8 = vld [vmem:[#allocation33_spill] sm:$0xff] }
 0x3e3   : > { %2725 = vmatpush.msra.mxu0 %v5704_v58 }
 0x3e4   : > { %2520 = vmatmul.f32.gmra.mxu1 %v6475_v40 }
 0x3e5   : > { %2726 = vmatpush.msra.mxu0 %v5702_v32  ;;  %v2256_v30 = vpop.f32.mrf.mxu0  ;;  %v2201_v32 = vadd.f32 %v2200_v31, %v5882_v17 }
 0x3e6   : > { %2979 = vmatmul.msk.f32.gmra.mxu2 %vm2146_vm1, %v6476_v56  ;;  %2476 = vmatmul.f32.gmra.mxu0 %v6477_v55  ;;  %v2257_v31 = vadd.f32 %v2256_v30, %v2204_v44 }
 0x3e7   : > { %2727 = vmatpush.msra.mxu0 %v5736_v59  ;;  %v2212_v14 = vpop.f32.mrf.mxu3  ;;  %v2254_v3 = vadd.f32 %v2253_v29, %v2201_v32 }
 0x3e8   : > { %2435 = vmatmul.f32.gmra.mxu3 %v6478_v8 }
 0x3e9   : > { %2728 = vmatpush.msra.mxu0 %v5757_v43  ;;  %v2306_v58 = vpop.f32.mrf.mxu1 }
 0x3ea   : > { %v2307_v53 = vadd.f32 %v2306_v58, %v2254_v3  ;;  %v5909_v58 = vpop.permute.xlu0 %2098 }
 0x3eb   : > { %6481 = vst [vmem:[#allocation10_spill] sm:$0xff] %v5909_v58  ;;  %v2207_v3 = vadd.f32 %v2206_v42, %v5909_v58 }
 0x3ec   : > { %2523 = vmatmul.f32.gmra.mxu1 %v6479_v26 }
 0x3ed   : > { %v2259_v59 = vpop.f32.mrf.mxu0 }
 0x3ee   : > { %2980 = vmatmul.msk.f32.gmra.mxu2 %vm2146_vm1, %v5450_v38  ;;  %2479 = vmatmul.f32.gmra.mxu0 %v5463_v25  ;;  %v2260_v30 = vadd.f32 %v2259_v59, %v2207_v3 }
 0x3ef   : > { %v5891_v43 = vpop.f32.mrf.mxu3 }
 0x3f0   : > { %2438 = vmatmul.f32.gmra.mxu3 %v5483_v45 }
 0x3f1   : > { %v2359_v28 = vpop.f32.mrf.mxu2  ;;  %v2309_v18 = vpop.f32.mrf.mxu1 }
 0x3f2   : > { %v2360_v0 = vadd.f32 %v2359_v28, %v2307_v53  ;;  %v2310_v29 = vadd.f32 %v2309_v18, %v2257_v31  ;;  %v6482_v53 = vld [vmem:[#allocation35_spill] sm:$0xff]  ;;  %v5920_v31 = vpop.permute.xlu1 %2103 }
 0x3f3   : > { %6483 = vst [vmem:[#allocation15_spill] sm:$0xff] %v5920_v31 }
 0x3f4   : > { %2526 = vmatmul.f32.gmra.mxu1 %v6480_v46  ;;  %2819 = vst [vmem:[%s5898_s15] sm:$0xff] %v2360_v0 }
 0x3f6   : > { %2981 = vmatmul.msk.f32.gmra.mxu2 %vm2146_vm1, %v5497_v62  ;;  %2482 = vmatmul.f32.gmra.mxu0 %v5509_v41  ;;  %v2262_v34 = vpop.f32.mrf.mxu0 }
 0x3f7   : > { %v5907_v6 = vpop.f32.mrf.mxu3 }
 0x3f8   : > { %2441 = vmatmul.f32.gmra.mxu3 %v5527_v22 }
 0x3f9   : > { %v2362_v1 = vpop.f32.mrf.mxu2  ;;  %v2312_v32 = vpop.f32.mrf.mxu1 }
 0x3fa   : > { %v2363_v28 = vadd.f32 %v2362_v1, %v2310_v29  ;;  %v2313_v0 = vadd.f32 %v2312_v32, %v2260_v30  ;;  %v2210_v29 = vadd.f32 %v2209_v20, %v5920_v31 }
 0x3fc   : > { %2529 = vmatmul.f32.gmra.mxu1 %v6482_v53  ;;  %2823 = vst [vmem:[%s5898_s15 + $0x18] sm:$0xff] %v2363_v28  ;;  %v2263_v59 = vadd.f32 %v2262_v34, %v2210_v29  ;;  %v3534_v28 = vld [vmem:[#allocation2] sm:$0xff] }
 0x3fe   : > { %2982 = vmatmul.msk.f32.gmra.mxu2 %vm2146_vm1, %v5543_v7  ;;  %2485 = vmatmul.f32.gmra.mxu0 %v5559_v16  ;;  %v2265_v44 = vpop.f32.mrf.mxu0 }
 0x3ff   : > { %v5918_v18 = vpop.f32.mrf.mxu3 }
 0x400   : > { %2444 = vmatmul.f32.gmra.mxu3 %v5586_v61  ;;  %v5930_v61 = vpop.permute.xlu2 %2108 }
 0x401   : > { %v2365_v42 = vpop.f32.mrf.mxu2  ;;  %6484 = vst [vmem:[#allocation7_spill] sm:$0xff] %v5930_v61 }
 0x402   : > { %v2315_v58 = vpop.f32.mrf.mxu1  ;;  %v2366_v1 = vadd.f32 %v2365_v42, %v2313_v0  ;;  %v2213_v0 = vadd.f32 %v2212_v14, %v5930_v61 }
 0x403   : > { %v2316_v30 = vadd.f32 %v2315_v58, %v2263_v59 }
 0x404   : > { %2532 = vmatmul.f32.gmra.mxu1 %v5531_v11  ;;  %2826 = vst [vmem:[%s5898_s15 + $0x30] sm:$0xff] %v2366_v1  ;;  %v2266_v34 = vadd.f32 %v2265_v44, %v2213_v0  ;;  %v3535_v1 = vld [vmem:[#allocation2 + $0x20] sm:$0xff] }
 0x406   : > { %2983 = vmatmul.msk.f32.gmra.mxu2 %vm2146_vm1, %v5604_v19  ;;  %2488 = vmatmul.f32.gmra.mxu0 %v5618_v57  ;;  %v2268_v3 = vpop.f32.mrf.mxu0 }
 0x407   : > { %v5928_v32 = vpop.f32.mrf.mxu3 }
 0x408   : > { %2623 = vmatmul.f32.vlgmr.msrb.gmra.mxu3 %v3534_v28  ;;  %v5940_v28 = vpop.permute.xlu0 %2113 }
 0x409   : > { %v2368_v20 = vpop.f32.mrf.mxu2 }
 0x40a   : > { %v2318_v31 = vpop.f32.mrf.mxu1  ;;  %v2369_v42 = vadd.f32 %v2368_v20, %v2316_v30  ;;  %v2216_v30 = vadd.f32 %v5891_v43, %v5940_v28 }
 0x40b   : > { %v2319_v59 = vadd.f32 %v2318_v31, %v2266_v34  ;;  %v3536_v31 = vld [vmem:[#allocation2 + $0x40] sm:$0xff] }
 0x40c   : > { %2535 = vmatmul.f32.gmra.mxu1 %v5592_v23  ;;  %2829 = vst [vmem:[%s5898_s15 + $0x48] sm:$0xff] %v2369_v42  ;;  %v2269_v20 = vadd.f32 %v2268_v3, %v2216_v30 }
 0x40e   : > { %2984 = vmatmul.msk.f32.gmra.mxu2 %vm2146_vm1, %v5683_v63  ;;  %2491 = vmatmul.f32.gmra.mxu0 %v5672_v9  ;;  %v2271_v29 = vpop.f32.mrf.mxu0 }
 0x40f   : > { %v5938_v58 = vpop.f32.mrf.mxu3 }
 0x410   : > { %2626 = vmatmul.f32.gmra.mxu3 %v3535_v1  ;;  %v5951_v1 = vpop.permute.xlu1 %2118 }
 0x411   : > { %v2371_v14 = vpop.f32.mrf.mxu2 }
 0x412   : > { %v2321_v61 = vpop.f32.mrf.mxu1  ;;  %v2372_v44 = vadd.f32 %v2371_v14, %v2319_v59  ;;  %v2219_v59 = vadd.f32 %v5907_v6, %v5951_v1 }
 0x413   : > { %v2322_v34 = vadd.f32 %v2321_v61, %v2269_v20 }
 0x414   : > { %2538 = vmatmul.f32.gmra.mxu1 %v5659_v50  ;;  %2832 = vst [vmem:[%s5898_s15 + $0x60] sm:$0xff] %v2372_v44  ;;  %v2272_v30 = vadd.f32 %v2271_v29, %v2219_v59 }
 0x416   : > { %2985 = vmatmul.msk.f32.gmra.mxu2 %vm2146_vm1, %v5734_v2  ;;  %2494 = vmatmul.f32.gmra.mxu0 %v5723_v27  ;;  %v2274_v0 = vpop.f32.mrf.mxu0 }
 0x417   : > { %v5949_v42 = vpop.f32.mrf.mxu3 }
 0x418   : > { %2629 = vmatmul.f32.gmra.mxu3 %v3536_v31 }
 0x41a   : > { %v2374_v43 = vpop.f32.mrf.mxu2  ;;  %v2324_v14 = vpop.f32.mrf.mxu1 }
 0x41b   : > { %v2375_v3 = vadd.f32 %v2374_v43, %v2322_v34  ;;  %v2325_v20 = vadd.f32 %v2324_v14, %v2272_v30  ;;  %v5966_v34 = vpop.permute.xlu2 %2123 }
 0x41c   : > { %2541 = vmatmul.f32.gmra.mxu1 %v5762_v4  ;;  %v2222_v29 = vadd.f32 %v5918_v18, %v5966_v34 }
 0x41d   : > { %2835 = vst [vmem:[%s5898_s15 + $0x78] sm:$0xff] %v2375_v3 }
 0x41e   : > { %2986 = vmatmul.msk.f32.gmra.mxu2 %vm2146_vm1, %v5774_v12  ;;  %2497 = vmatmul.f32.gmra.mxu0 %v5772_v47  ;;  %v2277_v44 = vpop.f32.mrf.mxu0  ;;  %v2275_v3 = vadd.f32 %v2274_v0, %v2222_v29 }
 0x41f   : > { %v5961_v61 = vpop.f32.mrf.mxu3 }
 0x420   : > { %2632 = vmatmul.f32.gmra.mxu3 %v6463_v39 }
 0x422   : > { %v2377_v31 = vpop.f32.mrf.mxu2 }
 0x423   : > { %v2378_v6 = vadd.f32 %v2377_v31, %v2325_v20  ;;  %v2327_v59 = vpop.f32.mrf.mxu1 }
 0x424   : > { %2544 = vmatmul.f32.gmra.mxu1 %v5802_v36  ;;  %v2328_v14 = vadd.f32 %v2327_v59, %v2275_v3 }
 0x425   : > { %2838 = vst [vmem:[%s5898_s15 + $0x90] sm:$0xff] %v2378_v6 }
 0x426   : > { %2987 = vmatmul.msk.f32.gmra.mxu2 %vm2146_vm1, %v5809_v10  ;;  %2676 = vmatmul.f32.vlgmr.msrb.gmra.mxu0 %v6466_v37 }
 0x427   : > { %v2280_v39 = vpop.f32.mrf.mxu0  ;;  %v5973_v43 = vpop.f32.mrf.mxu3 }
 0x428   : > { %2635 = vmatmul.f32.gmra.mxu3 %v6467_v24  ;;  %v5982_v24 = vpop.permute.xlu0 %2128 }
 0x429   : > { %v2225_v0 = vadd.f32 %v5928_v32, %v5982_v24 }
 0x42b   : > { %v2278_v31 = vadd.f32 %v2277_v44, %v2225_v0 }
 0x42c   : > { %2547 = vmatmul.f32.gmra.mxu1 %v5826_v60 }
 0x42d   : > { %v2380_v30 = vpop.f32.mrf.mxu2 }
 0x42e   : > { %2988 = vmatmul.msk.f32.gmra.mxu2 %vm2146_vm1, %v5833_v51  ;;  %2679 = vmatmul.f32.gmra.mxu0 %v6469_v54  ;;  %v2381_v18 = vadd.f32 %v2380_v30, %v2328_v14  ;;  %v5995_v14 = vpop.permute.xlu1 %2133 }
 0x42f   : > { %v2283_v20 = vpop.f32.mrf.mxu0  ;;  %v5980_v37 = vpop.f32.mrf.mxu3 }
 0x430   : > { %2638 = vmatmul.f32.gmra.mxu3 %v6470_v33  ;;  %2841 = vst [vmem:[%s5898_s15 + $0xa8] sm:$0xff] %v2381_v18 }
 0x434   : > { %2550 = vmatmul.f32.gmra.mxu1 %v5847_v15 }
 0x435   : > { %v2330_v54 = vpop.f32.mrf.mxu1  ;;  %v2383_v29 = vpop.f32.mrf.mxu2 }
 0x436   : > { %2995 = vmatmul.msk.f32.vlgmr.msrb.gmra.mxu2 %vm2146_vm1, %v6471_v49  ;;  %v2331_v6 = vadd.f32 %v2330_v54, %v2278_v31  ;;  %2682 = vmatmul.f32.gmra.mxu0 %v6472_v48  ;;  %v2228_v49 = vadd.f32 %v5938_v58, %v5995_v14  ;;  %v6006_v31 = vpop.permute.xlu2 %2138 }
 0x437   : > { %v5992_v59 = vpop.f32.mrf.mxu3  ;;  %v2286_v3 = vpop.f32.mrf.mxu0 }
 0x438   : > { %2641 = vmatmul.f32.gmra.mxu3 %v6473_v35  ;;  %v2384_v33 = vadd.f32 %v2383_v29, %v2331_v6  ;;  %v2281_v48 = vadd.f32 %v2280_v39, %v2228_v49 }
 0x43a   : > { %2844 = vst [vmem:[%s5898_s15 + $0xc0] sm:$0xff] %v2384_v33 }
 0x43c   : > { %2732 = vmatmul.f32.vlgmr.msrb.gmra.mxu1 %v6475_v40 }
 0x43e   : > { %2996 = vmatmul.msk.f32.gmra.mxu2 %vm2146_vm1, %v5352_v52  ;;  %v2386_v32 = vpop.f32.mrf.mxu2  ;;  %2685 = vmatmul.f32.gmra.mxu0 %v5366_v21  ;;  %v2231_v52 = vadd.f32 %v5949_v42, %v6006_v31 }
 0x43f   : > { %v2333_v35 = vpop.f32.mrf.mxu1 }
 0x440   : > { %2644 = vmatmul.f32.gmra.mxu3 %v5387_v5  ;;  %v2334_v44 = vadd.f32 %v2333_v35, %v2281_v48  ;;  %v6004_v30 = vpop.f32.mrf.mxu3  ;;  %v2284_v21 = vadd.f32 %v2283_v20, %v2231_v52 }
 0x442   : > { %v2387_v18 = vadd.f32 %v2386_v32, %v2334_v44  ;;  %v2465_v0 = vpop.f32.mrf.mxu0 }
 0x444   : > { %2735 = vmatmul.f32.gmra.mxu1 %v6479_v26  ;;  %2847 = vst [vmem:[%s5898_s15 + $0xd8] sm:$0xff] %v2387_v18  ;;  %v6019_v26 = vpop.permute.xlu0 %2143 }
 0x446   : > { %2997 = vmatmul.msk.f32.gmra.mxu2 %vm2146_vm1, %v6476_v56  ;;  %2688 = vmatmul.f32.gmra.mxu0 %v6477_v55  ;;  %v2234_v56 = vadd.f32 %v5961_v61, %v6019_v26 }
 0x448   : > { %2647 = vmatmul.f32.gmra.mxu3 %v6478_v8  ;;  %v2389_v40 = vpop.f32.mrf.mxu2  ;;  %v2287_v55 = vadd.f32 %v2286_v3, %v2234_v56 }
 0x449   : > { %v2336_v5 = vpop.f32.mrf.mxu1 }
 0x44a   : > { %v2337_v58 = vadd.f32 %v2336_v5, %v2284_v21 }
 0x44b   : > { %v6016_v54 = vpop.f32.mrf.mxu3  ;;  %v2468_v6 = vpop.f32.mrf.mxu0 }
 0x44c   : > { %v2390_v39 = vadd.f32 %v2389_v40, %v2337_v58  ;;  %2738 = vmatmul.f32.gmra.mxu1 %v6480_v46 }
 0x44e   : > { %2850 = vst [vmem:[%s5898_s15 + $0xf0] sm:$0xff] %v2390_v39  ;;  %2998 = vmatmul.msk.f32.gmra.mxu2 %vm2146_vm1, %v5450_v38  ;;  %2691 = vmatmul.f32.gmra.mxu0 %v5463_v25  ;;  %v2413_v38 = vadd.f32 %v5973_v43, %v5882_v17 }
 0x450   : > { %2650 = vmatmul.f32.gmra.mxu3 %v5483_v45  ;;  %v2466_v25 = vadd.f32 %v2465_v0, %v2413_v38 }
 0x451   : > { %v2392_v8 = vpop.f32.mrf.mxu2  ;;  %v2339_v42 = vpop.f32.mrf.mxu1 }
 0x452   : > { %v2340_v20 = vadd.f32 %v2339_v42, %v2287_v55 }
 0x453   : > { %v6028_v29 = vpop.f32.mrf.mxu3  ;;  %v2471_v33 = vpop.f32.mrf.mxu0 }
 0x454   : > { %v2393_v46 = vadd.f32 %v2392_v8, %v2340_v20  ;;  %2741 = vmatmul.f32.gmra.mxu1 %v6482_v53 }
 0x456   : > { %2999 = vmatmul.msk.f32.gmra.mxu2 %vm2146_vm1, %v5497_v62  ;;  %2853 = vst [vmem:[%s5898_s15 + $0x108] sm:$0xff] %v2393_v46  ;;  %2694 = vmatmul.f32.gmra.mxu0 %v5509_v41  ;;  %v2416_v62 = vadd.f32 %v5980_v37, %v5893_v13 }
 0x458   : > { %2653 = vmatmul.f32.gmra.mxu3 %v5527_v22  ;;  %v2469_v41 = vadd.f32 %v2468_v6, %v2416_v62  ;;  %v6485_v22 = vld [vmem:[#allocation36_spill] sm:$0xff] }
 0x459   : > { %v2571_v45 = vpop.f32.mrf.mxu2  ;;  %v2518_v61 = vpop.f32.mrf.mxu1 }
 0x45a   : > { %v2519_v3 = vadd.f32 %v2518_v61, %v2466_v25 }
 0x45b   : > { %v6038_v49 = vpop.f32.mrf.mxu3  ;;  %v2474_v53 = vpop.f32.mrf.mxu0 }
 0x45c   : > { %v2572_v32 = vadd.f32 %v2571_v45, %v2519_v3  ;;  %2744 = vmatmul.f32.gmra.mxu1 %v5531_v11 }
 0x45e   : > { %3000 = vmatmul.msk.f32.gmra.mxu2 %vm2146_vm1, %v5543_v7  ;;  %2820 = vst [vmem:[%s5898_s15 + $0x8] sm:$0xff] %v2572_v32  ;;  %2697 = vmatmul.f32.gmra.mxu0 %v5559_v16  ;;  %v6486_v7 = vld [vmem:[#allocation10_spill] sm:$0xff] }
 0x45f   : > { %v2419_v37 = vadd.f32 %v5992_v59, %v6486_v7 }
 0x460   : > { %2656 = vmatmul.f32.gmra.mxu3 %v6485_v22 }
 0x461   : > { %v2574_v43 = vpop.f32.mrf.mxu2  ;;  %v2521_v48 = vpop.f32.mrf.mxu1  ;;  %v2472_v16 = vadd.f32 %v2471_v33, %v2419_v37 }
 0x462   : > { %v2522_v35 = vadd.f32 %v2521_v48, %v2469_v41 }
 0x463   : > { %v6048_v44 = vpop.f32.mrf.mxu3  ;;  %v2477_v11 = vpop.f32.mrf.mxu0 }
 0x464   : > { %v2575_v18 = vadd.f32 %v2574_v43, %v2522_v35  ;;  %2747 = vmatmul.f32.gmra.mxu1 %v5592_v23 }
 0x466   : > { %3001 = vmatmul.msk.f32.gmra.mxu2 %vm2146_vm1, %v5604_v19  ;;  %2824 = vst [vmem:[%s5898_s15 + $0x20] sm:$0xff] %v2575_v18  ;;  %2700 = vmatmul.f32.gmra.mxu0 %v5618_v57  ;;  %v6487_v19 = vld [vmem:[#allocation15_spill] sm:$0xff] }
 0x467   : > { %v2422_v59 = vadd.f32 %v6004_v30, %v6487_v19 }
 0x468   : > { %3006 = vmatmul.msk.f32.vlgmr.msra.gmra.mxu3 %vm2146_vm1, %v5833_v51 }
 0x469   : > { %v2577_v0 = vpop.f32.mrf.mxu2  ;;  %v2524_v52 = vpop.f32.mrf.mxu1  ;;  %v2475_v57 = vadd.f32 %v2474_v53, %v2422_v59 }
 0x46a   : > { %v2525_v21 = vadd.f32 %v2524_v52, %v2472_v16 }
 0x46b   : > { %v2436_v5 = vpop.f32.mrf.mxu3  ;;  %v2480_v23 = vpop.f32.mrf.mxu0 }
 0x46c   : > { %v2578_v40 = vadd.f32 %v2577_v0, %v2525_v21  ;;  %2750 = vmatmul.f32.gmra.mxu1 %v5659_v50  ;;  %v6488_v50 = vld [vmem:[#allocation7_spill] sm:$0xff]  ;;  %v2437_v18 = vadd.f32 %v2436_v5, %v5982_v24 }
 0x46e   : > { %3002 = vmatmul.msk.f32.gmra.mxu2 %vm2146_vm1, %v5683_v63  ;;  %2827 = vst [vmem:[%s5898_s15 + $0x38] sm:$0xff] %v2578_v40  ;;  %2703 = vmatmul.f32.gmra.mxu0 %v5672_v9  ;;  %v2425_v63 = vadd.f32 %v6016_v54, %v6488_v50 }
 0x470   : > { %v2478_v9 = vadd.f32 %v2477_v11, %v2425_v63 }
 0x471   : > { %v2580_v58 = vpop.f32.mrf.mxu2  ;;  %v2527_v51 = vpop.f32.mrf.mxu1 }
 0x472   : > { %v2528_v39 = vadd.f32 %v2527_v51, %v2475_v57 }
 0x473   : > { %v2483_v56 = vpop.f32.mrf.mxu0  ;;  %v2439_v55 = vpop.f32.mrf.mxu3 }
 0x474   : > { %v2581_v6 = vadd.f32 %v2580_v58, %v2528_v39  ;;  %2753 = vmatmul.f32.gmra.mxu1 %v5762_v4  ;;  %v2440_v21 = vadd.f32 %v2439_v55, %v5995_v14 }
 0x476   : > { %3003 = vmatmul.msk.f32.gmra.mxu2 %vm2146_vm1, %v5734_v2  ;;  %2830 = vst [vmem:[%s5898_s15 + $0x50] sm:$0xff] %v2581_v6  ;;  %2706 = vmatmul.f32.gmra.mxu0 %v5723_v27  ;;  %v2428_v2 = vadd.f32 %v6028_v29, %v5940_v28 }
 0x478   : > { %v2481_v27 = vadd.f32 %v2480_v23, %v2428_v2 }
 0x479   : > { %v2583_v30 = vpop.f32.mrf.mxu2  ;;  %v2530_v8 = vpop.f32.mrf.mxu1 }
 0x47a   : > { %v2531_v42 = vadd.f32 %v2530_v8, %v2478_v9 }
 0x47b   : > { %v2486_v46 = vpop.f32.mrf.mxu0  ;;  %v2442_v4 = vpop.f32.mrf.mxu3 }
 0x47c   : > { %v2584_v20 = vadd.f32 %v2583_v30, %v2531_v42  ;;  %2756 = vmatmul.f32.gmra.mxu1 %v5802_v36  ;;  %v3537_v36 = vld [vmem:[#allocation2 + $0x10] sm:$0xff]  ;;  %v2443_v6 = vadd.f32 %v2442_v4, %v6006_v31 }
 0x47e   : > { %3004 = vmatmul.msk.f32.gmra.mxu2 %vm2146_vm1, %v5774_v12  ;;  %2833 = vst [vmem:[%s5898_s15 + $0x68] sm:$0xff] %v2584_v20  ;;  %2709 = vmatmul.f32.gmra.mxu0 %v5772_v47  ;;  %v2431_v12 = vadd.f32 %v6038_v49, %v5951_v1 }
 0x480   : > { %v2484_v29 = vadd.f32 %v2483_v56, %v2431_v12 }
 0x481   : > { %v2586_v54 = vpop.f32.mrf.mxu2  ;;  %v2533_v33 = vpop.f32.mrf.mxu1 }
 0x482   : > { %v2534_v38 = vadd.f32 %v2533_v33, %v2481_v27 }
 0x483   : > { %v2489_v45 = vpop.f32.mrf.mxu0  ;;  %v2445_v61 = vpop.f32.mrf.mxu3 }
 0x484   : > { %v2587_v25 = vadd.f32 %v2586_v54, %v2534_v38  ;;  %2759 = vmatmul.f32.gmra.mxu1 %v5826_v60  ;;  %v2434_v60 = vadd.f32 %v6048_v44, %v5966_v34  ;;  %v2490_v11 = vadd.f32 %v2489_v45, %v2437_v18  ;;  %v2446_v20 = vadd.f32 %v2445_v61, %v6019_v26 }
 0x486   : > { %3005 = vmatmul.msk.f32.gmra.mxu2 %vm2146_vm1, %v5809_v10  ;;  %2836 = vst [vmem:[%s5898_s15 + $0x80] sm:$0xff] %v2587_v25  ;;  %2729 = vmatmul.f32.vlgmr.msra.gmra.mxu0 %v3537_v36  ;;  %v2487_v10 = vadd.f32 %v2486_v46, %v2434_v60 }
 0x489   : > { %v2589_v47 = vpop.f32.mrf.mxu2  ;;  %v2536_v3 = vpop.f32.mrf.mxu1 }
 0x48a   : > { %v2537_v32 = vadd.f32 %v2536_v3, %v2484_v29 }
 0x48b   : > { %v2492_v62 = vpop.f32.mrf.mxu0  ;;  %v2624_v43 = vpop.f32.mrf.mxu3 }
 0x48c   : > { %v2590_v53 = vadd.f32 %v2589_v47, %v2537_v32  ;;  %2762 = vmatmul.f32.gmra.mxu1 %v5847_v15  ;;  %v2493_v40 = vadd.f32 %v2492_v62, %v2440_v21  ;;  %v2625_v58 = vadd.f32 %v2624_v43, %v5882_v17 }
 0x48e   : > { %2839 = vst [vmem:[%s5898_s15 + $0x98] sm:$0xff] %v2590_v53 }
 0x491   : > { %v2592_v41 = vpop.f32.mrf.mxu2  ;;  %v2539_v49 = vpop.f32.mrf.mxu1 }
 0x492   : > { %v2540_v22 = vadd.f32 %v2539_v49, %v2487_v10 }
 0x493   : > { %v2495_v35 = vpop.f32.mrf.mxu0  ;;  %v2627_v44 = vpop.f32.mrf.mxu3 }
 0x494   : > { %v2593_v48 = vadd.f32 %v2592_v41, %v2540_v22  ;;  %v2496_v63 = vadd.f32 %v2495_v35, %v2443_v6  ;;  %v2628_v45 = vadd.f32 %v2627_v44, %v5893_v13 }
 0x496   : > { %2842 = vst [vmem:[%s5898_s15 + $0xb0] sm:$0xff] %v2593_v48 }
 0x499   : > { %v2595_v37 = vpop.f32.mrf.mxu2  ;;  %v2542_v16 = vpop.f32.mrf.mxu1 }
 0x49a   : > { %v2543_v15 = vadd.f32 %v2542_v16, %v2490_v11 }
 0x49b   : > { %v2498_v52 = vpop.f32.mrf.mxu0  ;;  %v2630_v56 = vpop.f32.mrf.mxu3 }
 0x49c   : > { %v2596_v0 = vadd.f32 %v2595_v37, %v2543_v15  ;;  %v2499_v46 = vadd.f32 %v2498_v52, %v2446_v20  ;;  %v2631_v53 = vadd.f32 %v2630_v56, %v6486_v7 }
 0x49e   : > { %2845 = vst [vmem:[%s5898_s15 + $0xc8] sm:$0xff] %v2596_v0 }
 0x4a1   : > { %v2598_v23 = vpop.f32.mrf.mxu2  ;;  %v2545_v59 = vpop.f32.mrf.mxu1 }
 0x4a2   : > { %v2546_v57 = vadd.f32 %v2545_v59, %v2493_v40 }
 0x4a3   : > { %v2677_v51 = vpop.f32.mrf.mxu0  ;;  %v2633_v2 = vpop.f32.mrf.mxu3 }
 0x4a4   : > { %v2599_v5 = vadd.f32 %v2598_v23, %v2546_v57  ;;  %v6095_v39 = vadd.f32 %v2677_v51, %v2625_v58  ;;  %v2634_v43 = vadd.f32 %v2633_v2, %v6487_v19 }
 0x4a6   : > { %2848 = vst [vmem:[%s5898_s15 + $0xe0] sm:$0xff] %v2599_v5 }
 0x4a9   : > { %v2601_v9 = vpop.f32.mrf.mxu2  ;;  %v2548_v55 = vpop.f32.mrf.mxu1 }
 0x4aa   : > { %v2549_v30 = vadd.f32 %v2548_v55, %v2496_v63 }
 0x4ab   : > { %v2680_v42 = vpop.f32.mrf.mxu0  ;;  %v2636_v12 = vpop.f32.mrf.mxu3 }
 0x4ac   : > { %v2602_v8 = vadd.f32 %v2601_v9, %v2549_v30  ;;  %v2681_v29 = vadd.f32 %v2680_v42, %v2628_v45  ;;  %v2637_v15 = vadd.f32 %v2636_v12, %v6488_v50 }
 0x4ae   : > { %2851 = vst [vmem:[%s5898_s15 + $0xf8] sm:$0xff] %v2602_v8 }
 0x4b1   : > { %v2604_v17 = vpop.f32.mrf.mxu2  ;;  %v2551_v27 = vpop.f32.mrf.mxu1 }
 0x4b2   : > { %v2552_v54 = vadd.f32 %v2551_v27, %v2499_v46 }
 0x4b3   : > { %v2683_v4 = vpop.f32.mrf.mxu0  ;;  %v2639_v60 = vpop.f32.mrf.mxu3 }
 0x4b4   : > { %v2605_v33 = vadd.f32 %v2604_v17, %v2552_v54  ;;  %v2684_v10 = vadd.f32 %v2683_v4, %v2631_v53  ;;  %v2640_v59 = vadd.f32 %v2639_v60, %v5940_v28 }
 0x4b6   : > { %2854 = vst [vmem:[%s5898_s15 + $0x110] sm:$0xff] %v2605_v33 }
 0x4b9   : > { %v6102_v38 = vpop.f32.mrf.mxu2  ;;  %v2733_v25 = vpop.f32.mrf.mxu1 }
 0x4ba   : > { %v2734_v47 = vadd.f32 %v2733_v25, %v2681_v29 }
 0x4bb   : > { %v2686_v36 = vpop.f32.mrf.mxu0  ;;  %v2642_v18 = vpop.f32.mrf.mxu3 }
 0x4bc   : > { %v2687_v35 = vadd.f32 %v2686_v36, %v2634_v43  ;;  %v2643_v56 = vadd.f32 %v2642_v18, %v5951_v1 }
 0x4c1   : > { %v2786_v61 = vpop.f32.mrf.mxu2  ;;  %v2736_v3 = vpop.f32.mrf.mxu1 }
 0x4c2   : > { %v2787_v32 = vadd.f32 %v2786_v61, %v2734_v47  ;;  %v2737_v41 = vadd.f32 %v2736_v3, %v2684_v10 }
 0x4c3   : > { %v2689_v62 = vpop.f32.mrf.mxu0  ;;  %v2645_v19 = vpop.f32.mrf.mxu3 }
 0x4c4   : > { %2825 = vst.msk [vmem:[%s5898_s15 + $0x28] sm:$0xff] %vm2821_vm4, %v2787_v32  ;;  %v2690_v52 = vadd.f32 %v2689_v62, %v2637_v15  ;;  %v2646_v20 = vadd.f32 %v2645_v19, %v5966_v34 }
 0x4c9   : > { %v2789_v49 = vpop.f32.mrf.mxu2  ;;  %v2739_v13 = vpop.f32.mrf.mxu1 }
 0x4ca   : > { %v2790_v22 = vadd.f32 %v2789_v49, %v2737_v41  ;;  %v2740_v11 = vadd.f32 %v2739_v13, %v2687_v35 }
 0x4cb   : > { %v2692_v48 = vpop.f32.mrf.mxu0  ;;  %v2648_v63 = vpop.f32.mrf.mxu3 }
 0x4cc   : > { %2828 = vst.msk [vmem:[%s5898_s15 + $0x40] sm:$0xff] %vm2821_vm4, %v2790_v22  ;;  %v2693_v58 = vadd.f32 %v2692_v48, %v2640_v59  ;;  %v2649_v4 = vadd.f32 %v2648_v63, %v5982_v24 }
 0x4d1   : > { %v2792_v7 = vpop.f32.mrf.mxu2  ;;  %v2742_v37 = vpop.f32.mrf.mxu1 }
 0x4d2   : > { %v2793_v16 = vadd.f32 %v2792_v7, %v2740_v11  ;;  %v2743_v44 = vadd.f32 %v2742_v37, %v2690_v52 }
 0x4d3   : > { %v2695_v0 = vpop.f32.mrf.mxu0  ;;  %v2651_v17 = vpop.f32.mrf.mxu3 }
 0x4d4   : > { %2831 = vst.msk [vmem:[%s5898_s15 + $0x58] sm:$0xff] %vm2821_vm4, %v2793_v16  ;;  %v2696_v55 = vadd.f32 %v2695_v0, %v2643_v56  ;;  %v2652_v61 = vadd.f32 %v2651_v17, %v5995_v14 }
 0x4d9   : > { %v2795_v21 = vpop.f32.mrf.mxu2  ;;  %v2745_v40 = vpop.f32.mrf.mxu1 }
 0x4da   : > { %v2796_v23 = vadd.f32 %v2795_v21, %v2743_v44  ;;  %v2746_v5 = vadd.f32 %v2745_v40, %v2693_v58 }
 0x4db   : > { %v2698_v57 = vpop.f32.mrf.mxu0  ;;  %v2654_v12 = vpop.f32.mrf.mxu3 }
 0x4dc   : > { %2834 = vst.msk [vmem:[%s5898_s15 + $0x70] sm:$0xff] %vm2821_vm4, %v2796_v23  ;;  %v2699_v2 = vadd.f32 %v2698_v57, %v2646_v20  ;;  %v2655_v41 = vadd.f32 %v2654_v12, %v6006_v31 }
 0x4e1   : > { %v2798_v51 = vpop.f32.mrf.mxu2  ;;  %v2748_v50 = vpop.f32.mrf.mxu1 }
 0x4e2   : > { %v2799_v6 = vadd.f32 %v2798_v51, %v2746_v5  ;;  %v2749_v30 = vadd.f32 %v2748_v50, %v2696_v55 }
 0x4e3   : > { %v2701_v9 = vpop.f32.mrf.mxu0  ;;  %v2657_v24 = vpop.f32.mrf.mxu3 }
 0x4e4   : > { %2837 = vst.msk [vmem:[%s5898_s15 + $0x88] sm:$0xff] %vm2821_vm4, %v2799_v6  ;;  %v2702_v45 = vadd.f32 %v2701_v9, %v2649_v4  ;;  %v2658_v22 = vadd.f32 %v2657_v24, %v6019_v26 }
 0x4e9   : > { %v2801_v8 = vpop.f32.mrf.mxu2  ;;  %v2751_v28 = vpop.f32.mrf.mxu1 }
 0x4ea   : > { %v2802_v42 = vadd.f32 %v2801_v8, %v2749_v30  ;;  %v2752_v27 = vadd.f32 %v2751_v28, %v2699_v2 }
 0x4eb   : > { %v2704_v46 = vpop.f32.mrf.mxu0  ;;  %v2816_v37 = vpop.f32.mrf.mxu3 }
 0x4ec   : > { %2840 = vst.msk [vmem:[%s5898_s15 + $0xa0] sm:$0xff] %vm2821_vm4, %v2802_v42  ;;  %v2705_v32 = vadd.f32 %v2704_v46, %v2652_v61 }
 0x4f1   : > { %v2804_v1 = vpop.f32.mrf.mxu2  ;;  %v2754_v54 = vpop.f32.mrf.mxu1 }
 0x4f2   : > { %v2805_v33 = vadd.f32 %v2804_v1, %v2752_v27  ;;  %v2755_v36 = vadd.f32 %v2754_v54, %v2702_v45 }
 0x4f3   : > { %v2707_v25 = vpop.f32.mrf.mxu0 }
 0x4f4   : > { %2843 = vst.msk [vmem:[%s5898_s15 + $0xb8] sm:$0xff] %vm2821_vm4, %v2805_v33  ;;  %v2708_v13 = vadd.f32 %v2707_v25, %v2655_v41 }
 0x4f9   : > { %v2807_v34 = vpop.f32.mrf.mxu2  ;;  %v2757_v29 = vpop.f32.mrf.mxu1 }
 0x4fa   : > { %v2808_v47 = vadd.f32 %v2807_v34, %v2755_v36  ;;  %v2758_v53 = vadd.f32 %v2757_v29, %v2705_v32 }
 0x4fb   : > { %v2710_v3 = vpop.f32.mrf.mxu0 }
 0x4fc   : > { %2846 = vst.msk [vmem:[%s5898_s15 + $0xd0] sm:$0xff] %vm2821_vm4, %v2808_v47  ;;  %v2711_v35 = vadd.f32 %v2710_v3, %v2658_v22 }
 0x501   : > { %v2810_v62 = vpop.f32.mrf.mxu2  ;;  %v2760_v60 = vpop.f32.mrf.mxu1 }
 0x502   : > { %v2811_v10 = vadd.f32 %v2810_v62, %v2758_v53  ;;  %v2761_v43 = vadd.f32 %v2760_v60, %v2708_v13 }
 0x503   : > { %v2730_v49 = vpop.f32.mrf.mxu0 }
 0x504   : > { %2849 = vst.msk [vmem:[%s5898_s15 + $0xe8] sm:$0xff] %vm2821_vm4, %v2811_v10  ;;  %v2731_v14 = vadd.f32 %v2730_v49, %v6095_v39 }
 0x506   : > { %v2784_v48 = vadd.f32 %v6102_v38, %v2731_v14 }
 0x508   : > { %2822 = vst.msk [vmem:[%s5898_s15 + $0x10] sm:$0xff] %vm2821_vm4, %v2784_v48 }
 0x509   : > { %v2813_v18 = vpop.f32.mrf.mxu2  ;;  %v2763_v11 = vpop.f32.mrf.mxu1 }
 0x50a   : > { %v2814_v7 = vadd.f32 %v2813_v18, %v2761_v43  ;;  %v2764_v31 = vadd.f32 %v2763_v11, %v2711_v35 }
 0x50c   : > { %2852 = vst.msk [vmem:[%s5898_s15 + $0x100] sm:$0xff] %vm2821_vm4, %v2814_v7  ;;  %v2817_v16 = vadd.f32 %v2816_v37, %v2764_v31 }
 0x50e   : > { %2855 = vst.msk [vmem:[%s5898_s15 + $0x118] sm:$0xff] %vm2821_vm4, %v2817_v16 }
 0x50f PF: > { %s17_s21 = sadd.s32 1, %s3578_s21  }
 0x510   : > { %p14_p7 = scmp.ge.s32.totalorder %s17_s21, 4  }
 0x512   :  { %16 = sbr.rel (!%p14_p7) target bundleno = 1 (0x1), region = 89 }
 0x517   :  { %2877 = vsyncpa [#allocation3], 1 }
 0x518   :  { %2879 = vsyncpa [#allocation3 + $0x1], 1 }

</bundles_post_ra>
